<compile_context>
chip_gen: v7x
topology: tpu7x:2x2x1
jax: 0.10.0
libtpu: 0.0.40
codegen_flags: <defaults>
</compile_context>

<pallas_src>
import functools

import numpy as np
import jax
import jax.numpy as jnp
from jax.experimental import pallas as pl
from jax.experimental.pallas import tpu as pltpu


# ----------------------------------------------------------------------------
# host-side helpers (glue, no compute)
# ----------------------------------------------------------------------------
def _largest_divisor(n, target, multiple=1):
    """Largest d <= target with n % d == 0 and d % multiple == 0 (fallback: n itself)."""
    if n <= target:
        return n
    for d in range(target, 0, -1):
        if n % d == 0 and d % multiple == 0:
            return d
    return n


def regroup_static(x, record_len, max_len):
    """torch.tensor_split(record_len) + zero padding to a fixed agent dim.

    record_len is static host data (as in the PyTorch module, where it drives tensor_split).
    Returns (B, L, C, H, W) features and a (B, L) int32 validity mask.
    """
    # TODO(synk): truly dynamic per-batch agent counts would need scalar-prefetched offsets instead
    # of host-static padding.
    feats, mask_rows = [], []
    idx = 0
    for rl in record_len:
        f = x[idx:idx + rl]
        idx += rl
        pad = max_len - rl
        if pad > 0:
            f = jnp.concatenate([f, jnp.zeros((pad,) + x.shape[1:], x.dtype)], axis=0)
        feats.append(f)
        mask_rows.append([1] * rl + [0] * pad)
    return jnp.stack(feats, axis=0), jnp.asarray(mask_rows, jnp.int32)


def make_source_coords(theta, H, W):
    """F.affine_grid + F.grid_sample source-pixel coordinates (align_corners=False)."""
    xs = (2.0 * jnp.arange(W, dtype=jnp.float32) + 1.0) / W - 1.0
    ys = (2.0 * jnp.arange(H, dtype=jnp.float32) + 1.0) / H - 1.0
    xg, yg = jnp.meshgrid(xs, ys, indexing='xy')            # (H, W)
    t = theta[..., None, None]                               # (B, L, 2, 3, 1, 1)
    gx = t[:, :, 0, 0] * xg + t[:, :, 0, 1] * yg + t[:, :, 0, 2]
    gy = t[:, :, 1, 0] * xg + t[:, :, 1, 1] * yg + t[:, :, 1, 2]
    ix = ((gx + 1.0) * W - 1.0) * 0.5
    iy = ((gy + 1.0) * H - 1.0) * 0.5
    return ix, iy                                            # (B, L, H, W) unnormalized src coords


# ----------------------------------------------------------------------------
# Pallas kernel 1: bilinear affine warp (warp_affine_simple)
#   - the 4 bilinear corners are merged into ONE weighted one-hot gather matrix,
#     then a single (C, HW) x (HW, HW) matmul per item (4x fewer MXU pushes),
#   - several (b, l) items are processed per grid step to amortize per-step overhead.
# ----------------------------------------------------------------------------
def warp_kernel(src_ref, ix_ref, iy_ref, o_ref, *, H, W):
    HW = H * W
    iota_src = jax.lax.broadcasted_iota(jnp.int32, (HW, HW), 0)     # row = source flat index
    BB = src_ref.shape[0]
    for b in range(BB):                                             # static unroll over batched items
        ix = ix_ref[b]                                              # (1, HW)
        iy = iy_ref[b]                                              # (1, HW)
        x0f = jnp.floor(ix)
        y0f = jnp.floor(iy)
        wx1 = ix - x0f
        wx0 = 1.0 - wx1
        wy1 = iy - y0f
        wy0 = 1.0 - wy1
        x0 = x0f.astype(jnp.int32)
        y0 = y0f.astype(jnp.int32)
        x1 = x0 + 1
        y1 = y0 + 1
        gather = jnp.zeros((HW, HW), jnp.float32)
        for xc, yc, w in ((x0, y0, wx0 * wy0), (x1, y0, wx1 * wy0),
                          (x0, y1, wx0 * wy1), (x1, y1, wx1 * wy1)):
            valid = ((xc >= 0) & (xc <= W - 1) &
                     (yc >= 0) & (yc <= H - 1)).astype(jnp.float32)
            idx = jnp.clip(yc, 0, H - 1) * W + jnp.clip(xc, 0, W - 1)          # (1, HW)
            gather = gather + (w * valid) * (iota_src == idx).astype(jnp.float32)
        # single MXU matmul per item: (C, HW_src) @ (HW_src, HW_out)
        o_ref[b] = jnp.dot(src_ref[b], gather, preferred_element_type=jnp.float32)


def warp_affine_pallas(feat, ix, iy, *, batch_target=2):
    """feat: (B, L, C, H, W); ix/iy: (B, L, H, W) -> warped (B, L, C, H, W)."""
    # TODO(synk): the (HW, HW) gather matrix is O(HW^2) VMEM; for large BEV maps tile the output
    # HW dimension or switch to a DMA row gather.
    B, L, C, H, W = feat.shape
    BL, HW = B * L, H * W
    src = feat.reshape(BL, C, HW)
    ixf = ix.reshape(BL, 1, HW).astype(jnp.float32)
    iyf = iy.reshape(BL, 1, HW).astype(jnp.float32)
    BB = _largest_divisor(BL, batch_target)
    out = pl.pallas_call(
        functools.partial(warp_kernel, H=H, W=W),
        out_shape=jax.ShapeDtypeStruct((BL, C, HW), jnp.float32),
        grid=(BL // BB,),
        in_specs=[pl.BlockSpec((BB, C, HW), lambda i: (i, 0, 0)),
                  pl.BlockSpec((BB, 1, HW), lambda i: (i, 0, 0)),
                  pl.BlockSpec((BB, 1, HW), lambda i: (i, 0, 0))],
        out_specs=pl.BlockSpec((BB, C, HW), lambda i: (i, 0, 0)),
        compiler_params=pltpu.CompilerParams(
            dimension_semantics=("parallel",),
            vmem_limit_bytes=32 * 1024 * 1024),
    )(src, ixf, iyf)
    return out.reshape(B, L, C, H, W)


# ----------------------------------------------------------------------------
# Pallas kernel 2: per-pixel ScaledDotProductAttention across agents (ego query only)
#   x block: (1, L, TP, C) with C on the lane axis; output (1, TP, C) lane-dense.
#   The (B, L) agent-validity mask is scalar-prefetched into SMEM.
# ----------------------------------------------------------------------------
def att_fusion_kernel(mask_ref, x_ref, o_ref, *, L, scale):
    b = pl.program_id(0)
    xs = [x_ref[0, l] for l in range(L)]                        # each (TP, C)
    ego = xs[0]                                                 # ego agent is always index 0
    neg = jnp.float32(-1e30)                                    # finite "masked" score (no -inf NaNs)

    scores = []
    for l in range(L):
        s = jnp.sum(ego * xs[l], axis=-1, keepdims=True) * scale      # (TP, 1)
        valid = mask_ref[b, l].astype(jnp.float32)                    # 0/1 scalar from SMEM
        scores.append(s * valid + (1.0 - valid) * neg)

    m = scores[0]
    for l in range(1, L):
        m = jnp.maximum(m, scores[l])
    ps = [jnp.exp(s - m) for s in scores]
    den = ps[0]
    for l in range(1, L):
        den = den + ps[l]
    inv = pl.reciprocal(den, approx=True)                       # EUP, frees the VALU divide

    acc = (ps[0] * inv) * xs[0]
    for l in range(1, L):
        acc = acc + (ps[l] * inv) * xs[l]
    o_ref[0] = acc


def att_fusion_pallas(xw, mask, *, tile_target=512):
    """xw: (B, L, P, C) warped features, mask: (B, L) int32 -> (B, P, C) ego context."""
    B, L, P, C = xw.shape
    TP = _largest_divisor(P, tile_target, multiple=8)
    grid = (B, P // TP)
    grid_spec = pltpu.PrefetchScalarGridSpec(
        num_scalar_prefetch=1,                                   # (B, L) mask lands in SMEM
        grid=grid,
        in_specs=[pl.BlockSpec((1, L, TP, C), lambda b, p, m: (b, 0, p, 0))],
        out_specs=pl.BlockSpec((1, TP, C), lambda b, p, m: (b, p, 0)),
    )
    return pl.pallas_call(
        functools.partial(att_fusion_kernel, L=L, scale=float(1.0 / np.sqrt(C))),
        out_shape=jax.ShapeDtypeStruct((B, P, C), jnp.float32),
        grid_spec=grid_spec,
        compiler_params=pltpu.CompilerParams(
            dimension_semantics=("parallel", "parallel"),
            vmem_limit_bytes=32 * 1024 * 1024),
    )(mask, xw)


# ----------------------------------------------------------------------------
# Full AttFusion forward
# ----------------------------------------------------------------------------
def att_fusion_forward(x, record_len, affine_matrix):
    _, C, H, W = x.shape
    B, L = affine_matrix.shape[:2]

    feat, mask = regroup_static(x, record_len, L)            # (B, L, C, H, W), (B, L)
    theta = affine_matrix[:, 0]                              # warp every agent into the ego frame
    ix, iy = make_source_coords(theta, H, W)
    warped = warp_affine_pallas(feat, ix, iy)                # (B, L, C, H, W)

    xw = warped.reshape(B, L, C, H * W).transpose(0, 1, 3, 2)   # (B, L, P, C)  C on lanes
    fused = att_fusion_pallas(xw, mask)                      # (B, P, C) ego context per pixel
    return fused.reshape(B, H, W, C).transpose(0, 3, 1, 2)   # (B, C, H, W)


# ----------------------------------------------------------------------------
# pure-jnp reference (mirrors the PyTorch module) for a sanity check
# ----------------------------------------------------------------------------
def reference_forward(x, record_len, affine_matrix):
    _, C, H, W = x.shape
    B, L = affine_matrix.shape[:2]
    HW = H * W
    feat, mask = regroup_static(x, record_len, L)
    theta = affine_matrix[:, 0]
    ix, iy = make_source_coords(theta, H, W)
    src = feat.reshape(B, L, C, HW)
    ixf = ix.reshape(B, L, 1, HW)
    iyf = iy.reshape(B, L, 1, HW)
    x0 = jnp.floor(ixf)
    y0 = jnp.floor(iyf)
    warped = jnp.zeros_like(src)
    for dx in (0, 1):
        for dy in (0, 1):
            xc = x0 + dx
            yc = y0 + dy
            w = (1.0 - jnp.abs(ixf - xc)) * (1.0 - jnp.abs(iyf - yc))
            valid = ((xc >= 0) & (xc <= W - 1) &
                     (yc >= 0) & (yc <= H - 1)).astype(jnp.float32)
            idx = (jnp.clip(yc, 0, H - 1) * W + jnp.clip(xc, 0, W - 1)).astype(jnp.int32)
            g = jnp.take_along_axis(src, jnp.broadcast_to(idx, src.shape), axis=-1)
            warped = warped + (w * valid) * g
    xs = warped.transpose(0, 3, 1, 2)                                   # (B, HW, L, C)
    scores = jnp.einsum('bplc,bpmc->bplm', xs, xs,
                        precision=jax.lax.Precision.HIGHEST) / np.sqrt(C)
    scores = jnp.where(mask[:, None, None, :] > 0, scores, -1e30)
    attn = jax.nn.softmax(scores, axis=-1)
    ctx = jnp.einsum('bplm,bpmc->bplc', attn, xs,
                     precision=jax.lax.Precision.HIGHEST)
    ego = ctx[:, :, 0, :]                                               # (B, HW, C)
    return ego.reshape(B, H, W, C).transpose(0, 3, 1, 2)


# ----------------------------------------------------------------------------
if __name__ == "__main__":
    # C = 128 keeps the channel axis lane-dense (full 128-lane stores); H = W = 16 -> HW = 256.
    C, H, W = 128, 16, 16
    record_len = [2, 1]                     # agents per sample (static host data)
    B = len(record_len)
    L = max(record_len)                     # padded agent dim (affine_matrix has shape (B, L, L, 2, 3))

    key = jax.random.PRNGKey(0)
    x = jax.random.normal(key, (sum(record_len), C, H, W), jnp.float32)

    affine = np.zeros((B, L, L, 2, 3), np.float32)
    for b in range(B):
        for i in range(L):
            for j in range(L):
                ang = 0.05 * (j - i)
                affine[b, i, j, 0, 0] = np.cos(ang)
                affine[b, i, j, 0, 1] = -np.sin(ang)
                affine[b, i, j, 1, 0] = np.sin(ang)
                affine[b, i, j, 1, 1] = np.cos(ang)
                affine[b, i, j, 0, 2] = 0.10 * (j - i)
                affine[b, i, j, 1, 2] = -0.05 * (j - i)
    affine_matrix = jnp.asarray(affine)

    out = att_fusion_forward(x, record_len, affine_matrix)
    out = jax.block_until_ready(out)

    assert out.shape == (B, C, H, W), out.shape
    assert bool(jnp.all(jnp.isfinite(out)))

    ref = reference_forward(x, record_len, affine_matrix)
    err = float(jnp.max(jnp.abs(out - ref)))
    assert err < 1e-1, f"max abs error vs reference: {err}"

    print("KERNEL_OK")
</pallas_src>

<mosaic_0001>
module attributes {stable_mosaic.version = 11 : i64} {
  func.func @warp_kernel(%arg0: i32, %arg1: memref<2x128x256xf32, #tpu.memory_space<vmem>>, %arg2: memref<2x1x256xf32, #tpu.memory_space<vmem>>, %arg3: memref<2x1x256xf32, #tpu.memory_space<vmem>>, %arg4: memref<2x128x256xf32, #tpu.memory_space<vmem>>) attributes {dimension_semantics = [#tpu.dimension_semantics<parallel>], iteration_bounds = array<i64: 2>, scalar_prefetch = 0 : i64, scratch_operands = 0 : i64, tpu.core_type = #tpu.core_type<tc>, window_params = [{transform_indices = @transform_0, window_bounds = array<i64: 2, 128, 256>}, {transform_indices = @transform_1, window_bounds = array<i64: 2, 1, 256>}, {transform_indices = @transform_2, window_bounds = array<i64: 2, 1, 256>}, {transform_indices = @transform_3, window_bounds = array<i64: 2, 128, 256>}]} {
    %0 = tpu.iota {dimensions = array<i32: 0>} : vector<256x256xi32>
    %c0 = arith.constant 0 : index
    %c0_0 = arith.constant 0 : index
    %c0_1 = arith.constant 0 : index
    %1 = vector.load %arg2[%c0, %c0_0, %c0_1] : memref<2x1x256xf32, #tpu.memory_space<vmem>>, vector<1x1x256xf32>
    %2 = vector.shape_cast %1 : vector<1x1x256xf32> to vector<1x256xf32>
    %c0_2 = arith.constant 0 : index
    %c0_3 = arith.constant 0 : index
    %c0_4 = arith.constant 0 : index
    %3 = vector.load %arg3[%c0_2, %c0_3, %c0_4] : memref<2x1x256xf32, #tpu.memory_space<vmem>>, vector<1x1x256xf32>
    %4 = vector.shape_cast %3 : vector<1x1x256xf32> to vector<1x256xf32>
    %5 = math.floor %2 : vector<1x256xf32>
    %6 = math.floor %4 : vector<1x256xf32>
    %7 = arith.subf %2, %5 : vector<1x256xf32>
    %cst = arith.constant 1.000000e+00 : f32
    %8 = vector.broadcast %cst : f32 to vector<1x256xf32>
    %9 = arith.subf %8, %7 : vector<1x256xf32>
    %10 = arith.subf %4, %6 : vector<1x256xf32>
    %cst_5 = arith.constant 1.000000e+00 : f32
    %11 = vector.broadcast %cst_5 : f32 to vector<1x256xf32>
    %12 = arith.subf %11, %10 : vector<1x256xf32>
    %13 = arith.fptosi %5 : vector<1x256xf32> to vector<1x256xi32>
    %14 = arith.fptosi %6 : vector<1x256xf32> to vector<1x256xi32>
    %c1_i32 = arith.constant 1 : i32
    %15 = vector.broadcast %c1_i32 : i32 to vector<1x256xi32>
    %16 = arith.addi %13, %15 : vector<1x256xi32>
    %c1_i32_6 = arith.constant 1 : i32
    %17 = vector.broadcast %c1_i32_6 : i32 to vector<1x256xi32>
    %18 = arith.addi %14, %17 : vector<1x256xi32>
    %cst_7 = arith.constant 0.000000e+00 : f32
    %19 = vector.broadcast %cst_7 : f32 to vector<256x256xf32>
    %20 = arith.mulf %9, %12 : vector<1x256xf32>
    %21 = arith.mulf %7, %12 : vector<1x256xf32>
    %22 = arith.mulf %9, %10 : vector<1x256xf32>
    %23 = arith.mulf %7, %10 : vector<1x256xf32>
    %c0_i32 = arith.constant 0 : i32
    %24 = vector.broadcast %c0_i32 : i32 to vector<1x256xi32>
    %25 = arith.cmpi sge, %13, %24 : vector<1x256xi32>
    %c15_i32 = arith.constant 15 : i32
    %26 = vector.broadcast %c15_i32 : i32 to vector<1x256xi32>
    %27 = arith.cmpi sle, %13, %26 : vector<1x256xi32>
    %28 = arith.andi %25, %27 : vector<1x256xi1>
    %c0_i32_8 = arith.constant 0 : i32
    %29 = vector.broadcast %c0_i32_8 : i32 to vector<1x256xi32>
    %30 = arith.cmpi sge, %14, %29 : vector<1x256xi32>
    %31 = arith.andi %28, %30 : vector<1x256xi1>
    %c15_i32_9 = arith.constant 15 : i32
    %32 = vector.broadcast %c15_i32_9 : i32 to vector<1x256xi32>
    %33 = arith.cmpi sle, %14, %32 : vector<1x256xi32>
    %34 = arith.andi %31, %33 : vector<1x256xi1>
    %35 = arith.extui %34 : vector<1x256xi1> to vector<1x256xi32>
    %36 = arith.sitofp %35 : vector<1x256xi32> to vector<1x256xf32>
    %c0_i32_10 = arith.constant 0 : i32
    %c15_i32_11 = arith.constant 15 : i32
    %37 = vector.broadcast %c0_i32_10 : i32 to vector<1x256xi32>
    %38 = arith.maxsi %37, %14 : vector<1x256xi32>
    %39 = vector.broadcast %c15_i32_11 : i32 to vector<1x256xi32>
    %40 = arith.minsi %39, %38 : vector<1x256xi32>
    %c16_i32 = arith.constant 16 : i32
    %41 = vector.broadcast %c16_i32 : i32 to vector<1x256xi32>
    %42 = arith.muli %40, %41 : vector<1x256xi32>
    %c0_i32_12 = arith.constant 0 : i32
    %c15_i32_13 = arith.constant 15 : i32
    %43 = vector.broadcast %c0_i32_12 : i32 to vector<1x256xi32>
    %44 = arith.maxsi %43, %13 : vector<1x256xi32>
    %45 = vector.broadcast %c15_i32_13 : i32 to vector<1x256xi32>
    %46 = arith.minsi %45, %44 : vector<1x256xi32>
    %47 = arith.addi %42, %46 : vector<1x256xi32>
    %48 = arith.mulf %20, %36 : vector<1x256xf32>
    %49 = vector.broadcast %47 : vector<1x256xi32> to vector<256x256xi32>
    %50 = arith.cmpi eq, %0, %49 : vector<256x256xi32>
    %51 = arith.extui %50 : vector<256x256xi1> to vector<256x256xi32>
    %52 = arith.sitofp %51 : vector<256x256xi32> to vector<256x256xf32>
    %53 = vector.broadcast %48 : vector<1x256xf32> to vector<256x256xf32>
    %54 = arith.mulf %53, %52 : vector<256x256xf32>
    %55 = arith.addf %19, %54 : vector<256x256xf32>
    %c0_i32_14 = arith.constant 0 : i32
    %56 = vector.broadcast %c0_i32_14 : i32 to vector<1x256xi32>
    %57 = arith.cmpi sge, %16, %56 : vector<1x256xi32>
    %c15_i32_15 = arith.constant 15 : i32
    %58 = vector.broadcast %c15_i32_15 : i32 to vector<1x256xi32>
    %59 = arith.cmpi sle, %16, %58 : vector<1x256xi32>
    %60 = arith.andi %57, %59 : vector<1x256xi1>
    %c0_i32_16 = arith.constant 0 : i32
    %61 = vector.broadcast %c0_i32_16 : i32 to vector<1x256xi32>
    %62 = arith.cmpi sge, %14, %61 : vector<1x256xi32>
    %63 = arith.andi %60, %62 : vector<1x256xi1>
    %c15_i32_17 = arith.constant 15 : i32
    %64 = vector.broadcast %c15_i32_17 : i32 to vector<1x256xi32>
    %65 = arith.cmpi sle, %14, %64 : vector<1x256xi32>
    %66 = arith.andi %63, %65 : vector<1x256xi1>
    %67 = arith.extui %66 : vector<1x256xi1> to vector<1x256xi32>
    %68 = arith.sitofp %67 : vector<1x256xi32> to vector<1x256xf32>
    %c0_i32_18 = arith.constant 0 : i32
    %c15_i32_19 = arith.constant 15 : i32
    %69 = vector.broadcast %c0_i32_18 : i32 to vector<1x256xi32>
    %70 = arith.maxsi %69, %14 : vector<1x256xi32>
    %71 = vector.broadcast %c15_i32_19 : i32 to vector<1x256xi32>
    %72 = arith.minsi %71, %70 : vector<1x256xi32>
    %c16_i32_20 = arith.constant 16 : i32
    %73 = vector.broadcast %c16_i32_20 : i32 to vector<1x256xi32>
    %74 = arith.muli %72, %73 : vector<1x256xi32>
    %c0_i32_21 = arith.constant 0 : i32
    %c15_i32_22 = arith.constant 15 : i32
    %75 = vector.broadcast %c0_i32_21 : i32 to vector<1x256xi32>
    %76 = arith.maxsi %75, %16 : vector<1x256xi32>
    %77 = vector.broadcast %c15_i32_22 : i32 to vector<1x256xi32>
    %78 = arith.minsi %77, %76 : vector<1x256xi32>
    %79 = arith.addi %74, %78 : vector<1x256xi32>
    %80 = arith.mulf %21, %68 : vector<1x256xf32>
    %81 = vector.broadcast %79 : vector<1x256xi32> to vector<256x256xi32>
    %82 = arith.cmpi eq, %0, %81 : vector<256x256xi32>
    %83 = arith.extui %82 : vector<256x256xi1> to vector<256x256xi32>
    %84 = arith.sitofp %83 : vector<256x256xi32> to vector<256x256xf32>
    %85 = vector.broadcast %80 : vector<1x256xf32> to vector<256x256xf32>
    %86 = arith.mulf %85, %84 : vector<256x256xf32>
    %87 = arith.addf %55, %86 : vector<256x256xf32>
    %c0_i32_23 = arith.constant 0 : i32
    %88 = vector.broadcast %c0_i32_23 : i32 to vector<1x256xi32>
    %89 = arith.cmpi sge, %13, %88 : vector<1x256xi32>
    %c15_i32_24 = arith.constant 15 : i32
    %90 = vector.broadcast %c15_i32_24 : i32 to vector<1x256xi32>
    %91 = arith.cmpi sle, %13, %90 : vector<1x256xi32>
    %92 = arith.andi %89, %91 : vector<1x256xi1>
    %c0_i32_25 = arith.constant 0 : i32
    %93 = vector.broadcast %c0_i32_25 : i32 to vector<1x256xi32>
    %94 = arith.cmpi sge, %18, %93 : vector<1x256xi32>
    %95 = arith.andi %92, %94 : vector<1x256xi1>
    %c15_i32_26 = arith.constant 15 : i32
    %96 = vector.broadcast %c15_i32_26 : i32 to vector<1x256xi32>
    %97 = arith.cmpi sle, %18, %96 : vector<1x256xi32>
    %98 = arith.andi %95, %97 : vector<1x256xi1>
    %99 = arith.extui %98 : vector<1x256xi1> to vector<1x256xi32>
    %100 = arith.sitofp %99 : vector<1x256xi32> to vector<1x256xf32>
    %c0_i32_27 = arith.constant 0 : i32
    %c15_i32_28 = arith.constant 15 : i32
    %101 = vector.broadcast %c0_i32_27 : i32 to vector<1x256xi32>
    %102 = arith.maxsi %101, %18 : vector<1x256xi32>
    %103 = vector.broadcast %c15_i32_28 : i32 to vector<1x256xi32>
    %104 = arith.minsi %103, %102 : vector<1x256xi32>
    %c16_i32_29 = arith.constant 16 : i32
    %105 = vector.broadcast %c16_i32_29 : i32 to vector<1x256xi32>
    %106 = arith.muli %104, %105 : vector<1x256xi32>
    %c0_i32_30 = arith.constant 0 : i32
    %c15_i32_31 = arith.constant 15 : i32
    %107 = vector.broadcast %c0_i32_30 : i32 to vector<1x256xi32>
    %108 = arith.maxsi %107, %13 : vector<1x256xi32>
    %109 = vector.broadcast %c15_i32_31 : i32 to vector<1x256xi32>
    %110 = arith.minsi %109, %108 : vector<1x256xi32>
    %111 = arith.addi %106, %110 : vector<1x256xi32>
    %112 = arith.mulf %22, %100 : vector<1x256xf32>
    %113 = vector.broadcast %111 : vector<1x256xi32> to vector<256x256xi32>
    %114 = arith.cmpi eq, %0, %113 : vector<256x256xi32>
    %115 = arith.extui %114 : vector<256x256xi1> to vector<256x256xi32>
    %116 = arith.sitofp %115 : vector<256x256xi32> to vector<256x256xf32>
    %117 = vector.broadcast %112 : vector<1x256xf32> to vector<256x256xf32>
    %118 = arith.mulf %117, %116 : vector<256x256xf32>
    %119 = arith.addf %87, %118 : vector<256x256xf32>
    %c0_i32_32 = arith.constant 0 : i32
    %120 = vector.broadcast %c0_i32_32 : i32 to vector<1x256xi32>
    %121 = arith.cmpi sge, %16, %120 : vector<1x256xi32>
    %c15_i32_33 = arith.constant 15 : i32
    %122 = vector.broadcast %c15_i32_33 : i32 to vector<1x256xi32>
    %123 = arith.cmpi sle, %16, %122 : vector<1x256xi32>
    %124 = arith.andi %121, %123 : vector<1x256xi1>
    %c0_i32_34 = arith.constant 0 : i32
    %125 = vector.broadcast %c0_i32_34 : i32 to vector<1x256xi32>
    %126 = arith.cmpi sge, %18, %125 : vector<1x256xi32>
    %127 = arith.andi %124, %126 : vector<1x256xi1>
    %c15_i32_35 = arith.constant 15 : i32
    %128 = vector.broadcast %c15_i32_35 : i32 to vector<1x256xi32>
    %129 = arith.cmpi sle, %18, %128 : vector<1x256xi32>
    %130 = arith.andi %127, %129 : vector<1x256xi1>
    %131 = arith.extui %130 : vector<1x256xi1> to vector<1x256xi32>
    %132 = arith.sitofp %131 : vector<1x256xi32> to vector<1x256xf32>
    %c0_i32_36 = arith.constant 0 : i32
    %c15_i32_37 = arith.constant 15 : i32
    %133 = vector.broadcast %c0_i32_36 : i32 to vector<1x256xi32>
    %134 = arith.maxsi %133, %18 : vector<1x256xi32>
    %135 = vector.broadcast %c15_i32_37 : i32 to vector<1x256xi32>
    %136 = arith.minsi %135, %134 : vector<1x256xi32>
    %c16_i32_38 = arith.constant 16 : i32
    %137 = vector.broadcast %c16_i32_38 : i32 to vector<1x256xi32>
    %138 = arith.muli %136, %137 : vector<1x256xi32>
    %c0_i32_39 = arith.constant 0 : i32
    %c15_i32_40 = arith.constant 15 : i32
    %139 = vector.broadcast %c0_i32_39 : i32 to vector<1x256xi32>
    %140 = arith.maxsi %139, %16 : vector<1x256xi32>
    %141 = vector.broadcast %c15_i32_40 : i32 to vector<1x256xi32>
    %142 = arith.minsi %141, %140 : vector<1x256xi32>
    %143 = arith.addi %138, %142 : vector<1x256xi32>
    %144 = arith.mulf %23, %132 : vector<1x256xf32>
    %145 = vector.broadcast %143 : vector<1x256xi32> to vector<256x256xi32>
    %146 = arith.cmpi eq, %0, %145 : vector<256x256xi32>
    %147 = arith.extui %146 : vector<256x256xi1> to vector<256x256xi32>
    %148 = arith.sitofp %147 : vector<256x256xi32> to vector<256x256xf32>
    %149 = vector.broadcast %144 : vector<1x256xf32> to vector<256x256xf32>
    %150 = arith.mulf %149, %148 : vector<256x256xf32>
    %151 = arith.addf %119, %150 : vector<256x256xf32>
    %c0_41 = arith.constant 0 : index
    %c0_42 = arith.constant 0 : index
    %c0_43 = arith.constant 0 : index
    %152 = vector.load %arg1[%c0_41, %c0_42, %c0_43] : memref<2x128x256xf32, #tpu.memory_space<vmem>>, vector<1x128x256xf32>
    %153 = vector.shape_cast %152 : vector<1x128x256xf32> to vector<128x256xf32>
    %cst_44 = arith.constant dense<0.000000e+00> : vector<128x256xf32>
    %154 = tpu.matmul %153, %151, %cst_44 {dimension_numbers = #tpu.dot_dimension_numbers<[1], [0], [0], [1], [0, 0, 1, 1], [], []>} : vector<128x256xf32>, vector<256x256xf32>, vector<128x256xf32> -> vector<128x256xf32>
    %c0_45 = arith.constant 0 : index
    %c0_46 = arith.constant 0 : index
    %c0_47 = arith.constant 0 : index
    %155 = vector.load %arg4[%c0_45, %c0_46, %c0_47] : memref<2x128x256xf32, #tpu.memory_space<vmem>>, vector<1x128x256xf32>
    %156 = vector.shape_cast %155 : vector<1x128x256xf32> to vector<128x256xf32>
    %157 = vector.shape_cast %154 : vector<128x256xf32> to vector<1x128x256xf32>
    tpu.vector_store %arg4[%c0_45, %c0_46, %c0_47], %157 {strides = array<i32>} : memref<2x128x256xf32, #tpu.memory_space<vmem>>, vector<1x128x256xf32>,
    %c1 = arith.constant 1 : index
    %c0_48 = arith.constant 0 : index
    %c0_49 = arith.constant 0 : index
    %158 = vector.load %arg2[%c1, %c0_48, %c0_49] : memref<2x1x256xf32, #tpu.memory_space<vmem>>, vector<1x1x256xf32>
    %159 = vector.shape_cast %158 : vector<1x1x256xf32> to vector<1x256xf32>
    %c1_50 = arith.constant 1 : index
    %c0_51 = arith.constant 0 : index
    %c0_52 = arith.constant 0 : index
    %160 = vector.load %arg3[%c1_50, %c0_51, %c0_52] : memref<2x1x256xf32, #tpu.memory_space<vmem>>, vector<1x1x256xf32>
    %161 = vector.shape_cast %160 : vector<1x1x256xf32> to vector<1x256xf32>
    %162 = math.floor %159 : vector<1x256xf32>
    %163 = math.floor %161 : vector<1x256xf32>
    %164 = arith.subf %159, %162 : vector<1x256xf32>
    %cst_53 = arith.constant 1.000000e+00 : f32
    %165 = vector.broadcast %cst_53 : f32 to vector<1x256xf32>
    %166 = arith.subf %165, %164 : vector<1x256xf32>
    %167 = arith.subf %161, %163 : vector<1x256xf32>
    %cst_54 = arith.constant 1.000000e+00 : f32
    %168 = vector.broadcast %cst_54 : f32 to vector<1x256xf32>
    %169 = arith.subf %168, %167 : vector<1x256xf32>
    %170 = arith.fptosi %162 : vector<1x256xf32> to vector<1x256xi32>
    %171 = arith.fptosi %163 : vector<1x256xf32> to vector<1x256xi32>
    %c1_i32_55 = arith.constant 1 : i32
    %172 = vector.broadcast %c1_i32_55 : i32 to vector<1x256xi32>
    %173 = arith.addi %170, %172 : vector<1x256xi32>
    %c1_i32_56 = arith.constant 1 : i32
    %174 = vector.broadcast %c1_i32_56 : i32 to vector<1x256xi32>
    %175 = arith.addi %171, %174 : vector<1x256xi32>
    %cst_57 = arith.constant 0.000000e+00 : f32
    %176 = vector.broadcast %cst_57 : f32 to vector<256x256xf32>
    %177 = arith.mulf %166, %169 : vector<1x256xf32>
    %178 = arith.mulf %164, %169 : vector<1x256xf32>
    %179 = arith.mulf %166, %167 : vector<1x256xf32>
    %180 = arith.mulf %164, %167 : vector<1x256xf32>
    %c0_i32_58 = arith.constant 0 : i32
    %181 = vector.broadcast %c0_i32_58 : i32 to vector<1x256xi32>
    %182 = arith.cmpi sge, %170, %181 : vector<1x256xi32>
    %c15_i32_59 = arith.constant 15 : i32
    %183 = vector.broadcast %c15_i32_59 : i32 to vector<1x256xi32>
    %184 = arith.cmpi sle, %170, %183 : vector<1x256xi32>
    %185 = arith.andi %182, %184 : vector<1x256xi1>
    %c0_i32_60 = arith.constant 0 : i32
    %186 = vector.broadcast %c0_i32_60 : i32 to vector<1x256xi32>
    %187 = arith.cmpi sge, %171, %186 : vector<1x256xi32>
    %188 = arith.andi %185, %187 : vector<1x256xi1>
    %c15_i32_61 = arith.constant 15 : i32
    %189 = vector.broadcast %c15_i32_61 : i32 to vector<1x256xi32>
    %190 = arith.cmpi sle, %171, %189 : vector<1x256xi32>
    %191 = arith.andi %188, %190 : vector<1x256xi1>
    %192 = arith.extui %191 : vector<1x256xi1> to vector<1x256xi32>
    %193 = arith.sitofp %192 : vector<1x256xi32> to vector<1x256xf32>
    %c0_i32_62 = arith.constant 0 : i32
    %c15_i32_63 = arith.constant 15 : i32
    %194 = vector.broadcast %c0_i32_62 : i32 to vector<1x256xi32>
    %195 = arith.maxsi %194, %171 : vector<1x256xi32>
    %196 = vector.broadcast %c15_i32_63 : i32 to vector<1x256xi32>
    %197 = arith.minsi %196, %195 : vector<1x256xi32>
    %c16_i32_64 = arith.constant 16 : i32
    %198 = vector.broadcast %c16_i32_64 : i32 to vector<1x256xi32>
    %199 = arith.muli %197, %198 : vector<1x256xi32>
    %c0_i32_65 = arith.constant 0 : i32
    %c15_i32_66 = arith.constant 15 : i32
    %200 = vector.broadcast %c0_i32_65 : i32 to vector<1x256xi32>
    %201 = arith.maxsi %200, %170 : vector<1x256xi32>
    %202 = vector.broadcast %c15_i32_66 : i32 to vector<1x256xi32>
    %203 = arith.minsi %202, %201 : vector<1x256xi32>
    %204 = arith.addi %199, %203 : vector<1x256xi32>
    %205 = arith.mulf %177, %193 : vector<1x256xf32>
    %206 = vector.broadcast %204 : vector<1x256xi32> to vector<256x256xi32>
    %207 = arith.cmpi eq, %0, %206 : vector<256x256xi32>
    %208 = arith.extui %207 : vector<256x256xi1> to vector<256x256xi32>
    %209 = arith.sitofp %208 : vector<256x256xi32> to vector<256x256xf32>
    %210 = vector.broadcast %205 : vector<1x256xf32> to vector<256x256xf32>
    %211 = arith.mulf %210, %209 : vector<256x256xf32>
    %212 = arith.addf %176, %211 : vector<256x256xf32>
    %c0_i32_67 = arith.constant 0 : i32
    %213 = vector.broadcast %c0_i32_67 : i32 to vector<1x256xi32>
    %214 = arith.cmpi sge, %173, %213 : vector<1x256xi32>
    %c15_i32_68 = arith.constant 15 : i32
    %215 = vector.broadcast %c15_i32_68 : i32 to vector<1x256xi32>
    %216 = arith.cmpi sle, %173, %215 : vector<1x256xi32>
    %217 = arith.andi %214, %216 : vector<1x256xi1>
    %c0_i32_69 = arith.constant 0 : i32
    %218 = vector.broadcast %c0_i32_69 : i32 to vector<1x256xi32>
    %219 = arith.cmpi sge, %171, %218 : vector<1x256xi32>
    %220 = arith.andi %217, %219 : vector<1x256xi1>
    %c15_i32_70 = arith.constant 15 : i32
    %221 = vector.broadcast %c15_i32_70 : i32 to vector<1x256xi32>
    %222 = arith.cmpi sle, %171, %221 : vector<1x256xi32>
    %223 = arith.andi %220, %222 : vector<1x256xi1>
    %224 = arith.extui %223 : vector<1x256xi1> to vector<1x256xi32>
    %225 = arith.sitofp %224 : vector<1x256xi32> to vector<1x256xf32>
    %c0_i32_71 = arith.constant 0 : i32
    %c15_i32_72 = arith.constant 15 : i32
    %226 = vector.broadcast %c0_i32_71 : i32 to vector<1x256xi32>
    %227 = arith.maxsi %226, %171 : vector<1x256xi32>
    %228 = vector.broadcast %c15_i32_72 : i32 to vector<1x256xi32>
    %229 = arith.minsi %228, %227 : vector<1x256xi32>
    %c16_i32_73 = arith.constant 16 : i32
    %230 = vector.broadcast %c16_i32_73 : i32 to vector<1x256xi32>
    %231 = arith.muli %229, %230 : vector<1x256xi32>
    %c0_i32_74 = arith.constant 0 : i32
    %c15_i32_75 = arith.constant 15 : i32
    %232 = vector.broadcast %c0_i32_74 : i32 to vector<1x256xi32>
    %233 = arith.maxsi %232, %173 : vector<1x256xi32>
    %234 = vector.broadcast %c15_i32_75 : i32 to vector<1x256xi32>
    %235 = arith.minsi %234, %233 : vector<1x256xi32>
    %236 = arith.addi %231, %235 : vector<1x256xi32>
    %237 = arith.mulf %178, %225 : vector<1x256xf32>
    %238 = vector.broadcast %236 : vector<1x256xi32> to vector<256x256xi32>
    %239 = arith.cmpi eq, %0, %238 : vector<256x256xi32>
    %240 = arith.extui %239 : vector<256x256xi1> to vector<256x256xi32>
    %241 = arith.sitofp %240 : vector<256x256xi32> to vector<256x256xf32>
    %242 = vector.broadcast %237 : vector<1x256xf32> to vector<256x256xf32>
    %243 = arith.mulf %242, %241 : vector<256x256xf32>
    %244 = arith.addf %212, %243 : vector<256x256xf32>
    %c0_i32_76 = arith.constant 0 : i32
    %245 = vector.broadcast %c0_i32_76 : i32 to vector<1x256xi32>
    %246 = arith.cmpi sge, %170, %245 : vector<1x256xi32>
    %c15_i32_77 = arith.constant 15 : i32
    %247 = vector.broadcast %c15_i32_77 : i32 to vector<1x256xi32>
    %248 = arith.cmpi sle, %170, %247 : vector<1x256xi32>
    %249 = arith.andi %246, %248 : vector<1x256xi1>
    %c0_i32_78 = arith.constant 0 : i32
    %250 = vector.broadcast %c0_i32_78 : i32 to vector<1x256xi32>
    %251 = arith.cmpi sge, %175, %250 : vector<1x256xi32>
    %252 = arith.andi %249, %251 : vector<1x256xi1>
    %c15_i32_79 = arith.constant 15 : i32
    %253 = vector.broadcast %c15_i32_79 : i32 to vector<1x256xi32>
    %254 = arith.cmpi sle, %175, %253 : vector<1x256xi32>
    %255 = arith.andi %252, %254 : vector<1x256xi1>
    %256 = arith.extui %255 : vector<1x256xi1> to vector<1x256xi32>
    %257 = arith.sitofp %256 : vector<1x256xi32> to vector<1x256xf32>
    %c0_i32_80 = arith.constant 0 : i32
    %c15_i32_81 = arith.constant 15 : i32
    %258 = vector.broadcast %c0_i32_80 : i32 to vector<1x256xi32>
    %259 = arith.maxsi %258, %175 : vector<1x256xi32>
    %260 = vector.broadcast %c15_i32_81 : i32 to vector<1x256xi32>
    %261 = arith.minsi %260, %259 : vector<1x256xi32>
    %c16_i32_82 = arith.constant 16 : i32
    %262 = vector.broadcast %c16_i32_82 : i32 to vector<1x256xi32>
    %263 = arith.muli %261, %262 : vector<1x256xi32>
    %c0_i32_83 = arith.constant 0 : i32
    %c15_i32_84 = arith.constant 15 : i32
    %264 = vector.broadcast %c0_i32_83 : i32 to vector<1x256xi32>
    %265 = arith.maxsi %264, %170 : vector<1x256xi32>
    %266 = vector.broadcast %c15_i32_84 : i32 to vector<1x256xi32>
    %267 = arith.minsi %266, %265 : vector<1x256xi32>
    %268 = arith.addi %263, %267 : vector<1x256xi32>
    %269 = arith.mulf %179, %257 : vector<1x256xf32>
    %270 = vector.broadcast %268 : vector<1x256xi32> to vector<256x256xi32>
    %271 = arith.cmpi eq, %0, %270 : vector<256x256xi32>
    %272 = arith.extui %271 : vector<256x256xi1> to vector<256x256xi32>
    %273 = arith.sitofp %272 : vector<256x256xi32> to vector<256x256xf32>
    %274 = vector.broadcast %269 : vector<1x256xf32> to vector<256x256xf32>
    %275 = arith.mulf %274, %273 : vector<256x256xf32>
    %276 = arith.addf %244, %275 : vector<256x256xf32>
    %c0_i32_85 = arith.constant 0 : i32
    %277 = vector.broadcast %c0_i32_85 : i32 to vector<1x256xi32>
    %278 = arith.cmpi sge, %173, %277 : vector<1x256xi32>
    %c15_i32_86 = arith.constant 15 : i32
    %279 = vector.broadcast %c15_i32_86 : i32 to vector<1x256xi32>
    %280 = arith.cmpi sle, %173, %279 : vector<1x256xi32>
    %281 = arith.andi %278, %280 : vector<1x256xi1>
    %c0_i32_87 = arith.constant 0 : i32
    %282 = vector.broadcast %c0_i32_87 : i32 to vector<1x256xi32>
    %283 = arith.cmpi sge, %175, %282 : vector<1x256xi32>
    %284 = arith.andi %281, %283 : vector<1x256xi1>
    %c15_i32_88 = arith.constant 15 : i32
    %285 = vector.broadcast %c15_i32_88 : i32 to vector<1x256xi32>
    %286 = arith.cmpi sle, %175, %285 : vector<1x256xi32>
    %287 = arith.andi %284, %286 : vector<1x256xi1>
    %288 = arith.extui %287 : vector<1x256xi1> to vector<1x256xi32>
    %289 = arith.sitofp %288 : vector<1x256xi32> to vector<1x256xf32>
    %c0_i32_89 = arith.constant 0 : i32
    %c15_i32_90 = arith.constant 15 : i32
    %290 = vector.broadcast %c0_i32_89 : i32 to vector<1x256xi32>
    %291 = arith.maxsi %290, %175 : vector<1x256xi32>
    %292 = vector.broadcast %c15_i32_90 : i32 to vector<1x256xi32>
    %293 = arith.minsi %292, %291 : vector<1x256xi32>
    %c16_i32_91 = arith.constant 16 : i32
    %294 = vector.broadcast %c16_i32_91 : i32 to vector<1x256xi32>
    %295 = arith.muli %293, %294 : vector<1x256xi32>
    %c0_i32_92 = arith.constant 0 : i32
    %c15_i32_93 = arith.constant 15 : i32
    %296 = vector.broadcast %c0_i32_92 : i32 to vector<1x256xi32>
    %297 = arith.maxsi %296, %173 : vector<1x256xi32>
    %298 = vector.broadcast %c15_i32_93 : i32 to vector<1x256xi32>
    %299 = arith.minsi %298, %297 : vector<1x256xi32>
    %300 = arith.addi %295, %299 : vector<1x256xi32>
    %301 = arith.mulf %180, %289 : vector<1x256xf32>
    %302 = vector.broadcast %300 : vector<1x256xi32> to vector<256x256xi32>
    %303 = arith.cmpi eq, %0, %302 : vector<256x256xi32>
    %304 = arith.extui %303 : vector<256x256xi1> to vector<256x256xi32>
    %305 = arith.sitofp %304 : vector<256x256xi32> to vector<256x256xf32>
    %306 = vector.broadcast %301 : vector<1x256xf32> to vector<256x256xf32>
    %307 = arith.mulf %306, %305 : vector<256x256xf32>
    %308 = arith.addf %276, %307 : vector<256x256xf32>
    %c1_94 = arith.constant 1 : index
    %c0_95 = arith.constant 0 : index
    %c0_96 = arith.constant 0 : index
    %309 = vector.load %arg1[%c1_94, %c0_95, %c0_96] : memref<2x128x256xf32, #tpu.memory_space<vmem>>, vector<1x128x256xf32>
    %310 = vector.shape_cast %309 : vector<1x128x256xf32> to vector<128x256xf32>
    %cst_97 = arith.constant dense<0.000000e+00> : vector<128x256xf32>
    %311 = tpu.matmul %310, %308, %cst_97 {dimension_numbers = #tpu.dot_dimension_numbers<[1], [0], [0], [1], [0, 0, 1, 1], [], []>} : vector<128x256xf32>, vector<256x256xf32>, vector<128x256xf32> -> vector<128x256xf32>
    %c1_98 = arith.constant 1 : index
    %c0_99 = arith.constant 0 : index
    %c0_100 = arith.constant 0 : index
    %312 = vector.load %arg4[%c1_98, %c0_99, %c0_100] : memref<2x128x256xf32, #tpu.memory_space<vmem>>, vector<1x128x256xf32>
    %313 = vector.shape_cast %312 : vector<1x128x256xf32> to vector<128x256xf32>
    %314 = vector.shape_cast %311 : vector<128x256xf32> to vector<1x128x256xf32>
    tpu.vector_store %arg4[%c1_98, %c0_99, %c0_100], %314 {strides = array<i32>} : memref<2x128x256xf32, #tpu.memory_space<vmem>>, vector<1x128x256xf32>,
    return
  }
  func.func @transform_0(%arg0: i32) -> (i32, i32, i32) {
    %c0_i32 = arith.constant 0 : i32
    %c0_i32_0 = arith.constant 0 : i32
    %c0_i32_1 = arith.constant 0 : i32
    return %arg0, %c0_i32, %c0_i32_0 : i32, i32, i32
  }
  func.func @transform_1(%arg0: i32) -> (i32, i32, i32) {
    %c0_i32 = arith.constant 0 : i32
    %c0_i32_0 = arith.constant 0 : i32
    %c0_i32_1 = arith.constant 0 : i32
    return %arg0, %c0_i32, %c0_i32_0 : i32, i32, i32
  }
  func.func @transform_2(%arg0: i32) -> (i32, i32, i32) {
    %c0_i32 = arith.constant 0 : i32
    %c0_i32_0 = arith.constant 0 : i32
    %c0_i32_1 = arith.constant 0 : i32
    return %arg0, %c0_i32, %c0_i32_0 : i32, i32, i32
  }
  func.func @transform_3(%arg0: i32) -> (i32, i32, i32) {
    %c0_i32 = arith.constant 0 : i32
    %c0_i32_0 = arith.constant 0 : i32
    %c0_i32_1 = arith.constant 0 : i32
    return %arg0, %c0_i32, %c0_i32_0 : i32, i32, i32
  }
}

</mosaic_0001>

<bundles_post_ra>
// kernel: tpu_custom_call.1
= control target key start
LH: loop header
LB: loop body
LE: loop exit
PB: predicated region body
PF: predicated region fallthrough
CT: control target
= control target key end

     0   :  { %s7574_s0 = inlined_call_operand.hbm [shape: f32[4,128,256], index: 0, kind: input, shape index: {}]   ;;  %s7575_s1 = inlined_call_operand.hbm [shape: f32[4,1,256], index: 1, kind: input, shape index: {}]   ;;  %s7576_s2 = inlined_call_operand.hbm [shape: f32[4,1,256], index: 2, kind: input, shape index: {}]   ;;  %s7577_s3 = inlined_call_operand.hbm [shape: f32[4,128,256], index: 3, kind: output, shape index: {}]  }
   0x1   :  { %7582 = sst [smem:[#allocation12_spill]] %s7575_s1 }
   0x2   :  { %8 = vsyncpa [#allocation3], 0 }
   0x3   :  { %10 = vsyncpa [#allocation3 + $0x1], 0 }
   0x4   :  { %11 = vsyncpa [#allocation6], 0 }
   0x5   :  { %13 = vsyncpa [#allocation6 + $0x1], 0 }
   0x6   :  { %14 = vsyncpa [#allocation4], 0 }
   0x7   :  { %16 = vsyncpa [#allocation4 + $0x1], 0  ;;  %s4751_s12 = smov 0   ;;  %s4753_s13 = smov 0  }
   0x8   :  { %s4755_s14 = smov 0   ;;  %s4757_s15 = smov 0  }
   0x9 LB: > { %s4772_s16 = sadd.s32 4294967295, %s4718_s15   ;;  %s3739_s17 = sadd.s32 4294967294, %s4718_s15   ;;  %s4718_s15 = sphi %s4757_s15, %s7610_s15   ;;  %s4714_s14 = sphi %s4755_s14, %s7609_s14   ;;  %s4710_s13 = sphi %s4753_s13, %s7608_s13   ;;  %s4706_s12 = sphi %s4751_s12, %s7607_s12  }
   0xa   : > { %s4776_s18 = sadd.s32 1, %s4718_s15   ;;  %s29_s19 = sadd.s32 1, %s4714_s14 }
   0xb   : > { %s26_s20 = ssub.s32 %s4718_s15, %s4776_s18  ;;  %p36_p0 = scmp.ne.s32.totalorder %s4714_s14, %s4710_s13 }
   0xc   : > { %p27_p1 = scmp.eq.s32.totalorder %s26_s20, 0  ;;  %p37_p2 = scmp.eq.s32.totalorder %s4718_s15, 0 }
   0xd   : > { %p42_p3 = scmp.ne.s32.totalorder %s4710_s13, %s4706_s12  ;;  %p43_p4 = scmp.eq.s32.totalorder %s4772_s16, 0 }
   0xe   : > { %s4788_s21 = scalar_select %p27_p1, %s4714_s14, %s29_s19  }
   0xf   : > { %p38_p5 = por %p37_p2, %p36_p0  ;;  %p4790_p6 = por %p43_p4, %p42_p3 }
  0x10   : > { %p118_p7 = scmp.eq.s32.totalorder %s4772_s16, 1  ;;  %p124_p8 = scmp.eq.s32.totalorder %s3739_s17, 1 }
  0x11   : > { %s7583_s22 = scalar_select %p4790_p6, 1, 0 }
  0x12   : > { %p4517_p10 = scmp.lt.s32.totalorder %s4718_s15, 2  ;;  %p4797_p11 = por %p118_p7, %p36_p0 }
  0x13   : > { %p4801_p12 = por %p124_p8, %p42_p3  ;;  %s4806_s25 = sand.u32 1, %s4714_s14  }
  0x14   : > { %s7584_s23 = scalar_select %p4797_p11, 1, 0 }
  0x15   : > { %s7585_s24 = scalar_select %p4801_p12, 1, 0 }
  0x16   : > { %p4808_p13 = pnand %p4517_p10, %p38_p5  ;;  %s166_s27 = sand.u32 1, %s4718_s15  }
  0x17   : > { %s3746_s28 = sshll.u32 %s4806_s25, 2  ;;  %s4354_s29 = sshll.u32 %s4718_s15, 6 }
  0x18   : > { %s7587_s1 = sld [smem:[#allocation12_spill]]  ;;  %s170_s6 = scalar_lea.vmem [#allocation5], %s3746_s28 }
  0x19   : > { %s178_s7 = sshll.u32 %s170_s6, 4  ;;  %s4826_s8 = scalar_lea.sflag [#allocation6], %s166_s27  ;;  %s4824_s7 = int_to_ptr.vmem [resolvable:$true] %s178_s7 }
  0x1a   : > { %p4832_p1 = pneg %p4808_p13 }
  0x1e   : > { %s4820_s5 = scalar_lea.hbm %s7587_s1, %s4354_s29  ;;  %s4563_s19 = scalar_lea.hbm %s7587_s1, 128 }
  0x1f   : > { %s4558_s9 = scalar_lea.hbm %s4820_s5, 64  ;;  %p4564_p4 = scmp.lt.u32.totalorder %s4820_s5, %s7587_s1 }
  0x20   : > { %p4559_p0 = scmp.ne.s32.totalorder %s4820_s5, %s4558_s9  ;;  %p4565_p5 = scmp.lt.u32.totalorder %s4563_s19, %s4558_s9 }
  0x21   : > { %p4567_p8 = scmp.lt.u32.totalorder %s4558_s9, %s4820_s5 }
  0x22   : > { %p4561_p2 = pnand %p4832_p1, %p4559_p0  ;;  %p4566_p7 = por %p4565_p5, %p4564_p4 }
  0x24   : > { %p4562_p3 = pneg %p4561_p2  ;;  %p4568_p10 = por %p4567_p8, %p4566_p7 }
  0x26   : > { %p4569_p9 = pnand %p4568_p10, %p4562_p3 }
  0x28   : > { %4572 = shalt.err (!%p4569_p9)
}
  0x29   : > { %s4573_s27 = scalar_lea.vmem %s4824_s7, 64  ;;  %s4720_s4 = smov [#allocation5]  }
  0x2a   : > { %p4574_p0 = scmp.ne.s32.totalorder %s4824_s7, %s4573_s27  ;;  %s4578_s6 = sshll.u32 %s4720_s4, 4  ;;  %s4579_s6 = int_to_ptr.vmem [resolvable:$false] %s4578_s6 }
  0x2b   : > { %s4580_s11 = scalar_lea.vmem %s4579_s6, 128  ;;  %p4581_p11 = scmp.lt.s32.totalorder %s4824_s7, %s4579_s6 }
  0x2c   : > { %p4576_p2 = pnand %p4574_p0, %p4832_p1  ;;  %p4582_p6 = scmp.lt.s32.totalorder %s4580_s11, %s4573_s27 }
  0x2e   : > { %p4577_p12 = pneg %p4576_p2  ;;  %p4583_p4 = por %p4582_p6, %p4581_p11 }
  0x30   : > { %p4584_p5 = pnand %p4583_p4, %p4577_p12 }
  0x32   : > { %4587 = shalt.err (!%p4584_p5)
}
  0x33   : > { %s7580_s9 = smov 32   ;;  %s7581_s17 = smov 2  }
  0x34   : > { %4509 = dma.hbm_to_vmem [thread:$0]  (!%p4808_p13), %s4820_s5, 64, %s4824_s7, %s4826_s8, %s7580_s9, %s7580_s9, %s7581_s17  }
  0x35   : > { %s4864_s30 = scalar_lea.hbm %s7576_s2, %s4354_s29  ;;  %s192_s27 = scalar_lea.vmem [#allocation7], %s3746_s28 }
  0x36   : > { %s200_s4 = sshll.u32 %s192_s27, 4  ;;  %p3754_p6 = scmp.ge.s32.totalorder %s4718_s15, 1  ;;  %s4868_s4 = int_to_ptr.vmem [resolvable:$true] %s200_s4 }
  0x37   : > { %p208_p9 = scmp.lt.s32.totalorder %s4718_s15, 3  ;;  %s3742_s6 = sshll.u32 %s4806_s25, 9 }
  0x38   : > { %s4352_s11 = sshll.u32 %s4718_s15, 13  ;;  %s148_s28 = scalar_lea.vmem [#allocation2], %s3742_s6 }
  0x39   : > { %p4874_p11 = pnand %p3754_p6, %p208_p9  ;;  %s4881_s19 = scalar_lea.hbm %s7574_s0, %s4352_s11 }
  0x3a   : > { %s156_s29 = sshll.u32 %s148_s28, 4  ;;  %s145_s20 = scalar_lea.sflag [#allocation3], %s4806_s25  ;;  %s4883_s29 = int_to_ptr.vmem [resolvable:$true] %s156_s29 }
  0x3b   : > { %s7589_s1 = scalar_select %p4874_p11, 1, 0 }
  0x3c   : > { %s4588_s27 = scalar_lea.hbm %s4881_s19, 8192  ;;  %s4593_s5 = scalar_lea.hbm %s7574_s0, 16384 }
  0x3d   : > { %p4589_p12 = scmp.ne.s32.totalorder %s4881_s19, %s4588_s27  ;;  %p4594_p8 = scmp.lt.u32.totalorder %s4881_s19, %s7574_s0 }
  0x3e   : > { %p4595_p10 = scmp.lt.u32.totalorder %s4593_s5, %s4588_s27  ;;  %p4597_p2 = scmp.lt.u32.totalorder %s4588_s27, %s4881_s19 }
  0x3f   : > { %p4591_p3 = pnand %p4589_p12, %p4832_p1 }
  0x40   : > { %p4596_p0 = por %p4595_p10, %p4594_p8 }
  0x41   : > { %p4592_p7 = pneg %p4591_p3 }
  0x42   : > { %p4598_p4 = por %p4597_p2, %p4596_p0 }
  0x44   : > { %p4599_p5 = pnand %p4598_p4, %p4592_p7 }
  0x46   : > { %4602 = shalt.err (!%p4599_p5)
}
  0x47   : > { %s4603_s6 = scalar_lea.vmem %s4883_s29, 8192  ;;  %s4723_s9 = smov [#allocation2]  }
  0x48   : > { %p4604_p6 = scmp.ne.s32.totalorder %s4883_s29, %s4603_s6  ;;  %s4608_s17 = sshll.u32 %s4723_s9, 4  ;;  %s4609_s17 = int_to_ptr.vmem [resolvable:$false] %s4608_s17 }
  0x49   : > { %s4610_s28 = scalar_lea.vmem %s4609_s17, 16384  ;;  %p4611_p3 = scmp.lt.s32.totalorder %s4883_s29, %s4609_s17 }
  0x4a   : > { %p4606_p9 = pnand %p4604_p6, %p4832_p1  ;;  %p4612_p11 = scmp.lt.s32.totalorder %s4610_s28, %s4603_s6 }
  0x4c   : > { %p4607_p12 = pneg %p4606_p9  ;;  %p4613_p8 = por %p4612_p11, %p4611_p3 }
  0x4e   : > { %p4614_p10 = pnand %p4613_p8, %p4607_p12 }
  0x50   : > { %4617 = shalt.err (!%p4614_p10)
}
  0x51   : > { %s4724_s27 = smov 256   ;;  %s4725_s5 = smov 16  }
  0x52   : > { %4506 = dma.hbm_to_vmem [thread:$0]  (!%p4808_p13), %s4881_s19, 8192, %s4883_s29, %s145_s20, %s4724_s27, %s4724_s27, %s4725_s5  }
  0x53   : > { %s4618_s11 = scalar_lea.hbm %s4864_s30, 64  ;;  %s4623_s9 = scalar_lea.hbm %s7576_s2, 128 }
  0x54   : > { %p4619_p7 = scmp.ne.s32.totalorder %s4864_s30, %s4618_s11  ;;  %p4624_p2 = scmp.lt.u32.totalorder %s4864_s30, %s7576_s2 }
  0x55   : > { %p4625_p4 = scmp.lt.u32.totalorder %s4623_s9, %s4618_s11  ;;  %p4627_p6 = scmp.lt.u32.totalorder %s4618_s11, %s4864_s30 }
  0x56   : > { %p4621_p11 = pnand %p4619_p7, %p4832_p1 }
  0x57   : > { %p4626_p5 = por %p4625_p4, %p4624_p2 }
  0x58   : > { %p4622_p0 = pneg %p4621_p11 }
  0x59   : > { %p4628_p9 = por %p4627_p6, %p4626_p5 }
  0x5b   : > { %p4629_p12 = pnand %p4628_p9, %p4622_p0 }
  0x5d   : > { %4632 = shalt.err (!%p4629_p12)
}
  0x5e   : > { %s4633_s25 = scalar_lea.vmem %s4868_s4, 64  ;;  %s4726_s19 = smov [#allocation7]  }
  0x5f   : > { %p4634_p3 = scmp.ne.s32.totalorder %s4868_s4, %s4633_s25  ;;  %s4638_s29 = sshll.u32 %s4726_s19, 4  ;;  %s4639_s29 = int_to_ptr.vmem [resolvable:$false] %s4638_s29 }
  0x60   : > { %s4640_s20 = scalar_lea.vmem %s4639_s29, 128  ;;  %p4641_p7 = scmp.lt.s32.totalorder %s4868_s4, %s4639_s29 }
  0x61   : > { %p4636_p8 = pnand %p4634_p3, %p4832_p1  ;;  %p4642_p11 = scmp.lt.s32.totalorder %s4640_s20, %s4633_s25 }
  0x63   : > { %p4637_p10 = pneg %p4636_p8  ;;  %p4643_p2 = por %p4642_p11, %p4641_p7 }
  0x65   : > { %p4644_p4 = pnand %p4643_p2, %p4637_p10 }
  0x67   : > { %4647 = shalt.err (!%p4644_p4)
}
  0x68   : > { %s7590_s27 = smov 2   ;;  %s7591_s5 = smov 32  }
  0x69   : > { %4512 = dma.hbm_to_vmem [thread:$0]  (!%p4808_p13), %s4864_s30, 64, %s4868_s4, %s4826_s8, %s7591_s5, %s7591_s5, %s7590_s27  }
  0x6a   : > { %p7592_p1 = scmp.ne.s32.totalorder %s7589_s1, 0 }
  0x6b   : > { %s4937_s10 = sand.u32 (!%p7592_p1), 1, %s4710_s13   ;;  %p7593_p0 = scmp.ne.s32.totalorder (!%p7592_p1), %s7583_s22, 0 }
  0x6c   : > { %212 = sbr.rel (%p7592_p1) target bundleno = 956 (0x3bc), region = 32  ;;  %s3755_s11 = sshll.u32 (!%p7592_p1), %s4937_s10, 9 }
  0x6d   : > { %s215_s7 = scalar_lea.sflag (!%p7592_p1), [#allocation3], %s4937_s10  ;;  %s4943_s26 = scalar_lea.vmem (!%p7592_p1), [#allocation2], %s3755_s11 }
  0x73   : > { %4693 = dma.done.wait (%p7593_p0), %s215_s7, 8192  }
  0x74   : > { %4695 = vsyncadd (%p7593_p0), %s215_s7, 4294959104  ;;  %s223_s1 = sand.u32 1, %s4772_s16   ;;  %s3756_s8 = sshll.u32 %s4937_s10, 2 }
  0x75   : > { %s224_s30 = scalar_lea.sflag [#allocation6], %s223_s1  ;;  %s227_s4 = scalar_lea.vmem [#allocation5], %s3756_s8 }
  0x76   : > { %4697 = dma.done.wait (%p7593_p0), %s224_s30, 128  }
  0x77   : > { %4699 = vsyncadd (%p7593_p0), %s224_s30, 4294967168  ;;  %v273_v0 = vlaneseq  ;;  %v306_v7 = vld [vmem:[%s227_s4] sm:$0x3]  ;;  %s236_s22 = scalar_lea.vmem [#allocation7], %s3756_s8  ;;  %v4019_v9 = vld [vmem:[%s227_s4 + $0x2] sm:$0x3] }
  0x78   : > { %v307_v8 = vld [vmem:[%s236_s22] sm:$0x3]  ;;  %v308_v10 = vfloor.f32 %v306_v7  ;;  %v4020_v12 = vld [vmem:[%s236_s22 + $0x2] sm:$0x3]  ;;  %v1959_v13 = vfloor.f32 %v4019_v9  ;;  %v4727_v44 = vmov 0.0   ;;  %s7457_s6 = scalar_lea.vmem [#allocation8], %s3755_s11 }
  0x79   : > { %v4955_v1 = vshrl.u32 %v273_v0, 7  ;;  %v309_v11 = vfloor.f32 %v307_v8  ;;  %v1960_v15 = vfloor.f32 %v4020_v12  ;;  %s4358_s9 = sshll.u32 %s4772_s16, 13  ;;  %s3623_s17 = sshll.u32 %s7457_s6, 4  ;;  %s7528_s17 = int_to_ptr.vmem [resolvable:$true] %s3623_s17 }
  0x7a   : > { %v310_v19 = vsub.f32 %v306_v7, %v308_v10  ;;  %v4487_v21 = vtrunc.f32 %v308_v10  ;;  %v4984_v23 = vsub.f32 %v4019_v9, %v1959_v13  ;;  %v4491_v25 = vtrunc.f32 %v1959_v13  ;;  %s7526_s19 = scalar_lea.hbm %s7577_s3, %s4358_s9  ;;  %s3609_s29 = scalar_lea.sflag [#allocation4], %s4937_s10 }
  0x7b   : > { %v4958_v2 = vadd.s32 8, %v4955_v1  ;;  %v4961_v3 = vsub.s32 1, %v4955_v1  ;;  %v4964_v4 = vsub.s32 0, %v4955_v1  ;;  %v4967_v5 = vadd.s32 16, %v4955_v1  ;;  %s4648_s16 = scalar_lea.vmem %s7528_s17, 8192  ;;  %p7604_p5 = scmp.ne.s32.totalorder %s7584_s23, 0 }
  0x7c   : > { %v4970_v6 = vadd.s32 24, %v4955_v1  ;;  %v4973_v14 = vadd.s32 32, %v4955_v1  ;;  %v4976_v16 = vadd.s32 40, %v4955_v1  ;;  %v4979_v17 = vadd.s32 48, %v4955_v1  ;;  %p4649_p13 = scmp.ne.s32.totalorder %s7528_s17, %s4648_s16  ;;  %s4728_s20 = smov [#allocation8]  }
  0x7d   : > { %v4982_v18 = vadd.s32 56, %v4955_v1  ;;  %v312_v20 = vsub.f32 %v307_v8, %v309_v11  ;;  %v4489_v22 = vtrunc.f32 %v309_v11  ;;  %v4986_v24 = vsub.f32 %v4020_v12, %v1960_v15  ;;  %s4652_s27 = sshll.u32 %s4728_s20, 4  ;;  %s4653_s27 = int_to_ptr.vmem [resolvable:$false] %s4652_s27 }
  0x7e   : > { %v4493_v26 = vtrunc.f32 %v1960_v15  ;;  %v311_v27 = vsub.f32 1.0, %v310_v19  ;;  %v4488_v29 = vcvt.f32.s32 %v4487_v21  ;;  %v1962_v32 = vsub.f32 1.0, %v4984_v23  ;;  %p4650_p6 = pnand %p4649_p13, %p7604_p5  ;;  %s4654_s5 = scalar_lea.vmem %s4653_s27, 16384 }
  0x7f   : > { %v313_v28 = vsub.f32 1.0, %v312_v20  ;;  %v4490_v30 = vcvt.f32.s32 %v4489_v22  ;;  %v4988_v31 = vmul.f32 %v312_v20, %v310_v19  ;;  %v1964_v33 = vsub.f32 1.0, %v4986_v24  ;;  %p4655_p12 = scmp.lt.s32.totalorder %s7528_s17, %s4653_s27  ;;  %p4656_p3 = scmp.lt.s32.totalorder %s4654_s5, %s4648_s16 }
  0x80   : > { %v4992_v34 = vcvt.f32.s32 %v4491_v25  ;;  %v316_v35 = vadd.s32 1, %v4488_v29  ;;  %v320_v39 = vmul.f32 %v312_v20, %v311_v27  ;;  %vm322_vm0 = vcmp.ge.s32.totalorder %v4488_v29, 0  ;;  %p4651_p9 = pneg %p4650_p6 }
  0x81   : > { %v317_v36 = vadd.s32 1, %v4490_v30  ;;  %v318_v37 = vmul.f32 %v313_v28, %v311_v27  ;;  %v319_v38 = vmul.f32 %v313_v28, %v310_v19  ;;  %vm323_vm1 = vcmp.le.s32.totalorder %v4488_v29, 15  ;;  %p4657_p8 = por %p4656_p3, %p4655_p12 }
  0x82   : > { %vm325_vm2 = vcmp.ge.s32.totalorder %v4490_v30, 0  ;;  %vm4994_vm3 = vmand %vm322_vm0, %vm323_vm1  ;;  %vm327_vm4 = vcmp.le.s32.totalorder %v4490_v30, 15  ;;  %vm331_vm5 = vcmp.gt.s32.totalorder %v4490_v30, 0  ;;  %vm336_vm6 = vcmp.gt.s32.totalorder %v4488_v29, 0 }
  0x83   : > { %vm681_vm7 = vcmp.ge.s32.totalorder %v316_v35, 0  ;;  %vm326_vm8 = vmand %vm4994_vm3, %vm325_vm2  ;;  %v332_v41 = vsel %vm331_vm5, %v4490_v30, 0  ;;  %v337_v42 = vsel %vm336_vm6, %v4488_v29, 0  ;;  %vm682_vm9 = vcmp.le.s32.totalorder %v316_v35, 15  ;;  %p4658_p10 = pnand %p4657_p8, %p4651_p9 }
  0x84   : > { %vm688_vm10 = vcmp.gt.s32.totalorder %v316_v35, 0  ;;  %vm328_vm11 = vmand %vm326_vm8, %vm327_vm4  ;;  %vm333_vm12 = vcmp.lt.s32.totalorder %v332_v41, 15  ;;  %vm338_vm13 = vcmp.lt.s32.totalorder %v337_v42, 15  ;;  %vm1033_vm14 = vcmp.ge.s32.totalorder %v317_v36, 0 }
  0x85   : > { %v689_v43 = vsel %vm688_vm10, %v316_v35, 0  ;;  %v3759_v45 = vsel %vm328_vm11, 1.0, %v4727_v44  ;;  %v334_v46 = vsel %vm333_vm12, %v332_v41, 15  ;;  %v339_v47 = vsel %vm338_vm13, %v337_v42, 15  ;;  %vm5004_vm15 = vmand %vm681_vm7, %vm682_vm9 }
  0x86   : > { %vm690_vm0 = vcmp.lt.s32.totalorder %v689_v43, 15  ;;  %v335_v49 = vmul.u32 16, %v334_v46  ;;  %v5008_v50 = vmul.f32 %v3759_v45, %v318_v37  ;;  %vm684_vm1 = vmand %vm5004_vm15, %vm325_vm2  ;;  %vm1035_vm5 = vcmp.le.s32.totalorder %v317_v36, 15 }
  0x87   : > { %v691_v51 = vsel %vm690_vm0, %v689_v43, 15  ;;  %vm685_vm6 = vmand %vm684_vm1, %vm327_vm4  ;;  %vm1039_vm8 = vcmp.gt.s32.totalorder %v317_v36, 0  ;;  %v5014_v52 = vcvt.f32.s32 %v4493_v26  ;;  %v5017_v53 = vadd.s32 1, %v4992_v34 }
  0x88   : > { %v5019_v54 = vmul.f32 %v1964_v33, %v1962_v32  ;;  %v5021_v55 = vadd.s32 %v339_v47, %v335_v49  ;;  %v5025_v56 = vrot.slane %v5008_v50, %v4961_v3  ;;  %v3824_v57 = vsel %vm685_vm6, 1.0, %v4727_v44  ;;  %vm1034_vm2 = vmand %vm4994_vm3, %vm1033_vm14 }
  0x89   : > { %v5028_v58 = vadd.s32 %v691_v51, %v335_v49  ;;  %v5033_v59 = vmul.f32 %v3824_v57, %v319_v38  ;;  %vm1036_vm4 = vmand %vm1034_vm2, %vm1035_vm5  ;;  %v1040_v60 = vsel %vm1039_vm8, %v317_v36, 0  ;;  %v5037_v61 = vadd.s32 1, %v5014_v52 }
  0x8a   : > { %v5040_v62 = vmul.f32 %v1964_v33, %v4984_v23  ;;  %v5044_v63 = vrot.slane %v5021_v55, %v4961_v3  ;;  %v3889_v7 = vsel %vm1036_vm4, 1.0, %v4727_v44  ;;  %vm1041_vm3 = vcmp.lt.s32.totalorder %v1040_v60, 15  ;;  %vm1385_vm7 = vmand %vm5004_vm15, %vm1033_vm14 }
  0x8b   : > { %v5048_v0 = vrot.slane %v5028_v58, %v4961_v3  ;;  %v5056_v8 = vrot.slane %v5033_v59, %v4961_v3  ;;  %v1042_v9 = vsel %vm1041_vm3, %v1040_v60, 15  ;;  %v5058_v10 = vmul.f32 %v3889_v7, %v320_v39  ;;  %vm1386_vm13 = vmand %vm1385_vm7, %vm1035_vm5 }
  0x8c   : > { %v5061_v11 = vmul.f32 %v4986_v24, %v1962_v32  ;;  %vm351_vm9 = vcmp.eq.s32.totalorder %v4955_v1, %v5044_v63  ;;  %vm353_vm10 = vcmp.eq.s32.totalorder %v4958_v2, %v5044_v63  ;;  %v1043_v26 = vmul.u32 16, %v1042_v9 }
  0x8d   : > { %vm703_vm11 = vcmp.eq.s32.totalorder %v4955_v1, %v5048_v0  ;;  %vm705_vm12 = vcmp.eq.s32.totalorder %v4958_v2, %v5048_v0  ;;  %v3761_v12 = vsel %vm351_vm9, 1.0, %v4727_v44  ;;  %v3763_v13 = vsel %vm353_vm10, 1.0, %v4727_v44 }
  0x8e   : > { %v3826_v15 = vsel %vm703_vm11, 1.0, %v4727_v44  ;;  %v3828_v19 = vsel %vm705_vm12, 1.0, %v4727_v44  ;;  %v554_v20 = vmul.f32 %v3761_v12, %v5025_v56  ;;  %v556_v21 = vmul.f32 %v3763_v13, %v5025_v56 }
  0x8f   : > { %v906_v22 = vmul.f32 %v3826_v15, %v5056_v8  ;;  %v908_v25 = vmul.f32 %v3828_v19, %v5056_v8  ;;  %v5082_v27 = vrot.slane %v5058_v10, %v4961_v3  ;;  %v3954_v28 = vsel %vm1386_vm13, 1.0, %v4727_v44 }
  0x90   : > { %v5087_v29 = vmul.f32 %v4986_v24, %v4984_v23  ;;  %v5090_v33 = vmul.f32 %v3954_v28, %v4988_v31  ;;  %vm1973_vm14 = vcmp.ge.s32.totalorder %v4992_v34, 0  ;;  %v5093_v35 = vadd.s32 %v1043_v26, %v339_v47 }
  0x91   : > { %v970_v30 = vadd.f32 %v906_v22, %v554_v20  ;;  %v972_v32 = vadd.f32 %v908_v25, %v556_v21  ;;  %v5095_v36 = vadd.s32 %v1043_v26, %v691_v51  ;;  %vm1974_vm15 = vcmp.le.s32.totalorder %v4992_v34, 15 }
  0x92   : > { %vm1976_vm0 = vcmp.ge.s32.totalorder %v5014_v52, 0  ;;  %v5101_v37 = vrot.slane %v5090_v33, %v4961_v3  ;;  %vm5103_vm1 = vmand %vm1973_vm14, %vm1974_vm15  ;;  %vm1978_vm5 = vcmp.le.s32.totalorder %v5014_v52, 15  ;;  %vm1982_vm6 = vcmp.gt.s32.totalorder %v5014_v52, 0 }
  0x93   : > { %vm1987_vm8 = vcmp.gt.s32.totalorder %v4992_v34, 0  ;;  %v5112_v24 = vrot.slane %v5093_v35, %v4961_v3  ;;  %v5116_v31 = vrot.slane %v5095_v36, %v4961_v3  ;;  %vm1977_vm2 = vmand %vm5103_vm1, %vm1976_vm0  ;;  %v1983_v38 = vsel %vm1982_vm6, %v5014_v52, 0 }
  0x94   : > { %v1988_v39 = vsel %vm1987_vm8, %v4992_v34, 0  ;;  %vm5126_vm4 = vmand %vm1977_vm2, %vm1978_vm5  ;;  %vm1984_vm3 = vcmp.lt.s32.totalorder %v1983_v38, 15  ;;  %vm2332_vm9 = vcmp.ge.s32.totalorder %v5017_v53, 0  ;;  %vm2333_vm10 = vcmp.le.s32.totalorder %v5017_v53, 15 }
  0x95   : > { %vm1989_vm7 = vcmp.lt.s32.totalorder %v1988_v39, 15  ;;  %vm1055_vm11 = vcmp.eq.s32.totalorder %v4955_v1, %v5112_v24  ;;  %vm1057_vm12 = vcmp.eq.s32.totalorder %v4958_v2, %v5112_v24  ;;  %vm1400_vm13 = vcmp.eq.s32.totalorder %v4955_v1, %v5116_v31  ;;  %vm5140_vm15 = vmand %vm2332_vm9, %vm2333_vm10 }
  0x96   : > { %vm1402_vm14 = vcmp.eq.s32.totalorder %v4958_v2, %v5116_v31  ;;  %v3891_v41 = vsel %vm1055_vm11, 1.0, %v4727_v44  ;;  %v3893_v42 = vsel %vm1057_vm12, 1.0, %v4727_v44  ;;  %v3956_v43 = vsel %vm1400_vm13, 1.0, %v4727_v44  ;;  %vm2335_vm6 = vmand %vm5140_vm15, %vm1976_vm0 }
  0x97   : > { %v3958_v45 = vsel %vm1402_vm14, 1.0, %v4727_v44  ;;  %v1258_v46 = vmul.f32 %v3891_v41, %v5082_v27  ;;  %v1260_v47 = vmul.f32 %v3893_v42, %v5082_v27  ;;  %v1603_v48 = vmul.f32 %v3956_v43, %v5101_v37  ;;  %vm2336_vm8 = vmand %vm2335_vm6, %vm1978_vm5 }
  0x98   : > { %v1605_v49 = vmul.f32 %v3958_v45, %v5101_v37  ;;  %v4021_v51 = vsel %vm5126_vm4, 1.0, %v4727_v44  ;;  %v1985_v57 = vsel %vm1984_vm3, %v1983_v38, 15  ;;  %v1990_v60 = vsel %vm1989_vm7, %v1988_v39, 15 }
  0x99   : > { %v4086_v7 = vsel %vm2336_vm8, 1.0, %v4727_v44  ;;  %v1322_v9 = vadd.f32 %v1258_v46, %v970_v30  ;;  %v1324_v12 = vadd.f32 %v1260_v47, %v972_v32  ;;  %v1986_v13 = vmul.u32 16, %v1985_v57 }
  0x9a   : > { %v5165_v15 = vmul.f32 %v4021_v51, %v5019_v54  ;;  %vm2339_vm0 = vcmp.gt.s32.totalorder %v5017_v53, 0  ;;  %v5169_v52 = vmul.f32 %v4086_v7, %v5040_v62  ;;  %vm2684_vm5 = vcmp.ge.s32.totalorder %v5037_v61, 0 }
  0x9b   : > { %vm2686_vm2 = vcmp.le.s32.totalorder %v5037_v61, 15  ;;  %v1667_v19 = vadd.f32 %v1603_v48, %v1322_v9  ;;  %v1669_v20 = vadd.f32 %v1605_v49, %v1324_v12  ;;  %v5173_v21 = vadd.s32 %v1990_v60, %v1986_v13  ;;  %vm2685_vm4 = vmand %vm5103_vm1, %vm2684_vm5 }
  0x9c   : > { %v5177_v22 = vrot.slane %v5165_v15, %v4961_v3  ;;  %v2340_v54 = vsel %vm2339_vm0, %v5017_v53, 0  ;;  %v5186_v62 = vrot.slane %v5169_v52, %v4961_v3  ;;  %vm2687_vm3 = vmand %vm2685_vm4, %vm2686_vm2  ;;  %vm2690_vm7 = vcmp.gt.s32.totalorder %v5037_v61, 0 }
  0x9d   : > { %v5193_v25 = vrot.slane %v5021_v55, %v4964_v4  ;;  %v4359_v26 = vpack.c.bf16 %v1669_v20, %v1667_v19  ;;  %v5197_v28 = vrot.slane %v5173_v21, %v4961_v3  ;;  %vm2341_vm1 = vcmp.lt.s32.totalorder %v2340_v54, 15  ;;  %vm3036_vm9 = vmand %vm5140_vm15, %vm2684_vm5 }
  0x9e   : > { %v4151_v53 = vsel %vm2687_vm3, 1.0, %v4727_v44  ;;  %v2342_v30 = vsel %vm2341_vm1, %v2340_v54, 15  ;;  %v2691_v32 = vsel %vm2690_vm7, %v5037_v61, 0  ;;  %vm3037_vm14 = vmand %vm3036_vm9, %vm2686_vm2  ;;  %v5239_v46 = vrot.slane %v5008_v50, %v4964_v4 }
  0x9f   : > { %v5206_v23 = vmul.f32 %v4151_v53, %v5061_v11  ;;  %vm350_vm10 = vcmp.eq.s32.totalorder %v4955_v1, %v5193_v25  ;;  %4360 = vmatprep.subr.bf16.mxu0 %v4359_v26  ;;  %vm2002_vm11 = vcmp.eq.s32.totalorder %v4955_v1, %v5197_v28  ;;  %vm2004_vm12 = vcmp.eq.s32.totalorder %v4958_v2, %v5197_v28 }
  0xa0   : > { %v5214_v55 = vadd.s32 %v2342_v30, %v1986_v13  ;;  %vm2692_vm13 = vcmp.lt.s32.totalorder %v2691_v32, 15  ;;  %v4023_v38 = vsel %vm2002_vm11, 1.0, %v4727_v44  ;;  %v4025_v11 = vsel %vm2004_vm12, 1.0, %v4727_v44 }
  0xa1   : > { %v2693_v39 = vsel %vm2692_vm13, %v2691_v32, 15  ;;  %v5222_v40 = vrot.slane %v5206_v23, %v4961_v3  ;;  %v2205_v34 = vmul.f32 %v4023_v38, %v5177_v22  ;;  %v2207_v41 = vmul.f32 %v4025_v11, %v5177_v22 }
  0xa2   : > { %v5228_v42 = vrot.slane %v5214_v55, %v4961_v3  ;;  %v2694_v43 = vmul.u32 16, %v2693_v39  ;;  %v4216_v61 = vsel %vm3037_vm14, 1.0, %v4727_v44  ;;  %vm352_vm15 = vcmp.eq.s32.totalorder %v4958_v2, %v5193_v25 }
  0xa3   : > { %v3760_v45 = vsel %vm350_vm10, 1.0, %v4727_v44  ;;  %v5252_v57 = vmul.f32 %v4216_v61, %v5087_v29  ;;  %v3762_v50 = vsel %vm352_vm15, 1.0, %v4727_v44  ;;  %v5273_v20 = vrot.slane %v5028_v58, %v4964_v4 }
  0xa4   : > { %vm2354_vm6 = vcmp.eq.s32.totalorder %v4955_v1, %v5228_v42  ;;  %vm2356_vm8 = vcmp.eq.s32.totalorder %v4958_v2, %v5228_v42  ;;  %v5245_v47 = vadd.s32 %v2694_v43, %v1990_v60  ;;  %v5247_v48 = vadd.s32 %v2694_v43, %v2342_v30 }
  0xa5   : > { %v4088_v49 = vsel %vm2354_vm6, 1.0, %v4727_v44  ;;  %v4090_v51 = vsel %vm2356_vm8, 1.0, %v4727_v44  ;;  %v5267_v13 = vrot.slane %v5252_v57, %v4961_v3  ;;  %v553_v29 = vmul.f32 %v3760_v45, %v5239_v46 }
  0xa6   : > { %v2557_v7 = vmul.f32 %v4088_v49, %v5186_v62  ;;  %v2559_v9 = vmul.f32 %v4090_v51, %v5186_v62  ;;  %v5259_v12 = vrot.slane %v5245_v47, %v4961_v3  ;;  %v5263_v60 = vrot.slane %v5247_v48, %v4961_v3 }
  0xa7   : > { %v555_v19 = vmul.f32 %v3762_v50, %v5239_v46  ;;  %vm702_vm3 = vcmp.eq.s32.totalorder %v4955_v1, %v5273_v20  ;;  %vm704_vm7 = vcmp.eq.s32.totalorder %v4958_v2, %v5273_v20  ;;  %v5299_v45 = vrot.slane %v5033_v59, %v4964_v4 }
  0xa8   : > { %v2621_v54 = vadd.f32 %v2557_v7, %v2205_v34  ;;  %v2623_v26 = vadd.f32 %v2559_v9, %v2207_v41  ;;  %vm2706_vm0 = vcmp.eq.s32.totalorder %v4955_v1, %v5259_v12  ;;  %vm2708_vm5 = vcmp.eq.s32.totalorder %v4958_v2, %v5259_v12 }
  0xa9   : > { %v4153_v53 = vsel %vm2706_vm0, 1.0, %v4727_v44  ;;  %v4155_v3 = vsel %vm2708_vm5, 1.0, %v4727_v44  ;;  %vm3051_vm2 = vcmp.eq.s32.totalorder %v4955_v1, %v5263_v60  ;;  %vm3053_vm4 = vcmp.eq.s32.totalorder %v4958_v2, %v5263_v60 }
  0xaa   : > { %v2909_v58 = vmul.f32 %v4153_v53, %v5222_v40  ;;  %v2911_v30 = vmul.f32 %v4155_v3, %v5222_v40  ;;  %v4218_v32 = vsel %vm3051_vm2, 1.0, %v4727_v44  ;;  %v4220_v38 = vsel %vm3053_vm4, 1.0, %v4727_v44 }
  0xab   : > { %v3254_v11 = vmul.f32 %v4218_v32, %v5267_v13  ;;  %v3256_v39 = vmul.f32 %v4220_v38, %v5267_v13  ;;  %v3825_v43 = vsel %vm702_vm3, 1.0, %v4727_v44  ;;  %v3827_v61 = vsel %vm704_vm7, 1.0, %v4727_v44 }
  0xac   : > { %v2973_v34 = vadd.f32 %v2909_v58, %v2621_v54  ;;  %v2975_v41 = vadd.f32 %v2911_v30, %v2623_v26  ;;  %v5303_v49 = vrot.slane %v5093_v35, %v4964_v4  ;;  %v5307_v51 = vrot.slane %v5058_v10, %v4964_v4 }
  0xad   : > { %v5311_v50 = vrot.slane %v5095_v36, %v4964_v4  ;;  %v5315_v54 = vrot.slane %v5090_v33, %v4964_v4  ;;  %v5319_v59 = vrot.slane %v5173_v21, %v4964_v4  ;;  %v905_v35 = vmul.f32 %v3825_v43, %v5299_v45 }
  0xae   : > { %v3318_v7 = vadd.f32 %v3254_v11, %v2973_v34  ;;  %v3320_v9 = vadd.f32 %v3256_v39, %v2975_v41  ;;  %v907_v26 = vmul.f32 %v3827_v61, %v5299_v45  ;;  %vm1054_vm1 = vcmp.eq.s32.totalorder %v4955_v1, %v5303_v49 }
  0xaf   : > { %vm1056_vm9 = vcmp.eq.s32.totalorder %v4958_v2, %v5303_v49  ;;  %v3890_v36 = vsel %vm1054_vm1, 1.0, %v4727_v44  ;;  %vm1399_vm10 = vcmp.eq.s32.totalorder %v4955_v1, %v5311_v50  ;;  %v969_v21 = vadd.f32 %v905_v35, %v553_v29 }
  0xb0   : > { %v4423_v10 = vpack.c.bf16 %v3320_v9, %v3318_v7  ;;  %v3892_v33 = vsel %vm1056_vm9, 1.0, %v4727_v44  ;;  %v971_v53 = vadd.f32 %v907_v26, %v555_v19  ;;  %v1257_v3 = vmul.f32 %v3890_v36, %v5307_v51 }
  0xb1   : > { %v1259_v58 = vmul.f32 %v3892_v33, %v5307_v51  ;;  %vm1401_vm11 = vcmp.eq.s32.totalorder %v4958_v2, %v5311_v50  ;;  %v3955_v30 = vsel %vm1399_vm10, 1.0, %v4727_v44  ;;  %vm2001_vm12 = vcmp.eq.s32.totalorder %v4955_v1, %v5319_v59 }
  0xb2   : > { %4424 = vmatprep.subr.bf16.mxu1 %v4423_v10  ;;  %vm2003_vm13 = vcmp.eq.s32.totalorder %v4958_v2, %v5319_v59  ;;  %v1321_v32 = vadd.f32 %v1257_v3, %v969_v21  ;;  %v3957_v29 = vsel %vm1401_vm11, 1.0, %v4727_v44  ;;  %v1602_v19 = vmul.f32 %v3955_v30, %v5315_v54 }
  0xb3   : > { %v1323_v38 = vadd.f32 %v1259_v58, %v971_v53  ;;  %v1604_v11 = vmul.f32 %v3957_v29, %v5315_v54  ;;  %v4022_v39 = vsel %vm2001_vm12, 1.0, %v4727_v44  ;;  %v4024_v34 = vsel %vm2003_vm13, 1.0, %v4727_v44 }
  0xb4   : > { %v5347_v41 = vrot.slane %v5165_v15, %v4964_v4  ;;  %v1666_v43 = vadd.f32 %v1602_v19, %v1321_v32  ;;  %v5351_v61 = vrot.slane %v5214_v55, %v4964_v4  ;;  %v5355_v7 = vrot.slane %v5169_v52, %v4964_v4 }
  0xb5   : > { %v5359_v9 = vrot.slane %v5245_v47, %v4964_v4  ;;  %v1668_v35 = vadd.f32 %v1604_v11, %v1323_v38  ;;  %v5365_v15 = vrot.slane %v5206_v23, %v4964_v4  ;;  %v5385_v58 = vrot.slane %v5247_v48, %v4964_v4 }
  0xb6   : > { %v2204_v26 = vmul.f32 %v4022_v39, %v5347_v41  ;;  %v2206_v10 = vmul.f32 %v4024_v34, %v5347_v41  ;;  %vm2353_vm14 = vcmp.eq.s32.totalorder %v4955_v1, %v5351_v61  ;;  %vm2355_vm15 = vcmp.eq.s32.totalorder %v4958_v2, %v5351_v61 }
  0xb7   : > { %vm2705_vm6 = vcmp.eq.s32.totalorder %v4955_v1, %v5359_v9  ;;  %vm2707_vm8 = vcmp.eq.s32.totalorder %v4958_v2, %v5359_v9  ;;  %v4361_v52 = vpack.c.bf16 %v1668_v35, %v1666_v43  ;;  %v4087_v55 = vsel %vm2353_vm14, 1.0, %v4727_v44 }
  0xb8   : > { %v4089_v47 = vsel %vm2355_vm15, 1.0, %v4727_v44  ;;  %v4152_v23 = vsel %vm2705_vm6, 1.0, %v4727_v44  ;;  %v2556_v36 = vmul.f32 %v4087_v55, %v5355_v7  ;;  %v4154_v21 = vsel %vm2707_vm8, 1.0, %v4727_v44 }
  0xb9   : > { %v2558_v33 = vmul.f32 %v4089_v47, %v5355_v7  ;;  %v2908_v53 = vmul.f32 %v4152_v23, %v5365_v15  ;;  %4362 = vmatpush1.bf16.msra.mxu0 %v4361_v52  ;;  %v2910_v3 = vmul.f32 %v4154_v21, %v5365_v15  ;;  %v5389_v30 = vrot.slane %v5252_v57, %v4964_v4 }
  0xba   : > { %vm355_vm0 = vcmp.eq.s32.totalorder %v4967_v5, %v5044_v63  ;;  %v2620_v32 = vadd.f32 %v2556_v36, %v2204_v26  ;;  %vm357_vm5 = vcmp.eq.s32.totalorder %v4970_v6, %v5044_v63  ;;  %vm3050_vm2 = vcmp.eq.s32.totalorder %v4955_v1, %v5385_v58 }
  0xbb   : > { %v2622_v38 = vadd.f32 %v2558_v33, %v2206_v10  ;;  %v3765_v29 = vsel %vm355_vm0, 1.0, %v4727_v44  ;;  %vm3052_vm4 = vcmp.eq.s32.totalorder %v4958_v2, %v5385_v58  ;;  %v3767_v48 = vsel %vm357_vm5, 1.0, %v4727_v44 }
  0xbc   : > { %v558_v4 = vmul.f32 %v3765_v29, %v5025_v56  ;;  %v2972_v57 = vadd.f32 %v2908_v53, %v2620_v32  ;;  %v4217_v11 = vsel %vm3050_vm2, 1.0, %v4727_v44  ;;  %v4219_v39 = vsel %vm3052_vm4, 1.0, %v4727_v44 }
  0xbd   : > { %v2974_v19 = vadd.f32 %v2910_v3, %v2622_v38  ;;  %v3253_v34 = vmul.f32 %v4217_v11, %v5389_v30  ;;  %v3255_v43 = vmul.f32 %v4219_v39, %v5389_v30  ;;  %v560_v35 = vmul.f32 %v3767_v48, %v5025_v56 }
  0xbe   : > { %vm707_vm3 = vcmp.eq.s32.totalorder %v4967_v5, %v5048_v0  ;;  %vm709_vm7 = vcmp.eq.s32.totalorder %v4970_v6, %v5048_v0  ;;  %vm1059_vm1 = vcmp.eq.s32.totalorder %v4967_v5, %v5112_v24  ;;  %vm1061_vm9 = vcmp.eq.s32.totalorder %v4970_v6, %v5112_v24 }
  0xbf   : > { %v3830_v2 = vsel %vm707_vm3, 1.0, %v4727_v44  ;;  %v3317_v26 = vadd.f32 %v3253_v34, %v2972_v57  ;;  %v3319_v10 = vadd.f32 %v3255_v43, %v2974_v19  ;;  %v3832_v52 = vsel %vm709_vm7, 1.0, %v4727_v44 }
  0xc0   : > { %v910_v55 = vmul.f32 %v3830_v2, %v5056_v8  ;;  %v912_v47 = vmul.f32 %v3832_v52, %v5056_v8  ;;  %v3895_v23 = vsel %vm1059_vm1, 1.0, %v4727_v44  ;;  %v3897_v36 = vsel %vm1061_vm9, 1.0, %v4727_v44 }
  0xc1   : > { %vm1404_vm10 = vcmp.eq.s32.totalorder %v4967_v5, %v5116_v31  ;;  %v4425_v33 = vpack.c.bf16 %v3319_v10, %v3317_v26  ;;  %v1262_v53 = vmul.f32 %v3895_v23, %v5082_v27  ;;  %v1264_v3 = vmul.f32 %v3897_v36, %v5082_v27 }
  0xc2   : > { %v974_v21 = vadd.f32 %v910_v55, %v558_v4  ;;  %v976_v32 = vadd.f32 %v912_v47, %v560_v35  ;;  %vm1406_vm11 = vcmp.eq.s32.totalorder %v4970_v6, %v5116_v31  ;;  %v3960_v38 = vsel %vm1404_vm10, 1.0, %v4727_v44 }
  0xc3   : > { %vm2006_vm12 = vcmp.eq.s32.totalorder %v4967_v5, %v5197_v28  ;;  %4426 = vmatpush1.bf16.msra.mxu1 %v4425_v33  ;;  %v3962_v48 = vsel %vm1406_vm11, 1.0, %v4727_v44  ;;  %v1607_v57 = vmul.f32 %v3960_v38, %v5101_v37  ;;  %vm2008_vm13 = vcmp.eq.s32.totalorder %v4970_v6, %v5197_v28 }
  0xc4   : > { %v1326_v29 = vadd.f32 %v1262_v53, %v974_v21  ;;  %v1328_v4 = vadd.f32 %v1264_v3, %v976_v32  ;;  %v1609_v19 = vmul.f32 %v3962_v48, %v5101_v37  ;;  %v4027_v11 = vsel %vm2006_vm12, 1.0, %v4727_v44 }
  0xc5   : > { %v4029_v39 = vsel %vm2008_vm13, 1.0, %v4727_v44  ;;  %v2209_v43 = vmul.f32 %v4027_v11, %v5177_v22  ;;  %vm2358_vm14 = vcmp.eq.s32.totalorder %v4967_v5, %v5228_v42  ;;  %vm2360_vm15 = vcmp.eq.s32.totalorder %v4970_v6, %v5228_v42 }
  0xc6   : > { %v1671_v34 = vadd.f32 %v1607_v57, %v1326_v29  ;;  %v2211_v35 = vmul.f32 %v4029_v39, %v5177_v22  ;;  %v1673_v2 = vadd.f32 %v1609_v19, %v1328_v4  ;;  %v4092_v26 = vsel %vm2358_vm14, 1.0, %v4727_v44 }
  0xc7   : > { %vm2710_vm6 = vcmp.eq.s32.totalorder %v4967_v5, %v5259_v12  ;;  %v4094_v10 = vsel %vm2360_vm15, 1.0, %v4727_v44  ;;  %v2561_v52 = vmul.f32 %v4092_v26, %v5186_v62  ;;  %vm2712_vm8 = vcmp.eq.s32.totalorder %v4970_v6, %v5259_v12 }
  0xc8   : > { %v4157_v55 = vsel %vm2710_vm6, 1.0, %v4727_v44  ;;  %v4363_v47 = vpack.c.bf16 %v1673_v2, %v1671_v34  ;;  %v2563_v23 = vmul.f32 %v4094_v10, %v5186_v62  ;;  %v4159_v36 = vsel %vm2712_vm8, 1.0, %v4727_v44 }
  0xc9   : > { %v2913_v33 = vmul.f32 %v4157_v55, %v5222_v40  ;;  %v2625_v21 = vadd.f32 %v2561_v52, %v2209_v43  ;;  %v2915_v53 = vmul.f32 %v4159_v36, %v5222_v40  ;;  %vm3055_vm0 = vcmp.eq.s32.totalorder %v4967_v5, %v5263_v60 }
  0xca   : > { %vm3057_vm5 = vcmp.eq.s32.totalorder %v4970_v6, %v5263_v60  ;;  %4364 = vmatprep.subr.bf16.mxu0 %v4363_v47  ;;  %v2627_v3 = vadd.f32 %v2563_v23, %v2211_v35  ;;  %v4222_v32 = vsel %vm3055_vm0, 1.0, %v4727_v44  ;;  %vm354_vm2 = vcmp.eq.s32.totalorder %v4967_v5, %v5193_v25 }
  0xcb   : > { %v4224_v38 = vsel %vm3057_vm5, 1.0, %v4727_v44  ;;  %v2977_v29 = vadd.f32 %v2913_v33, %v2625_v21  ;;  %v3258_v48 = vmul.f32 %v4222_v32, %v5267_v13  ;;  %vm356_vm4 = vcmp.eq.s32.totalorder %v4970_v6, %v5193_v25 }
  0xcc   : > { %v3260_v57 = vmul.f32 %v4224_v38, %v5267_v13  ;;  %v2979_v4 = vadd.f32 %v2915_v53, %v2627_v3  ;;  %v3764_v19 = vsel %vm354_vm2, 1.0, %v4727_v44  ;;  %v3766_v11 = vsel %vm356_vm4, 1.0, %v4727_v44 }
  0xcd   : > { %vm706_vm3 = vcmp.eq.s32.totalorder %v4967_v5, %v5273_v20  ;;  %v3322_v39 = vadd.f32 %v3258_v48, %v2977_v29  ;;  %v557_v34 = vmul.f32 %v3764_v19, %v5239_v46  ;;  %v559_v43 = vmul.f32 %v3766_v11, %v5239_v46 }
  0xce   : > { %vm708_vm7 = vcmp.eq.s32.totalorder %v4970_v6, %v5273_v20  ;;  %v3324_v35 = vadd.f32 %v3260_v57, %v2979_v4  ;;  %v3829_v2 = vsel %vm706_vm3, 1.0, %v4727_v44  ;;  %vm1058_vm1 = vcmp.eq.s32.totalorder %v4967_v5, %v5303_v49 }
  0xcf   : > { %v3831_v26 = vsel %vm708_vm7, 1.0, %v4727_v44  ;;  %v909_v10 = vmul.f32 %v3829_v2, %v5299_v45  ;;  %vm1060_vm9 = vcmp.eq.s32.totalorder %v4970_v6, %v5303_v49  ;;  %v3894_v55 = vsel %vm1058_vm1, 1.0, %v4727_v44 }
  0xd0   : > { %v911_v52 = vmul.f32 %v3831_v26, %v5299_v45  ;;  %v4427_v47 = vpack.c.bf16 %v3324_v35, %v3322_v39  ;;  %v3896_v23 = vsel %vm1060_vm9, 1.0, %v4727_v44  ;;  %v1261_v36 = vmul.f32 %v3894_v55, %v5307_v51 }
  0xd1   : > { %vm1403_vm10 = vcmp.eq.s32.totalorder %v4967_v5, %v5311_v50  ;;  %v973_v33 = vadd.f32 %v909_v10, %v557_v34  ;;  %v1263_v53 = vmul.f32 %v3896_v23, %v5307_v51  ;;  %vm1405_vm11 = vcmp.eq.s32.totalorder %v4970_v6, %v5311_v50 }
  0xd2   : > { %v975_v21 = vadd.f32 %v911_v52, %v559_v43  ;;  %4428 = vmatprep.subr.bf16.mxu1 %v4427_v47  ;;  %v3959_v3 = vsel %vm1403_vm10, 1.0, %v4727_v44  ;;  %v3961_v32 = vsel %vm1405_vm11, 1.0, %v4727_v44  ;;  %vm2005_vm12 = vcmp.eq.s32.totalorder %v4967_v5, %v5319_v59 }
  0xd3   : > { %vm2007_vm13 = vcmp.eq.s32.totalorder %v4970_v6, %v5319_v59  ;;  %v1325_v38 = vadd.f32 %v1261_v36, %v973_v33  ;;  %v1606_v48 = vmul.f32 %v3959_v3, %v5315_v54  ;;  %v1608_v57 = vmul.f32 %v3961_v32, %v5315_v54 }
  0xd4   : > { %v1327_v29 = vadd.f32 %v1263_v53, %v975_v21  ;;  %v4026_v4 = vsel %vm2005_vm12, 1.0, %v4727_v44  ;;  %v4028_v19 = vsel %vm2007_vm13, 1.0, %v4727_v44  ;;  %vm2357_vm14 = vcmp.eq.s32.totalorder %v4967_v5, %v5351_v61 }
  0xd5   : > { %vm2359_vm15 = vcmp.eq.s32.totalorder %v4970_v6, %v5351_v61  ;;  %v1670_v11 = vadd.f32 %v1606_v48, %v1325_v38  ;;  %v2208_v34 = vmul.f32 %v4026_v4, %v5347_v41  ;;  %v2210_v43 = vmul.f32 %v4028_v19, %v5347_v41 }
  0xd6   : > { %v1672_v39 = vadd.f32 %v1608_v57, %v1327_v29  ;;  %v4091_v35 = vsel %vm2357_vm14, 1.0, %v4727_v44  ;;  %v4093_v2 = vsel %vm2359_vm15, 1.0, %v4727_v44  ;;  %vm2709_vm6 = vcmp.eq.s32.totalorder %v4967_v5, %v5359_v9 }
  0xd7   : > { %vm2711_vm8 = vcmp.eq.s32.totalorder %v4970_v6, %v5359_v9  ;;  %v2560_v10 = vmul.f32 %v4091_v35, %v5355_v7  ;;  %v2562_v52 = vmul.f32 %v4093_v2, %v5355_v7  ;;  %v4156_v55 = vsel %vm2709_vm6, 1.0, %v4727_v44 }
  0xd8   : > { %v4365_v26 = vpack.c.bf16 %v1672_v39, %v1670_v11  ;;  %v4158_v47 = vsel %vm2711_vm8, 1.0, %v4727_v44  ;;  %v2912_v23 = vmul.f32 %v4156_v55, %v5365_v15  ;;  %vm3054_vm0 = vcmp.eq.s32.totalorder %v4967_v5, %v5385_v58 }
  0xd9   : > { %vm3056_vm5 = vcmp.eq.s32.totalorder %v4970_v6, %v5385_v58  ;;  %v2624_v36 = vadd.f32 %v2560_v10, %v2208_v34  ;;  %v2626_v33 = vadd.f32 %v2562_v52, %v2210_v43  ;;  %v2914_v21 = vmul.f32 %v4158_v47, %v5365_v15 }
  0xda   : > { %4366 = vmatpush1.bf16.msra.mxu0 %v4365_v26  ;;  %v4221_v53 = vsel %vm3054_vm0, 1.0, %v4727_v44  ;;  %v4223_v3 = vsel %vm3056_vm5, 1.0, %v4727_v44  ;;  %vm359_vm2 = vcmp.eq.s32.totalorder %v4973_v14, %v5044_v63  ;;  %vm361_vm4 = vcmp.eq.s32.totalorder %v4976_v16, %v5044_v63 }
  0xdb   : > { %v3257_v32 = vmul.f32 %v4221_v53, %v5389_v30  ;;  %v2976_v5 = vadd.f32 %v2912_v23, %v2624_v36  ;;  %v2978_v38 = vadd.f32 %v2914_v21, %v2626_v33  ;;  %v3259_v6 = vmul.f32 %v4223_v3, %v5389_v30 }
  0xdc   : > { %v3769_v29 = vsel %vm359_vm2, 1.0, %v4727_v44  ;;  %v3771_v48 = vsel %vm361_vm4, 1.0, %v4727_v44  ;;  %vm711_vm3 = vcmp.eq.s32.totalorder %v4973_v14, %v5048_v0  ;;  %vm713_vm7 = vcmp.eq.s32.totalorder %v4976_v16, %v5048_v0 }
  0xdd   : > { %v562_v57 = vmul.f32 %v3769_v29, %v5025_v56  ;;  %v3321_v4 = vadd.f32 %v3257_v32, %v2976_v5  ;;  %v3323_v19 = vadd.f32 %v3259_v6, %v2978_v38  ;;  %v564_v11 = vmul.f32 %v3771_v48, %v5025_v56 }
  0xde   : > { %v3834_v39 = vsel %vm711_vm3, 1.0, %v4727_v44  ;;  %v3836_v34 = vsel %vm713_vm7, 1.0, %v4727_v44  ;;  %vm1063_vm1 = vcmp.eq.s32.totalorder %v4973_v14, %v5112_v24  ;;  %vm1065_vm9 = vcmp.eq.s32.totalorder %v4976_v16, %v5112_v24 }
  0xdf   : > { %v914_v43 = vmul.f32 %v3834_v39, %v5056_v8  ;;  %v4429_v35 = vpack.c.bf16 %v3323_v19, %v3321_v4  ;;  %v916_v2 = vmul.f32 %v3836_v34, %v5056_v8  ;;  %v3899_v26 = vsel %vm1063_vm1, 1.0, %v4727_v44 }
  0xe0   : > { %v3901_v10 = vsel %vm1065_vm9, 1.0, %v4727_v44  ;;  %v1266_v55 = vmul.f32 %v3899_v26, %v5082_v27  ;;  %vm1408_vm10 = vcmp.eq.s32.totalorder %v4973_v14, %v5116_v31  ;;  %vm1410_vm11 = vcmp.eq.s32.totalorder %v4976_v16, %v5116_v31 }
  0xe1   : > { %v978_v52 = vadd.f32 %v914_v43, %v562_v57  ;;  %v1268_v47 = vmul.f32 %v3901_v10, %v5082_v27  ;;  %4430 = vmatpush1.bf16.msra.mxu1 %v4429_v35  ;;  %v980_v23 = vadd.f32 %v916_v2, %v564_v11  ;;  %v3964_v36 = vsel %vm1408_vm10, 1.0, %v4727_v44 }
  0xe2   : > { %vm2010_vm12 = vcmp.eq.s32.totalorder %v4973_v14, %v5197_v28  ;;  %v3966_v21 = vsel %vm1410_vm11, 1.0, %v4727_v44  ;;  %v1611_v53 = vmul.f32 %v3964_v36, %v5101_v37  ;;  %vm2012_vm13 = vcmp.eq.s32.totalorder %v4976_v16, %v5197_v28 }
  0xe3   : > { %v1330_v33 = vadd.f32 %v1266_v55, %v978_v52  ;;  %v1332_v3 = vadd.f32 %v1268_v47, %v980_v23  ;;  %v1613_v32 = vmul.f32 %v3966_v21, %v5101_v37  ;;  %v4031_v5 = vsel %vm2010_vm12, 1.0, %v4727_v44 }
  0xe4   : > { %v4033_v38 = vsel %vm2012_vm13, 1.0, %v4727_v44  ;;  %v2213_v29 = vmul.f32 %v4031_v5, %v5177_v22  ;;  %vm2362_vm14 = vcmp.eq.s32.totalorder %v4973_v14, %v5228_v42  ;;  %vm2364_vm15 = vcmp.eq.s32.totalorder %v4976_v16, %v5228_v42 }
  0xe5   : > { %v1675_v6 = vadd.f32 %v1611_v53, %v1330_v33  ;;  %v2215_v48 = vmul.f32 %v4033_v38, %v5177_v22  ;;  %v1677_v57 = vadd.f32 %v1613_v32, %v1332_v3  ;;  %v4096_v4 = vsel %vm2362_vm14, 1.0, %v4727_v44 }
  0xe6   : > { %vm2714_vm6 = vcmp.eq.s32.totalorder %v4973_v14, %v5259_v12  ;;  %v4098_v19 = vsel %vm2364_vm15, 1.0, %v4727_v44  ;;  %v2565_v11 = vmul.f32 %v4096_v4, %v5186_v62  ;;  %vm2716_vm8 = vcmp.eq.s32.totalorder %v4976_v16, %v5259_v12 }
  0xe7   : > { %v4161_v39 = vsel %vm2714_vm6, 1.0, %v4727_v44  ;;  %v4367_v34 = vpack.c.bf16 %v1677_v57, %v1675_v6  ;;  %v2567_v43 = vmul.f32 %v4098_v19, %v5186_v62  ;;  %v4163_v35 = vsel %vm2716_vm8, 1.0, %v4727_v44 }
  0xe8   : > { %v2917_v2 = vmul.f32 %v4161_v39, %v5222_v40  ;;  %v2629_v26 = vadd.f32 %v2565_v11, %v2213_v29  ;;  %v2919_v10 = vmul.f32 %v4163_v35, %v5222_v40  ;;  %vm3059_vm0 = vcmp.eq.s32.totalorder %v4973_v14, %v5263_v60 }
  0xe9   : > { %vm3061_vm5 = vcmp.eq.s32.totalorder %v4976_v16, %v5263_v60  ;;  %4368 = vmatprep.subr.bf16.mxu0 %v4367_v34  ;;  %v2631_v52 = vadd.f32 %v2567_v43, %v2215_v48  ;;  %v4226_v55 = vsel %vm3059_vm0, 1.0, %v4727_v44  ;;  %vm358_vm2 = vcmp.eq.s32.totalorder %v4973_v14, %v5193_v25 }
  0xea   : > { %v4228_v47 = vsel %vm3061_vm5, 1.0, %v4727_v44  ;;  %v2981_v23 = vadd.f32 %v2917_v2, %v2629_v26  ;;  %v3262_v36 = vmul.f32 %v4226_v55, %v5267_v13  ;;  %vm360_vm4 = vcmp.eq.s32.totalorder %v4976_v16, %v5193_v25 }
  0xeb   : > { %v3264_v33 = vmul.f32 %v4228_v47, %v5267_v13  ;;  %v2983_v21 = vadd.f32 %v2919_v10, %v2631_v52  ;;  %v3768_v53 = vsel %vm358_vm2, 1.0, %v4727_v44  ;;  %v3770_v3 = vsel %vm360_vm4, 1.0, %v4727_v44 }
  0xec   : > { %vm710_vm3 = vcmp.eq.s32.totalorder %v4973_v14, %v5273_v20  ;;  %v3326_v32 = vadd.f32 %v3262_v36, %v2981_v23  ;;  %v561_v5 = vmul.f32 %v3768_v53, %v5239_v46  ;;  %v563_v38 = vmul.f32 %v3770_v3, %v5239_v46 }
  0xed   : > { %vm712_vm7 = vcmp.eq.s32.totalorder %v4976_v16, %v5273_v20  ;;  %v3328_v6 = vadd.f32 %v3264_v33, %v2983_v21  ;;  %v3833_v29 = vsel %vm710_vm3, 1.0, %v4727_v44  ;;  %vm1062_vm1 = vcmp.eq.s32.totalorder %v4973_v14, %v5303_v49 }
  0xee   : > { %v3835_v48 = vsel %vm712_vm7, 1.0, %v4727_v44  ;;  %v913_v57 = vmul.f32 %v3833_v29, %v5299_v45  ;;  %vm1064_vm9 = vcmp.eq.s32.totalorder %v4976_v16, %v5303_v49  ;;  %v3898_v19 = vsel %vm1062_vm1, 1.0, %v4727_v44 }
  0xef   : > { %v915_v4 = vmul.f32 %v3835_v48, %v5299_v45  ;;  %v4431_v11 = vpack.c.bf16 %v3328_v6, %v3326_v32  ;;  %v3900_v39 = vsel %vm1064_vm9, 1.0, %v4727_v44  ;;  %v1265_v34 = vmul.f32 %v3898_v19, %v5307_v51 }
  0xf0   : > { %vm1407_vm10 = vcmp.eq.s32.totalorder %v4973_v14, %v5311_v50  ;;  %v977_v43 = vadd.f32 %v913_v57, %v561_v5  ;;  %v1267_v2 = vmul.f32 %v3900_v39, %v5307_v51  ;;  %vm1409_vm11 = vcmp.eq.s32.totalorder %v4976_v16, %v5311_v50 }
  0xf1   : > { %v979_v35 = vadd.f32 %v915_v4, %v563_v38  ;;  %4432 = vmatprep.subr.bf16.mxu1 %v4431_v11  ;;  %v3963_v26 = vsel %vm1407_vm10, 1.0, %v4727_v44  ;;  %v3965_v10 = vsel %vm1409_vm11, 1.0, %v4727_v44  ;;  %vm2009_vm12 = vcmp.eq.s32.totalorder %v4973_v14, %v5319_v59 }
  0xf2   : > { %vm2011_vm13 = vcmp.eq.s32.totalorder %v4976_v16, %v5319_v59  ;;  %v1329_v52 = vadd.f32 %v1265_v34, %v977_v43  ;;  %v1610_v47 = vmul.f32 %v3963_v26, %v5315_v54  ;;  %v1612_v23 = vmul.f32 %v3965_v10, %v5315_v54 }
  0xf3   : > { %v1331_v55 = vadd.f32 %v1267_v2, %v979_v35  ;;  %v4030_v36 = vsel %vm2009_vm12, 1.0, %v4727_v44  ;;  %v4032_v33 = vsel %vm2011_vm13, 1.0, %v4727_v44  ;;  %vm2361_vm14 = vcmp.eq.s32.totalorder %v4973_v14, %v5351_v61 }
  0xf4   : > { %vm2363_vm15 = vcmp.eq.s32.totalorder %v4976_v16, %v5351_v61  ;;  %v1674_v21 = vadd.f32 %v1610_v47, %v1329_v52  ;;  %v2212_v3 = vmul.f32 %v4030_v36, %v5347_v41  ;;  %v2214_v32 = vmul.f32 %v4032_v33, %v5347_v41 }
  0xf5   : > { %v1676_v53 = vadd.f32 %v1612_v23, %v1331_v55  ;;  %v4095_v5 = vsel %vm2361_vm14, 1.0, %v4727_v44  ;;  %v4097_v38 = vsel %vm2363_vm15, 1.0, %v4727_v44  ;;  %vm2713_vm6 = vcmp.eq.s32.totalorder %v4973_v14, %v5359_v9 }
  0xf6   : > { %vm2715_vm8 = vcmp.eq.s32.totalorder %v4976_v16, %v5359_v9  ;;  %v2564_v29 = vmul.f32 %v4095_v5, %v5355_v7  ;;  %v2566_v48 = vmul.f32 %v4097_v38, %v5355_v7  ;;  %v4160_v57 = vsel %vm2713_vm6, 1.0, %v4727_v44 }
  0xf7   : > { %v4369_v6 = vpack.c.bf16 %v1676_v53, %v1674_v21  ;;  %v4162_v4 = vsel %vm2715_vm8, 1.0, %v4727_v44  ;;  %v2916_v19 = vmul.f32 %v4160_v57, %v5365_v15  ;;  %vm3058_vm0 = vcmp.eq.s32.totalorder %v4973_v14, %v5385_v58 }
  0xf8   : > { %vm3060_vm5 = vcmp.eq.s32.totalorder %v4976_v16, %v5385_v58  ;;  %v2628_v11 = vadd.f32 %v2564_v29, %v2212_v3  ;;  %v2630_v39 = vadd.f32 %v2566_v48, %v2214_v32  ;;  %v2918_v34 = vmul.f32 %v4162_v4, %v5365_v15 }
  0xf9   : > { %4370 = vmatpush1.bf16.msra.mxu0 %v4369_v6  ;;  %v4225_v43 = vsel %vm3058_vm0, 1.0, %v4727_v44  ;;  %v4227_v35 = vsel %vm3060_vm5, 1.0, %v4727_v44  ;;  %vm363_vm2 = vcmp.eq.s32.totalorder %v4979_v17, %v5044_v63  ;;  %vm365_vm4 = vcmp.eq.s32.totalorder %v4982_v18, %v5044_v63 }
  0xfa   : > { %v3261_v2 = vmul.f32 %v4225_v43, %v5389_v30  ;;  %v2980_v14 = vadd.f32 %v2916_v19, %v2628_v11  ;;  %v2982_v26 = vadd.f32 %v2918_v34, %v2630_v39  ;;  %v3263_v16 = vmul.f32 %v4227_v35, %v5389_v30 }
  0xfb   : > { %v3773_v10 = vsel %vm363_vm2, 1.0, %v4727_v44  ;;  %v3775_v52 = vsel %vm365_vm4, 1.0, %v4727_v44  ;;  %vm715_vm3 = vcmp.eq.s32.totalorder %v4979_v17, %v5048_v0  ;;  %vm717_vm7 = vcmp.eq.s32.totalorder %v4982_v18, %v5048_v0 }
  0xfc   : > { %v566_v55 = vmul.f32 %v3773_v10, %v5025_v56  ;;  %v3325_v47 = vadd.f32 %v3261_v2, %v2980_v14  ;;  %v3327_v23 = vadd.f32 %v3263_v16, %v2982_v26  ;;  %v568_v36 = vmul.f32 %v3775_v52, %v5025_v56 }
  0xfd   : > { %v3838_v33 = vsel %vm715_vm3, 1.0, %v4727_v44  ;;  %v3840_v21 = vsel %vm717_vm7, 1.0, %v4727_v44  ;;  %vm1067_vm1 = vcmp.eq.s32.totalorder %v4979_v17, %v5112_v24  ;;  %vm1069_vm9 = vcmp.eq.s32.totalorder %v4982_v18, %v5112_v24 }
  0xfe   : > { %v918_v53 = vmul.f32 %v3838_v33, %v5056_v8  ;;  %v4433_v3 = vpack.c.bf16 %v3327_v23, %v3325_v47  ;;  %v920_v32 = vmul.f32 %v3840_v21, %v5056_v8  ;;  %v3903_v5 = vsel %vm1067_vm1, 1.0, %v4727_v44 }
  0xff   : > { %v3905_v38 = vsel %vm1069_vm9, 1.0, %v4727_v44  ;;  %v1270_v29 = vmul.f32 %v3903_v5, %v5082_v27  ;;  %vm1412_vm10 = vcmp.eq.s32.totalorder %v4979_v17, %v5116_v31  ;;  %vm1414_vm11 = vcmp.eq.s32.totalorder %v4982_v18, %v5116_v31 }
 0x100   : > { %v982_v6 = vadd.f32 %v918_v53, %v566_v55  ;;  %v1272_v48 = vmul.f32 %v3905_v38, %v5082_v27  ;;  %4434 = vmatpush1.bf16.msra.mxu1 %v4433_v3  ;;  %v984_v57 = vadd.f32 %v920_v32, %v568_v36  ;;  %v3968_v4 = vsel %vm1412_vm10, 1.0, %v4727_v44 }
 0x101   : > { %vm2014_vm12 = vcmp.eq.s32.totalorder %v4979_v17, %v5197_v28  ;;  %v3970_v11 = vsel %vm1414_vm11, 1.0, %v4727_v44  ;;  %v1615_v39 = vmul.f32 %v3968_v4, %v5101_v37  ;;  %vm2016_vm13 = vcmp.eq.s32.totalorder %v4982_v18, %v5197_v28 }
 0x102   : > { %v1334_v19 = vadd.f32 %v1270_v29, %v982_v6  ;;  %v1336_v34 = vadd.f32 %v1272_v48, %v984_v57  ;;  %v1617_v43 = vmul.f32 %v3970_v11, %v5101_v37  ;;  %v4035_v35 = vsel %vm2014_vm12, 1.0, %v4727_v44 }
 0x103   : > { %v4037_v2 = vsel %vm2016_vm13, 1.0, %v4727_v44  ;;  %v2217_v26 = vmul.f32 %v4035_v35, %v5177_v22  ;;  %vm2366_vm14 = vcmp.eq.s32.totalorder %v4979_v17, %v5228_v42  ;;  %vm2368_vm15 = vcmp.eq.s32.totalorder %v4982_v18, %v5228_v42 }
 0x104   : > { %v1679_v14 = vadd.f32 %v1615_v39, %v1334_v19  ;;  %v2219_v16 = vmul.f32 %v4037_v2, %v5177_v22  ;;  %v1681_v10 = vadd.f32 %v1617_v43, %v1336_v34  ;;  %v4100_v52 = vsel %vm2366_vm14, 1.0, %v4727_v44 }
 0x105   : > { %vm2718_vm6 = vcmp.eq.s32.totalorder %v4979_v17, %v5259_v12  ;;  %v4102_v55 = vsel %vm2368_vm15, 1.0, %v4727_v44  ;;  %v2569_v47 = vmul.f32 %v4100_v52, %v5186_v62  ;;  %vm2720_vm8 = vcmp.eq.s32.totalorder %v4982_v18, %v5259_v12 }
 0x106   : > { %v4165_v23 = vsel %vm2718_vm6, 1.0, %v4727_v44  ;;  %v4371_v36 = vpack.c.bf16 %v1681_v10, %v1679_v14  ;;  %v2571_v33 = vmul.f32 %v4102_v55, %v5186_v62  ;;  %v4167_v21 = vsel %vm2720_vm8, 1.0, %v4727_v44 }
 0x107   : > { %v2921_v53 = vmul.f32 %v4165_v23, %v5222_v40  ;;  %v2633_v3 = vadd.f32 %v2569_v47, %v2217_v26  ;;  %v2923_v32 = vmul.f32 %v4167_v21, %v5222_v40  ;;  %vm3063_vm0 = vcmp.eq.s32.totalorder %v4979_v17, %v5263_v60 }
 0x108   : > { %vm3065_vm5 = vcmp.eq.s32.totalorder %v4982_v18, %v5263_v60  ;;  %4372 = vmatprep.subr.bf16.mxu0 %v4371_v36  ;;  %v2635_v5 = vadd.f32 %v2571_v33, %v2219_v16  ;;  %v4230_v38 = vsel %vm3063_vm0, 1.0, %v4727_v44  ;;  %vm362_vm2 = vcmp.eq.s32.totalorder %v4979_v17, %v5193_v25 }
 0x109   : > { %v4232_v6 = vsel %vm3065_vm5, 1.0, %v4727_v44  ;;  %v2985_v29 = vadd.f32 %v2921_v53, %v2633_v3  ;;  %v3266_v48 = vmul.f32 %v4230_v38, %v5267_v13  ;;  %vm364_vm4 = vcmp.eq.s32.totalorder %v4982_v18, %v5193_v25 }
 0x10a   : > { %v3268_v57 = vmul.f32 %v4232_v6, %v5267_v13  ;;  %v2987_v4 = vadd.f32 %v2923_v32, %v2635_v5  ;;  %v3772_v19 = vsel %vm362_vm2, 1.0, %v4727_v44  ;;  %v3774_v11 = vsel %vm364_vm4, 1.0, %v4727_v44 }
 0x10b   : > { %vm714_vm3 = vcmp.eq.s32.totalorder %v4979_v17, %v5273_v20  ;;  %v3330_v39 = vadd.f32 %v3266_v48, %v2985_v29  ;;  %v565_v34 = vmul.f32 %v3772_v19, %v5239_v46  ;;  %v567_v43 = vmul.f32 %v3774_v11, %v5239_v46 }
 0x10c   : > { %vm716_vm7 = vcmp.eq.s32.totalorder %v4982_v18, %v5273_v20  ;;  %v3332_v35 = vadd.f32 %v3268_v57, %v2987_v4  ;;  %v3837_v2 = vsel %vm714_vm3, 1.0, %v4727_v44  ;;  %vm1066_vm1 = vcmp.eq.s32.totalorder %v4979_v17, %v5303_v49 }
 0x10d   : > { %v3839_v14 = vsel %vm716_vm7, 1.0, %v4727_v44  ;;  %v917_v26 = vmul.f32 %v3837_v2, %v5299_v45  ;;  %vm1068_vm9 = vcmp.eq.s32.totalorder %v4982_v18, %v5303_v49  ;;  %v3902_v10 = vsel %vm1066_vm1, 1.0, %v4727_v44 }
 0x10e   : > { %v919_v16 = vmul.f32 %v3839_v14, %v5299_v45  ;;  %v4435_v52 = vpack.c.bf16 %v3332_v35, %v3330_v39  ;;  %v3904_v55 = vsel %vm1068_vm9, 1.0, %v4727_v44  ;;  %v1269_v47 = vmul.f32 %v3902_v10, %v5307_v51 }
 0x10f   : > { %vm1411_vm10 = vcmp.eq.s32.totalorder %v4979_v17, %v5311_v50  ;;  %v981_v23 = vadd.f32 %v917_v26, %v565_v34  ;;  %v1271_v33 = vmul.f32 %v3904_v55, %v5307_v51  ;;  %vm1413_vm11 = vcmp.eq.s32.totalorder %v4982_v18, %v5311_v50 }
 0x110   : > { %v983_v36 = vadd.f32 %v919_v16, %v567_v43  ;;  %4436 = vmatprep.subr.bf16.mxu1 %v4435_v52  ;;  %v3967_v21 = vsel %vm1411_vm10, 1.0, %v4727_v44  ;;  %v3969_v53 = vsel %vm1413_vm11, 1.0, %v4727_v44  ;;  %vm2013_vm12 = vcmp.eq.s32.totalorder %v4979_v17, %v5319_v59 }
 0x111   : > { %vm2015_vm13 = vcmp.eq.s32.totalorder %v4982_v18, %v5319_v59  ;;  %v1333_v3 = vadd.f32 %v1269_v47, %v981_v23  ;;  %v1614_v5 = vmul.f32 %v3967_v21, %v5315_v54  ;;  %v1616_v38 = vmul.f32 %v3969_v53, %v5315_v54 }
 0x112   : > { %v1335_v32 = vadd.f32 %v1271_v33, %v983_v36  ;;  %v4034_v6 = vsel %vm2013_vm12, 1.0, %v4727_v44  ;;  %v4036_v29 = vsel %vm2015_vm13, 1.0, %v4727_v44  ;;  %vm2365_vm14 = vcmp.eq.s32.totalorder %v4979_v17, %v5351_v61 }
 0x113   : > { %vm2367_vm15 = vcmp.eq.s32.totalorder %v4982_v18, %v5351_v61  ;;  %v1678_v48 = vadd.f32 %v1614_v5, %v1333_v3  ;;  %v2216_v4 = vmul.f32 %v4034_v6, %v5347_v41  ;;  %v2218_v19 = vmul.f32 %v4036_v29, %v5347_v41 }
 0x114   : > { %v1680_v57 = vadd.f32 %v1616_v38, %v1335_v32  ;;  %v4099_v11 = vsel %vm2365_vm14, 1.0, %v4727_v44  ;;  %v4101_v39 = vsel %vm2367_vm15, 1.0, %v4727_v44  ;;  %vm2717_vm6 = vcmp.eq.s32.totalorder %v4979_v17, %v5359_v9 }
 0x115   : > { %vm2719_vm8 = vcmp.eq.s32.totalorder %v4982_v18, %v5359_v9  ;;  %v2568_v43 = vmul.f32 %v4099_v11, %v5355_v7  ;;  %v2570_v35 = vmul.f32 %v4101_v39, %v5355_v7  ;;  %v4164_v2 = vsel %vm2717_vm6, 1.0, %v4727_v44 }
 0x116   : > { %v4373_v34 = vpack.c.bf16 %v1680_v57, %v1678_v48  ;;  %v4166_v14 = vsel %vm2719_vm8, 1.0, %v4727_v44  ;;  %v2920_v26 = vmul.f32 %v4164_v2, %v5365_v15  ;;  %vm3062_vm0 = vcmp.eq.s32.totalorder %v4979_v17, %v5385_v58 }
 0x117   : > { %vm3064_vm5 = vcmp.eq.s32.totalorder %v4982_v18, %v5385_v58  ;;  %v2632_v16 = vadd.f32 %v2568_v43, %v2216_v4  ;;  %v2634_v10 = vadd.f32 %v2570_v35, %v2218_v19  ;;  %v2922_v52 = vmul.f32 %v4166_v14, %v5365_v15 }
 0x118   : > { %4374 = vmatpush1.bf16.msra.mxu0 %v4373_v34  ;;  %v4229_v55 = vsel %vm3062_vm0, 1.0, %v4727_v44  ;;  %v4231_v47 = vsel %vm3064_vm5, 1.0, %v4727_v44  ;;  %v5783_v36 = vadd.s32 64, %v4955_v1  ;;  %v5786_v33 = vadd.s32 72, %v4955_v1 }
 0x119   : > { %v3265_v23 = vmul.f32 %v4229_v55, %v5389_v30  ;;  %v2984_v17 = vadd.f32 %v2920_v26, %v2632_v16  ;;  %v2986_v21 = vadd.f32 %v2922_v52, %v2634_v10  ;;  %v3267_v18 = vmul.f32 %v4231_v47, %v5389_v30 }
 0x11a   : > { %v5790_v53 = vadd.s32 80, %v4955_v1  ;;  %vm367_vm2 = vcmp.eq.s32.totalorder %v5783_v36, %v5044_v63  ;;  %vm369_vm4 = vcmp.eq.s32.totalorder %v5786_v33, %v5044_v63  ;;  %vm719_vm3 = vcmp.eq.s32.totalorder %v5783_v36, %v5048_v0 }
 0x11b   : > { %vm721_vm7 = vcmp.eq.s32.totalorder %v5786_v33, %v5048_v0  ;;  %v3329_v3 = vadd.f32 %v3265_v23, %v2984_v17  ;;  %v3331_v32 = vadd.f32 %v3267_v18, %v2986_v21  ;;  %v3777_v5 = vsel %vm367_vm2, 1.0, %v4727_v44 }
 0x11c   : > { %v3779_v38 = vsel %vm369_vm4, 1.0, %v4727_v44  ;;  %v570_v6 = vmul.f32 %v3777_v5, %v5025_v56  ;;  %v3842_v48 = vsel %vm719_vm3, 1.0, %v4727_v44  ;;  %v3844_v57 = vsel %vm721_vm7, 1.0, %v4727_v44 }
 0x11d   : > { %v572_v29 = vmul.f32 %v3779_v38, %v5025_v56  ;;  %v4437_v4 = vpack.c.bf16 %v3331_v32, %v3329_v3  ;;  %v922_v19 = vmul.f32 %v3842_v48, %v5056_v8  ;;  %v924_v11 = vmul.f32 %v3844_v57, %v5056_v8 }
 0x11e   : > { %vm1071_vm1 = vcmp.eq.s32.totalorder %v5783_v36, %v5112_v24  ;;  %vm1073_vm9 = vcmp.eq.s32.totalorder %v5786_v33, %v5112_v24  ;;  %vm1416_vm10 = vcmp.eq.s32.totalorder %v5783_v36, %v5116_v31  ;;  %vm1418_vm11 = vcmp.eq.s32.totalorder %v5786_v33, %v5116_v31 }
 0x11f   : > { %v3907_v39 = vsel %vm1071_vm1, 1.0, %v4727_v44  ;;  %4438 = vmatpush1.bf16.msra.mxu1 %v4437_v4  ;;  %v986_v34 = vadd.f32 %v922_v19, %v570_v6  ;;  %v988_v43 = vadd.f32 %v924_v11, %v572_v29  ;;  %v3909_v35 = vsel %vm1073_vm9, 1.0, %v4727_v44 }
 0x120   : > { %v1274_v2 = vmul.f32 %v3907_v39, %v5082_v27  ;;  %v1276_v14 = vmul.f32 %v3909_v35, %v5082_v27  ;;  %v3972_v26 = vsel %vm1416_vm10, 1.0, %v4727_v44  ;;  %v3974_v16 = vsel %vm1418_vm11, 1.0, %v4727_v44 }
 0x121   : > { %vm2018_vm12 = vcmp.eq.s32.totalorder %v5783_v36, %v5197_v28  ;;  %v1619_v52 = vmul.f32 %v3972_v26, %v5101_v37  ;;  %v1621_v55 = vmul.f32 %v3974_v16, %v5101_v37  ;;  %vm2020_vm13 = vcmp.eq.s32.totalorder %v5786_v33, %v5197_v28 }
 0x122   : > { %v1338_v10 = vadd.f32 %v1274_v2, %v986_v34  ;;  %v1340_v47 = vadd.f32 %v1276_v14, %v988_v43  ;;  %v4039_v23 = vsel %vm2018_vm12, 1.0, %v4727_v44  ;;  %v4041_v17 = vsel %vm2020_vm13, 1.0, %v4727_v44 }
 0x123   : > { %vm2370_vm14 = vcmp.eq.s32.totalorder %v5783_v36, %v5228_v42  ;;  %v2221_v18 = vmul.f32 %v4039_v23, %v5177_v22  ;;  %v2223_v3 = vmul.f32 %v4041_v17, %v5177_v22  ;;  %vm2372_vm15 = vcmp.eq.s32.totalorder %v5786_v33, %v5228_v42 }
 0x124   : > { %v1683_v21 = vadd.f32 %v1619_v52, %v1338_v10  ;;  %v1685_v32 = vadd.f32 %v1621_v55, %v1340_v47  ;;  %v4104_v5 = vsel %vm2370_vm14, 1.0, %v4727_v44  ;;  %v4106_v38 = vsel %vm2372_vm15, 1.0, %v4727_v44 }
 0x125   : > { %vm2722_vm6 = vcmp.eq.s32.totalorder %v5783_v36, %v5259_v12  ;;  %v2573_v6 = vmul.f32 %v4104_v5, %v5186_v62  ;;  %v2575_v29 = vmul.f32 %v4106_v38, %v5186_v62  ;;  %vm2724_vm8 = vcmp.eq.s32.totalorder %v5786_v33, %v5259_v12 }
 0x126   : > { %v4169_v48 = vsel %vm2722_vm6, 1.0, %v4727_v44  ;;  %v4375_v57 = vpack.c.bf16 %v1685_v32, %v1683_v21  ;;  %v4171_v4 = vsel %vm2724_vm8, 1.0, %v4727_v44  ;;  %vm3067_vm0 = vcmp.eq.s32.totalorder %v5783_v36, %v5263_v60 }
 0x127   : > { %v2925_v19 = vmul.f32 %v4169_v48, %v5222_v40  ;;  %v2637_v11 = vadd.f32 %v2573_v6, %v2221_v18  ;;  %v2639_v39 = vadd.f32 %v2575_v29, %v2223_v3  ;;  %v2927_v34 = vmul.f32 %v4171_v4, %v5222_v40 }
 0x128   : > { %vm3069_vm5 = vcmp.eq.s32.totalorder %v5786_v33, %v5263_v60  ;;  %4376 = vmatprep.subr.bf16.mxu0 %v4375_v57  ;;  %v4234_v43 = vsel %vm3067_vm0, 1.0, %v4727_v44  ;;  %vm366_vm2 = vcmp.eq.s32.totalorder %v5783_v36, %v5193_v25  ;;  %vm368_vm4 = vcmp.eq.s32.totalorder %v5786_v33, %v5193_v25 }
 0x129   : > { %v4236_v35 = vsel %vm3069_vm5, 1.0, %v4727_v44  ;;  %v2989_v2 = vadd.f32 %v2925_v19, %v2637_v11  ;;  %v2991_v14 = vadd.f32 %v2927_v34, %v2639_v39  ;;  %v3270_v26 = vmul.f32 %v4234_v43, %v5267_v13 }
 0x12a   : > { %v3272_v16 = vmul.f32 %v4236_v35, %v5267_v13  ;;  %v3776_v10 = vsel %vm366_vm2, 1.0, %v4727_v44  ;;  %v3778_v52 = vsel %vm368_vm4, 1.0, %v4727_v44  ;;  %vm718_vm3 = vcmp.eq.s32.totalorder %v5783_v36, %v5273_v20 }
 0x12b   : > { %vm720_vm7 = vcmp.eq.s32.totalorder %v5786_v33, %v5273_v20  ;;  %v3334_v55 = vadd.f32 %v3270_v26, %v2989_v2  ;;  %v569_v23 = vmul.f32 %v3776_v10, %v5239_v46  ;;  %v571_v17 = vmul.f32 %v3778_v52, %v5239_v46 }
 0x12c   : > { %v3336_v47 = vadd.f32 %v3272_v16, %v2991_v14  ;;  %v3841_v21 = vsel %vm718_vm3, 1.0, %v4727_v44  ;;  %v3843_v18 = vsel %vm720_vm7, 1.0, %v4727_v44  ;;  %vm1070_vm1 = vcmp.eq.s32.totalorder %v5783_v36, %v5303_v49 }
 0x12d   : > { %vm1072_vm9 = vcmp.eq.s32.totalorder %v5786_v33, %v5303_v49  ;;  %v921_v32 = vmul.f32 %v3841_v21, %v5299_v45  ;;  %v923_v5 = vmul.f32 %v3843_v18, %v5299_v45  ;;  %v3906_v38 = vsel %vm1070_vm1, 1.0, %v4727_v44 }
 0x12e   : > { %v4439_v3 = vpack.c.bf16 %v3336_v47, %v3334_v55  ;;  %v3908_v6 = vsel %vm1072_vm9, 1.0, %v4727_v44  ;;  %v1273_v29 = vmul.f32 %v3906_v38, %v5307_v51  ;;  %vm1415_vm10 = vcmp.eq.s32.totalorder %v5783_v36, %v5311_v50 }
 0x12f   : > { %vm1417_vm11 = vcmp.eq.s32.totalorder %v5786_v33, %v5311_v50  ;;  %v985_v48 = vadd.f32 %v921_v32, %v569_v23  ;;  %v987_v57 = vadd.f32 %v923_v5, %v571_v17  ;;  %v1275_v4 = vmul.f32 %v3908_v6, %v5307_v51 }
 0x130   : > { %4440 = vmatprep.subr.bf16.mxu1 %v4439_v3  ;;  %v3971_v19 = vsel %vm1415_vm10, 1.0, %v4727_v44  ;;  %v3973_v11 = vsel %vm1417_vm11, 1.0, %v4727_v44  ;;  %vm2017_vm12 = vcmp.eq.s32.totalorder %v5783_v36, %v5319_v59  ;;  %vm2019_vm13 = vcmp.eq.s32.totalorder %v5786_v33, %v5319_v59 }
 0x131   : > { %v1618_v39 = vmul.f32 %v3971_v19, %v5315_v54  ;;  %v1337_v34 = vadd.f32 %v1273_v29, %v985_v48  ;;  %v1339_v43 = vadd.f32 %v1275_v4, %v987_v57  ;;  %v1620_v35 = vmul.f32 %v3973_v11, %v5315_v54 }
 0x132   : > { %v4038_v2 = vsel %vm2017_vm12, 1.0, %v4727_v44  ;;  %v4040_v14 = vsel %vm2019_vm13, 1.0, %v4727_v44  ;;  %vm2369_vm14 = vcmp.eq.s32.totalorder %v5783_v36, %v5351_v61  ;;  %vm2371_vm15 = vcmp.eq.s32.totalorder %v5786_v33, %v5351_v61 }
 0x133   : > { %v2220_v26 = vmul.f32 %v4038_v2, %v5347_v41  ;;  %v1682_v16 = vadd.f32 %v1618_v39, %v1337_v34  ;;  %v1684_v10 = vadd.f32 %v1620_v35, %v1339_v43  ;;  %v2222_v52 = vmul.f32 %v4040_v14, %v5347_v41 }
 0x134   : > { %v4103_v55 = vsel %vm2369_vm14, 1.0, %v4727_v44  ;;  %v4105_v47 = vsel %vm2371_vm15, 1.0, %v4727_v44  ;;  %vm2721_vm6 = vcmp.eq.s32.totalorder %v5783_v36, %v5359_v9  ;;  %vm2723_vm8 = vcmp.eq.s32.totalorder %v5786_v33, %v5359_v9 }
 0x135   : > { %v2572_v23 = vmul.f32 %v4103_v55, %v5355_v7  ;;  %v4377_v17 = vpack.c.bf16 %v1684_v10, %v1682_v16  ;;  %v2574_v21 = vmul.f32 %v4105_v47, %v5355_v7  ;;  %v4168_v18 = vsel %vm2721_vm6, 1.0, %v4727_v44 }
 0x136   : > { %v4170_v3 = vsel %vm2723_vm8, 1.0, %v4727_v44  ;;  %v2924_v5 = vmul.f32 %v4168_v18, %v5365_v15  ;;  %vm3066_vm0 = vcmp.eq.s32.totalorder %v5783_v36, %v5385_v58  ;;  %vm3068_vm5 = vcmp.eq.s32.totalorder %v5786_v33, %v5385_v58 }
 0x137   : > { %v2636_v32 = vadd.f32 %v2572_v23, %v2220_v26  ;;  %v2926_v38 = vmul.f32 %v4170_v3, %v5365_v15  ;;  %4378 = vmatpush1.bf16.msra.mxu0 %v4377_v17  ;;  %v2638_v6 = vadd.f32 %v2574_v21, %v2222_v52  ;;  %v4233_v29 = vsel %vm3066_vm0, 1.0, %v4727_v44 }
 0x138   : > { %v5918_v48 = vadd.s32 88, %v4955_v1  ;;  %v4235_v4 = vsel %vm3068_vm5, 1.0, %v4727_v44  ;;  %v3269_v19 = vmul.f32 %v4233_v29, %v5389_v30  ;;  %vm371_vm2 = vcmp.eq.s32.totalorder %v5790_v53, %v5044_v63 }
 0x139   : > { %v2988_v57 = vadd.f32 %v2924_v5, %v2636_v32  ;;  %v2990_v11 = vadd.f32 %v2926_v38, %v2638_v6  ;;  %v3271_v36 = vmul.f32 %v4235_v4, %v5389_v30  ;;  %v3781_v33 = vsel %vm371_vm2, 1.0, %v4727_v44 }
 0x13a   : > { %vm373_vm4 = vcmp.eq.s32.totalorder %v5918_v48, %v5044_v63  ;;  %v574_v43 = vmul.f32 %v3781_v33, %v5025_v56  ;;  %vm723_vm3 = vcmp.eq.s32.totalorder %v5790_v53, %v5048_v0  ;;  %vm725_vm7 = vcmp.eq.s32.totalorder %v5918_v48, %v5048_v0 }
 0x13b   : > { %v3333_v39 = vadd.f32 %v3269_v19, %v2988_v57  ;;  %v3783_v34 = vsel %vm373_vm4, 1.0, %v4727_v44  ;;  %v3335_v35 = vadd.f32 %v3271_v36, %v2990_v11  ;;  %v3846_v14 = vsel %vm723_vm3, 1.0, %v4727_v44 }
 0x13c   : > { %v576_v2 = vmul.f32 %v3783_v34, %v5025_v56  ;;  %v3848_v26 = vsel %vm725_vm7, 1.0, %v4727_v44  ;;  %v926_v16 = vmul.f32 %v3846_v14, %v5056_v8  ;;  %vm1075_vm1 = vcmp.eq.s32.totalorder %v5790_v53, %v5112_v24 }
 0x13d   : > { %vm1077_vm9 = vcmp.eq.s32.totalorder %v5918_v48, %v5112_v24  ;;  %v4441_v10 = vpack.c.bf16 %v3335_v35, %v3333_v39  ;;  %v928_v52 = vmul.f32 %v3848_v26, %v5056_v8  ;;  %v3911_v55 = vsel %vm1075_vm1, 1.0, %v4727_v44 }
 0x13e   : > { %v3913_v47 = vsel %vm1077_vm9, 1.0, %v4727_v44  ;;  %v990_v23 = vadd.f32 %v926_v16, %v574_v43  ;;  %v1278_v17 = vmul.f32 %v3911_v55, %v5082_v27  ;;  %vm1420_vm10 = vcmp.eq.s32.totalorder %v5790_v53, %v5116_v31 }
 0x13f   : > { %v1280_v21 = vmul.f32 %v3913_v47, %v5082_v27  ;;  %4442 = vmatpush1.bf16.msra.mxu1 %v4441_v10  ;;  %v992_v18 = vadd.f32 %v928_v52, %v576_v2  ;;  %vm1422_vm11 = vcmp.eq.s32.totalorder %v5918_v48, %v5116_v31  ;;  %v3976_v3 = vsel %vm1420_vm10, 1.0, %v4727_v44 }
 0x140   : > { %vm2022_vm12 = vcmp.eq.s32.totalorder %v5790_v53, %v5197_v28  ;;  %v1342_v32 = vadd.f32 %v1278_v17, %v990_v23  ;;  %v3978_v5 = vsel %vm1422_vm11, 1.0, %v4727_v44  ;;  %v1623_v38 = vmul.f32 %v3976_v3, %v5101_v37 }
 0x141   : > { %vm2024_vm13 = vcmp.eq.s32.totalorder %v5918_v48, %v5197_v28  ;;  %v1344_v6 = vadd.f32 %v1280_v21, %v992_v18  ;;  %v1625_v29 = vmul.f32 %v3978_v5, %v5101_v37  ;;  %v4043_v57 = vsel %vm2022_vm12, 1.0, %v4727_v44 }
 0x142   : > { %v4045_v4 = vsel %vm2024_vm13, 1.0, %v4727_v44  ;;  %v1687_v19 = vadd.f32 %v1623_v38, %v1342_v32  ;;  %v2225_v11 = vmul.f32 %v4043_v57, %v5177_v22  ;;  %vm2374_vm14 = vcmp.eq.s32.totalorder %v5790_v53, %v5228_v42 }
 0x143   : > { %v2227_v36 = vmul.f32 %v4045_v4, %v5177_v22  ;;  %v1689_v33 = vadd.f32 %v1625_v29, %v1344_v6  ;;  %vm2376_vm15 = vcmp.eq.s32.totalorder %v5918_v48, %v5228_v42  ;;  %v4108_v39 = vsel %vm2374_vm14, 1.0, %v4727_v44 }
 0x144   : > { %vm2726_vm6 = vcmp.eq.s32.totalorder %v5790_v53, %v5259_v12  ;;  %v4110_v34 = vsel %vm2376_vm15, 1.0, %v4727_v44  ;;  %v2577_v43 = vmul.f32 %v4108_v39, %v5186_v62  ;;  %vm2728_vm8 = vcmp.eq.s32.totalorder %v5918_v48, %v5259_v12 }
 0x145   : > { %v4173_v35 = vsel %vm2726_vm6, 1.0, %v4727_v44  ;;  %v4379_v2 = vpack.c.bf16 %v1689_v33, %v1687_v19  ;;  %v2579_v14 = vmul.f32 %v4110_v34, %v5186_v62  ;;  %v4175_v26 = vsel %vm2728_vm8, 1.0, %v4727_v44 }
 0x146   : > { %v2929_v16 = vmul.f32 %v4173_v35, %v5222_v40  ;;  %v2641_v10 = vadd.f32 %v2577_v43, %v2225_v11  ;;  %v2931_v52 = vmul.f32 %v4175_v26, %v5222_v40  ;;  %vm3071_vm0 = vcmp.eq.s32.totalorder %v5790_v53, %v5263_v60 }
 0x147   : > { %vm3073_vm5 = vcmp.eq.s32.totalorder %v5918_v48, %v5263_v60  ;;  %4380 = vmatprep.subr.bf16.mxu0 %v4379_v2  ;;  %v2643_v55 = vadd.f32 %v2579_v14, %v2227_v36  ;;  %v4238_v47 = vsel %vm3071_vm0, 1.0, %v4727_v44  ;;  %vm370_vm2 = vcmp.eq.s32.totalorder %v5790_v53, %v5193_v25 }
 0x148   : > { %v4240_v23 = vsel %vm3073_vm5, 1.0, %v4727_v44  ;;  %v2993_v17 = vadd.f32 %v2929_v16, %v2641_v10  ;;  %v3274_v21 = vmul.f32 %v4238_v47, %v5267_v13  ;;  %vm372_vm4 = vcmp.eq.s32.totalorder %v5918_v48, %v5193_v25 }
 0x149   : > { %v3276_v18 = vmul.f32 %v4240_v23, %v5267_v13  ;;  %v2995_v3 = vadd.f32 %v2931_v52, %v2643_v55  ;;  %v3780_v32 = vsel %vm370_vm2, 1.0, %v4727_v44  ;;  %v3782_v5 = vsel %vm372_vm4, 1.0, %v4727_v44 }
 0x14a   : > { %vm722_vm3 = vcmp.eq.s32.totalorder %v5790_v53, %v5273_v20  ;;  %v3338_v38 = vadd.f32 %v3274_v21, %v2993_v17  ;;  %v573_v6 = vmul.f32 %v3780_v32, %v5239_v46  ;;  %v575_v29 = vmul.f32 %v3782_v5, %v5239_v46 }
 0x14b   : > { %vm724_vm7 = vcmp.eq.s32.totalorder %v5918_v48, %v5273_v20  ;;  %v3340_v57 = vadd.f32 %v3276_v18, %v2995_v3  ;;  %v3845_v4 = vsel %vm722_vm3, 1.0, %v4727_v44  ;;  %vm1074_vm1 = vcmp.eq.s32.totalorder %v5790_v53, %v5303_v49 }
 0x14c   : > { %v3847_v19 = vsel %vm724_vm7, 1.0, %v4727_v44  ;;  %v925_v11 = vmul.f32 %v3845_v4, %v5299_v45  ;;  %vm1076_vm9 = vcmp.eq.s32.totalorder %v5918_v48, %v5303_v49  ;;  %v3910_v33 = vsel %vm1074_vm1, 1.0, %v4727_v44 }
 0x14d   : > { %v927_v36 = vmul.f32 %v3847_v19, %v5299_v45  ;;  %v4443_v39 = vpack.c.bf16 %v3340_v57, %v3338_v38  ;;  %v3912_v34 = vsel %vm1076_vm9, 1.0, %v4727_v44  ;;  %v1277_v43 = vmul.f32 %v3910_v33, %v5307_v51 }
 0x14e   : > { %vm1419_vm10 = vcmp.eq.s32.totalorder %v5790_v53, %v5311_v50  ;;  %v989_v35 = vadd.f32 %v925_v11, %v573_v6  ;;  %v1279_v14 = vmul.f32 %v3912_v34, %v5307_v51  ;;  %vm1421_vm11 = vcmp.eq.s32.totalorder %v5918_v48, %v5311_v50 }
 0x14f   : > { %v991_v2 = vadd.f32 %v927_v36, %v575_v29  ;;  %4444 = vmatprep.subr.bf16.mxu1 %v4443_v39  ;;  %v3975_v26 = vsel %vm1419_vm10, 1.0, %v4727_v44  ;;  %v3977_v16 = vsel %vm1421_vm11, 1.0, %v4727_v44  ;;  %vm2021_vm12 = vcmp.eq.s32.totalorder %v5790_v53, %v5319_v59 }
 0x150   : > { %vm2023_vm13 = vcmp.eq.s32.totalorder %v5918_v48, %v5319_v59  ;;  %v1341_v10 = vadd.f32 %v1277_v43, %v989_v35  ;;  %v1622_v55 = vmul.f32 %v3975_v26, %v5315_v54  ;;  %v1624_v47 = vmul.f32 %v3977_v16, %v5315_v54 }
 0x151   : > { %v1343_v52 = vadd.f32 %v1279_v14, %v991_v2  ;;  %v4042_v23 = vsel %vm2021_vm12, 1.0, %v4727_v44  ;;  %v4044_v17 = vsel %vm2023_vm13, 1.0, %v4727_v44  ;;  %vm2373_vm14 = vcmp.eq.s32.totalorder %v5790_v53, %v5351_v61 }
 0x152   : > { %vm2375_vm15 = vcmp.eq.s32.totalorder %v5918_v48, %v5351_v61  ;;  %v1686_v21 = vadd.f32 %v1622_v55, %v1341_v10  ;;  %v2224_v3 = vmul.f32 %v4042_v23, %v5347_v41  ;;  %v2226_v32 = vmul.f32 %v4044_v17, %v5347_v41 }
 0x153   : > { %v1688_v18 = vadd.f32 %v1624_v47, %v1343_v52  ;;  %v4107_v5 = vsel %vm2373_vm14, 1.0, %v4727_v44  ;;  %v4109_v38 = vsel %vm2375_vm15, 1.0, %v4727_v44  ;;  %vm2725_vm6 = vcmp.eq.s32.totalorder %v5790_v53, %v5359_v9 }
 0x154   : > { %vm2727_vm8 = vcmp.eq.s32.totalorder %v5918_v48, %v5359_v9  ;;  %v2576_v29 = vmul.f32 %v4107_v5, %v5355_v7  ;;  %v2578_v57 = vmul.f32 %v4109_v38, %v5355_v7  ;;  %v4172_v4 = vsel %vm2725_vm6, 1.0, %v4727_v44 }
 0x155   : > { %v4381_v6 = vpack.c.bf16 %v1688_v18, %v1686_v21  ;;  %v4174_v19 = vsel %vm2727_vm8, 1.0, %v4727_v44  ;;  %v2928_v11 = vmul.f32 %v4172_v4, %v5365_v15  ;;  %vm3070_vm0 = vcmp.eq.s32.totalorder %v5790_v53, %v5385_v58 }
 0x156   : > { %vm3072_vm5 = vcmp.eq.s32.totalorder %v5918_v48, %v5385_v58  ;;  %v2640_v36 = vadd.f32 %v2576_v29, %v2224_v3  ;;  %v2642_v33 = vadd.f32 %v2578_v57, %v2226_v32  ;;  %v2930_v39 = vmul.f32 %v4174_v19, %v5365_v15 }
 0x157   : > { %4382 = vmatpush1.bf16.msra.mxu0 %v4381_v6  ;;  %v4237_v34 = vsel %vm3070_vm0, 1.0, %v4727_v44  ;;  %v4239_v43 = vsel %vm3072_vm5, 1.0, %v4727_v44  ;;  %v6051_v2 = vadd.s32 96, %v4955_v1  ;;  %v6054_v14 = vadd.s32 104, %v4955_v1 }
 0x158   : > { %v3273_v35 = vmul.f32 %v4237_v34, %v5389_v30  ;;  %v2992_v53 = vadd.f32 %v2928_v11, %v2640_v36  ;;  %v2994_v26 = vadd.f32 %v2930_v39, %v2642_v33  ;;  %v3275_v48 = vmul.f32 %v4239_v43, %v5389_v30 }
 0x159   : > { %v6058_v16 = vadd.s32 112, %v4955_v1  ;;  %vm375_vm2 = vcmp.eq.s32.totalorder %v6051_v2, %v5044_v63  ;;  %vm377_vm4 = vcmp.eq.s32.totalorder %v6054_v14, %v5044_v63  ;;  %vm727_vm3 = vcmp.eq.s32.totalorder %v6051_v2, %v5048_v0 }
 0x15a   : > { %vm729_vm7 = vcmp.eq.s32.totalorder %v6054_v14, %v5048_v0  ;;  %v3337_v10 = vadd.f32 %v3273_v35, %v2992_v53  ;;  %v3339_v52 = vadd.f32 %v3275_v48, %v2994_v26  ;;  %v3785_v55 = vsel %vm375_vm2, 1.0, %v4727_v44 }
 0x15b   : > { %v3787_v47 = vsel %vm377_vm4, 1.0, %v4727_v44  ;;  %v578_v23 = vmul.f32 %v3785_v55, %v5025_v56  ;;  %v3850_v21 = vsel %vm727_vm3, 1.0, %v4727_v44  ;;  %v3852_v18 = vsel %vm729_vm7, 1.0, %v4727_v44 }
 0x15c   : > { %v580_v17 = vmul.f32 %v3787_v47, %v5025_v56  ;;  %v4445_v3 = vpack.c.bf16 %v3339_v52, %v3337_v10  ;;  %v930_v32 = vmul.f32 %v3850_v21, %v5056_v8  ;;  %v932_v5 = vmul.f32 %v3852_v18, %v5056_v8 }
 0x15d   : > { %vm1079_vm1 = vcmp.eq.s32.totalorder %v6051_v2, %v5112_v24  ;;  %vm1081_vm9 = vcmp.eq.s32.totalorder %v6054_v14, %v5112_v24  ;;  %vm1424_vm10 = vcmp.eq.s32.totalorder %v6051_v2, %v5116_v31  ;;  %vm1426_vm11 = vcmp.eq.s32.totalorder %v6054_v14, %v5116_v31 }
 0x15e   : > { %v3915_v38 = vsel %vm1079_vm1, 1.0, %v4727_v44  ;;  %4446 = vmatpush1.bf16.msra.mxu1 %v4445_v3  ;;  %v994_v6 = vadd.f32 %v930_v32, %v578_v23  ;;  %v996_v29 = vadd.f32 %v932_v5, %v580_v17  ;;  %v3917_v57 = vsel %vm1081_vm9, 1.0, %v4727_v44 }
 0x15f   : > { %v1282_v4 = vmul.f32 %v3915_v38, %v5082_v27  ;;  %v1284_v19 = vmul.f32 %v3917_v57, %v5082_v27  ;;  %v3980_v11 = vsel %vm1424_vm10, 1.0, %v4727_v44  ;;  %v3982_v36 = vsel %vm1426_vm11, 1.0, %v4727_v44 }
 0x160   : > { %vm2026_vm12 = vcmp.eq.s32.totalorder %v6051_v2, %v5197_v28  ;;  %v1627_v39 = vmul.f32 %v3980_v11, %v5101_v37  ;;  %v1629_v34 = vmul.f32 %v3982_v36, %v5101_v37  ;;  %vm2028_vm13 = vcmp.eq.s32.totalorder %v6054_v14, %v5197_v28 }
 0x161   : > { %v1346_v33 = vadd.f32 %v1282_v4, %v994_v6  ;;  %v1348_v43 = vadd.f32 %v1284_v19, %v996_v29  ;;  %v4047_v35 = vsel %vm2026_vm12, 1.0, %v4727_v44  ;;  %v4049_v53 = vsel %vm2028_vm13, 1.0, %v4727_v44 }
 0x162   : > { %vm2378_vm14 = vcmp.eq.s32.totalorder %v6051_v2, %v5228_v42  ;;  %v2229_v48 = vmul.f32 %v4047_v35, %v5177_v22  ;;  %v2231_v10 = vmul.f32 %v4049_v53, %v5177_v22  ;;  %vm2380_vm15 = vcmp.eq.s32.totalorder %v6054_v14, %v5228_v42 }
 0x163   : > { %v1691_v26 = vadd.f32 %v1627_v39, %v1346_v33  ;;  %v1693_v52 = vadd.f32 %v1629_v34, %v1348_v43  ;;  %v4112_v55 = vsel %vm2378_vm14, 1.0, %v4727_v44  ;;  %v4114_v47 = vsel %vm2380_vm15, 1.0, %v4727_v44 }
 0x164   : > { %vm2730_vm6 = vcmp.eq.s32.totalorder %v6051_v2, %v5259_v12  ;;  %v2581_v23 = vmul.f32 %v4112_v55, %v5186_v62  ;;  %v2583_v17 = vmul.f32 %v4114_v47, %v5186_v62  ;;  %vm2732_vm8 = vcmp.eq.s32.totalorder %v6054_v14, %v5259_v12 }
 0x165   : > { %v4177_v21 = vsel %vm2730_vm6, 1.0, %v4727_v44  ;;  %v4383_v18 = vpack.c.bf16 %v1693_v52, %v1691_v26  ;;  %v4179_v3 = vsel %vm2732_vm8, 1.0, %v4727_v44  ;;  %vm3075_vm0 = vcmp.eq.s32.totalorder %v6051_v2, %v5263_v60 }
 0x166   : > { %v2933_v32 = vmul.f32 %v4177_v21, %v5222_v40  ;;  %v2645_v5 = vadd.f32 %v2581_v23, %v2229_v48  ;;  %v2647_v38 = vadd.f32 %v2583_v17, %v2231_v10  ;;  %v2935_v6 = vmul.f32 %v4179_v3, %v5222_v40 }
 0x167   : > { %vm3077_vm5 = vcmp.eq.s32.totalorder %v6054_v14, %v5263_v60  ;;  %4384 = vmatprep.subr.bf16.mxu0 %v4383_v18  ;;  %v4242_v29 = vsel %vm3075_vm0, 1.0, %v4727_v44  ;;  %vm374_vm2 = vcmp.eq.s32.totalorder %v6051_v2, %v5193_v25  ;;  %vm376_vm4 = vcmp.eq.s32.totalorder %v6054_v14, %v5193_v25 }
 0x168   : > { %v4244_v57 = vsel %vm3077_vm5, 1.0, %v4727_v44  ;;  %v2997_v4 = vadd.f32 %v2933_v32, %v2645_v5  ;;  %v2999_v19 = vadd.f32 %v2935_v6, %v2647_v38  ;;  %v3278_v11 = vmul.f32 %v4242_v29, %v5267_v13 }
 0x169   : > { %v3280_v36 = vmul.f32 %v4244_v57, %v5267_v13  ;;  %v3784_v33 = vsel %vm374_vm2, 1.0, %v4727_v44  ;;  %v3786_v39 = vsel %vm376_vm4, 1.0, %v4727_v44  ;;  %vm726_vm3 = vcmp.eq.s32.totalorder %v6051_v2, %v5273_v20 }
 0x16a   : > { %vm728_vm7 = vcmp.eq.s32.totalorder %v6054_v14, %v5273_v20  ;;  %v3342_v34 = vadd.f32 %v3278_v11, %v2997_v4  ;;  %v577_v35 = vmul.f32 %v3784_v33, %v5239_v46  ;;  %v579_v53 = vmul.f32 %v3786_v39, %v5239_v46 }
 0x16b   : > { %v3344_v43 = vadd.f32 %v3280_v36, %v2999_v19  ;;  %v3849_v26 = vsel %vm726_vm3, 1.0, %v4727_v44  ;;  %v3851_v48 = vsel %vm728_vm7, 1.0, %v4727_v44  ;;  %vm1078_vm1 = vcmp.eq.s32.totalorder %v6051_v2, %v5303_v49 }
 0x16c   : > { %vm1080_vm9 = vcmp.eq.s32.totalorder %v6054_v14, %v5303_v49  ;;  %v929_v52 = vmul.f32 %v3849_v26, %v5299_v45  ;;  %v931_v55 = vmul.f32 %v3851_v48, %v5299_v45  ;;  %v3914_v47 = vsel %vm1078_vm1, 1.0, %v4727_v44 }
 0x16d   : > { %v4447_v10 = vpack.c.bf16 %v3344_v43, %v3342_v34  ;;  %v3916_v23 = vsel %vm1080_vm9, 1.0, %v4727_v44  ;;  %v1281_v17 = vmul.f32 %v3914_v47, %v5307_v51  ;;  %vm1423_vm10 = vcmp.eq.s32.totalorder %v6051_v2, %v5311_v50 }
 0x16e   : > { %vm1425_vm11 = vcmp.eq.s32.totalorder %v6054_v14, %v5311_v50  ;;  %v993_v21 = vadd.f32 %v929_v52, %v577_v35  ;;  %v995_v18 = vadd.f32 %v931_v55, %v579_v53  ;;  %v1283_v3 = vmul.f32 %v3916_v23, %v5307_v51 }
 0x16f   : > { %4448 = vmatprep.subr.bf16.mxu1 %v4447_v10  ;;  %v3979_v32 = vsel %vm1423_vm10, 1.0, %v4727_v44  ;;  %v3981_v5 = vsel %vm1425_vm11, 1.0, %v4727_v44  ;;  %vm2025_vm12 = vcmp.eq.s32.totalorder %v6051_v2, %v5319_v59  ;;  %vm2027_vm13 = vcmp.eq.s32.totalorder %v6054_v14, %v5319_v59 }
 0x170   : > { %v1626_v38 = vmul.f32 %v3979_v32, %v5315_v54  ;;  %v1345_v6 = vadd.f32 %v1281_v17, %v993_v21  ;;  %v1347_v29 = vadd.f32 %v1283_v3, %v995_v18  ;;  %v1628_v57 = vmul.f32 %v3981_v5, %v5315_v54 }
 0x171   : > { %v4046_v4 = vsel %vm2025_vm12, 1.0, %v4727_v44  ;;  %v4048_v19 = vsel %vm2027_vm13, 1.0, %v4727_v44  ;;  %vm2377_vm14 = vcmp.eq.s32.totalorder %v6051_v2, %v5351_v61  ;;  %vm2379_vm15 = vcmp.eq.s32.totalorder %v6054_v14, %v5351_v61 }
 0x172   : > { %v2228_v11 = vmul.f32 %v4046_v4, %v5347_v41  ;;  %v1690_v36 = vadd.f32 %v1626_v38, %v1345_v6  ;;  %v1692_v33 = vadd.f32 %v1628_v57, %v1347_v29  ;;  %v2230_v39 = vmul.f32 %v4048_v19, %v5347_v41 }
 0x173   : > { %v4111_v34 = vsel %vm2377_vm14, 1.0, %v4727_v44  ;;  %v4113_v43 = vsel %vm2379_vm15, 1.0, %v4727_v44  ;;  %vm2729_vm6 = vcmp.eq.s32.totalorder %v6051_v2, %v5359_v9  ;;  %vm2731_vm8 = vcmp.eq.s32.totalorder %v6054_v14, %v5359_v9 }
 0x174   : > { %v2580_v35 = vmul.f32 %v4111_v34, %v5355_v7  ;;  %v4385_v53 = vpack.c.bf16 %v1692_v33, %v1690_v36  ;;  %v2582_v26 = vmul.f32 %v4113_v43, %v5355_v7  ;;  %v4176_v48 = vsel %vm2729_vm6, 1.0, %v4727_v44 }
 0x175   : > { %v4178_v10 = vsel %vm2731_vm8, 1.0, %v4727_v44  ;;  %v2932_v55 = vmul.f32 %v4176_v48, %v5365_v15  ;;  %vm3074_vm0 = vcmp.eq.s32.totalorder %v6051_v2, %v5385_v58  ;;  %vm3076_vm5 = vcmp.eq.s32.totalorder %v6054_v14, %v5385_v58 }
 0x176   : > { %v2644_v52 = vadd.f32 %v2580_v35, %v2228_v11  ;;  %v2934_v47 = vmul.f32 %v4178_v10, %v5365_v15  ;;  %4386 = vmatpush1.bf16.msra.mxu0 %v4385_v53  ;;  %v2646_v23 = vadd.f32 %v2582_v26, %v2230_v39  ;;  %v4241_v17 = vsel %vm3074_vm0, 1.0, %v4727_v44 }
 0x177   : > { %v6186_v21 = vadd.s32 120, %v4955_v1  ;;  %v4243_v3 = vsel %vm3076_vm5, 1.0, %v4727_v44  ;;  %v3277_v32 = vmul.f32 %v4241_v17, %v5389_v30  ;;  %vm379_vm2 = vcmp.eq.s32.totalorder %v6058_v16, %v5044_v63 }
 0x178   : > { %v2996_v18 = vadd.f32 %v2932_v55, %v2644_v52  ;;  %v2998_v5 = vadd.f32 %v2934_v47, %v2646_v23  ;;  %v3279_v2 = vmul.f32 %v4243_v3, %v5389_v30  ;;  %v3789_v14 = vsel %vm379_vm2, 1.0, %v4727_v44 }
 0x179   : > { %vm381_vm4 = vcmp.eq.s32.totalorder %v6186_v21, %v5044_v63  ;;  %v582_v29 = vmul.f32 %v3789_v14, %v5025_v56  ;;  %vm731_vm3 = vcmp.eq.s32.totalorder %v6058_v16, %v5048_v0  ;;  %vm733_vm7 = vcmp.eq.s32.totalorder %v6186_v21, %v5048_v0 }
 0x17a   : > { %v3341_v38 = vadd.f32 %v3277_v32, %v2996_v18  ;;  %v3791_v6 = vsel %vm381_vm4, 1.0, %v4727_v44  ;;  %v3343_v57 = vadd.f32 %v3279_v2, %v2998_v5  ;;  %v3854_v19 = vsel %vm731_vm3, 1.0, %v4727_v44 }
 0x17b   : > { %v584_v4 = vmul.f32 %v3791_v6, %v5025_v56  ;;  %v3856_v11 = vsel %vm733_vm7, 1.0, %v4727_v44  ;;  %v934_v36 = vmul.f32 %v3854_v19, %v5056_v8  ;;  %vm1083_vm1 = vcmp.eq.s32.totalorder %v6058_v16, %v5112_v24 }
 0x17c   : > { %vm1085_vm9 = vcmp.eq.s32.totalorder %v6186_v21, %v5112_v24  ;;  %v4449_v33 = vpack.c.bf16 %v3343_v57, %v3341_v38  ;;  %v936_v39 = vmul.f32 %v3856_v11, %v5056_v8  ;;  %v3919_v34 = vsel %vm1083_vm1, 1.0, %v4727_v44 }
 0x17d   : > { %v3921_v43 = vsel %vm1085_vm9, 1.0, %v4727_v44  ;;  %v998_v35 = vadd.f32 %v934_v36, %v582_v29  ;;  %v1286_v53 = vmul.f32 %v3919_v34, %v5082_v27  ;;  %vm1428_vm10 = vcmp.eq.s32.totalorder %v6058_v16, %v5116_v31 }
 0x17e   : > { %v1288_v26 = vmul.f32 %v3921_v43, %v5082_v27  ;;  %4450 = vmatpush1.bf16.msra.mxu1 %v4449_v33  ;;  %v1000_v48 = vadd.f32 %v936_v39, %v584_v4  ;;  %vm1430_vm11 = vcmp.eq.s32.totalorder %v6186_v21, %v5116_v31  ;;  %v3984_v10 = vsel %vm1428_vm10, 1.0, %v4727_v44 }
 0x17f   : > { %vm2030_vm12 = vcmp.eq.s32.totalorder %v6058_v16, %v5197_v28  ;;  %v1350_v52 = vadd.f32 %v1286_v53, %v998_v35  ;;  %v3986_v55 = vsel %vm1430_vm11, 1.0, %v4727_v44  ;;  %v1631_v47 = vmul.f32 %v3984_v10, %v5101_v37 }
 0x180   : > { %vm2032_vm13 = vcmp.eq.s32.totalorder %v6186_v21, %v5197_v28  ;;  %v1352_v23 = vadd.f32 %v1288_v26, %v1000_v48  ;;  %v1633_v17 = vmul.f32 %v3986_v55, %v5101_v37  ;;  %v4051_v18 = vsel %vm2030_vm12, 1.0, %v4727_v44 }
 0x181   : > { %v4053_v3 = vsel %vm2032_vm13, 1.0, %v4727_v44  ;;  %v1695_v32 = vadd.f32 %v1631_v47, %v1350_v52  ;;  %v2233_v5 = vmul.f32 %v4051_v18, %v5177_v22  ;;  %vm2382_vm14 = vcmp.eq.s32.totalorder %v6058_v16, %v5228_v42 }
 0x182   : > { %v2235_v2 = vmul.f32 %v4053_v3, %v5177_v22  ;;  %v1697_v14 = vadd.f32 %v1633_v17, %v1352_v23  ;;  %vm2384_vm15 = vcmp.eq.s32.totalorder %v6186_v21, %v5228_v42  ;;  %v4116_v38 = vsel %vm2382_vm14, 1.0, %v4727_v44 }
 0x183   : > { %vm2734_vm6 = vcmp.eq.s32.totalorder %v6058_v16, %v5259_v12  ;;  %v4118_v6 = vsel %vm2384_vm15, 1.0, %v4727_v44  ;;  %v2585_v29 = vmul.f32 %v4116_v38, %v5186_v62  ;;  %vm2736_vm8 = vcmp.eq.s32.totalorder %v6186_v21, %v5259_v12 }
 0x184   : > { %v4181_v57 = vsel %vm2734_vm6, 1.0, %v4727_v44  ;;  %v4387_v4 = vpack.c.bf16 %v1697_v14, %v1695_v32  ;;  %v2587_v19 = vmul.f32 %v4118_v6, %v5186_v62  ;;  %v4183_v11 = vsel %vm2736_vm8, 1.0, %v4727_v44 }
 0x185   : > { %v2937_v36 = vmul.f32 %v4181_v57, %v5222_v40  ;;  %v2649_v33 = vadd.f32 %v2585_v29, %v2233_v5  ;;  %v2939_v39 = vmul.f32 %v4183_v11, %v5222_v40  ;;  %vm3079_vm0 = vcmp.eq.s32.totalorder %v6058_v16, %v5263_v60 }
 0x186   : > { %vm3081_vm5 = vcmp.eq.s32.totalorder %v6186_v21, %v5263_v60  ;;  %4388 = vmatprep.subr.bf16.mxu0 %v4387_v4  ;;  %v2651_v34 = vadd.f32 %v2587_v19, %v2235_v2  ;;  %v4246_v43 = vsel %vm3079_vm0, 1.0, %v4727_v44  ;;  %vm378_vm2 = vcmp.eq.s32.totalorder %v6058_v16, %v5193_v25 }
 0x187   : > { %v4248_v35 = vsel %vm3081_vm5, 1.0, %v4727_v44  ;;  %v3001_v53 = vadd.f32 %v2937_v36, %v2649_v33  ;;  %v3282_v26 = vmul.f32 %v4246_v43, %v5267_v13  ;;  %vm380_vm4 = vcmp.eq.s32.totalorder %v6186_v21, %v5193_v25 }
 0x188   : > { %v3284_v48 = vmul.f32 %v4248_v35, %v5267_v13  ;;  %v3003_v10 = vadd.f32 %v2939_v39, %v2651_v34  ;;  %v3788_v52 = vsel %vm378_vm2, 1.0, %v4727_v44  ;;  %v3790_v55 = vsel %vm380_vm4, 1.0, %v4727_v44 }
 0x189   : > { %vm730_vm3 = vcmp.eq.s32.totalorder %v6058_v16, %v5273_v20  ;;  %v3346_v47 = vadd.f32 %v3282_v26, %v3001_v53  ;;  %v581_v23 = vmul.f32 %v3788_v52, %v5239_v46  ;;  %v583_v17 = vmul.f32 %v3790_v55, %v5239_v46 }
 0x18a   : > { %vm732_vm7 = vcmp.eq.s32.totalorder %v6186_v21, %v5273_v20  ;;  %v3348_v18 = vadd.f32 %v3284_v48, %v3003_v10  ;;  %v3853_v3 = vsel %vm730_vm3, 1.0, %v4727_v44  ;;  %vm1082_vm1 = vcmp.eq.s32.totalorder %v6058_v16, %v5303_v49 }
 0x18b   : > { %v3855_v32 = vsel %vm732_vm7, 1.0, %v4727_v44  ;;  %v933_v5 = vmul.f32 %v3853_v3, %v5299_v45  ;;  %vm1084_vm9 = vcmp.eq.s32.totalorder %v6186_v21, %v5303_v49  ;;  %v3918_v14 = vsel %vm1082_vm1, 1.0, %v4727_v44 }
 0x18c   : > { %v935_v2 = vmul.f32 %v3855_v32, %v5299_v45  ;;  %v4451_v38 = vpack.c.bf16 %v3348_v18, %v3346_v47  ;;  %v3920_v6 = vsel %vm1084_vm9, 1.0, %v4727_v44  ;;  %v1285_v29 = vmul.f32 %v3918_v14, %v5307_v51 }
 0x18d   : > { %vm1427_vm10 = vcmp.eq.s32.totalorder %v6058_v16, %v5311_v50  ;;  %v997_v57 = vadd.f32 %v933_v5, %v581_v23  ;;  %v1287_v19 = vmul.f32 %v3920_v6, %v5307_v51  ;;  %vm1429_vm11 = vcmp.eq.s32.totalorder %v6186_v21, %v5311_v50 }
 0x18e   : > { %v999_v4 = vadd.f32 %v935_v2, %v583_v17  ;;  %4452 = vmatprep.subr.bf16.mxu1 %v4451_v38  ;;  %v3983_v11 = vsel %vm1427_vm10, 1.0, %v4727_v44  ;;  %v3985_v36 = vsel %vm1429_vm11, 1.0, %v4727_v44  ;;  %vm2029_vm12 = vcmp.eq.s32.totalorder %v6058_v16, %v5319_v59 }
 0x18f   : > { %vm2031_vm13 = vcmp.eq.s32.totalorder %v6186_v21, %v5319_v59  ;;  %v1349_v33 = vadd.f32 %v1285_v29, %v997_v57  ;;  %v1630_v34 = vmul.f32 %v3983_v11, %v5315_v54  ;;  %v1632_v43 = vmul.f32 %v3985_v36, %v5315_v54 }
 0x190   : > { %v1351_v39 = vadd.f32 %v1287_v19, %v999_v4  ;;  %v4050_v35 = vsel %vm2029_vm12, 1.0, %v4727_v44  ;;  %v4052_v53 = vsel %vm2031_vm13, 1.0, %v4727_v44  ;;  %vm2381_vm14 = vcmp.eq.s32.totalorder %v6058_v16, %v5351_v61 }
 0x191   : > { %vm2383_vm15 = vcmp.eq.s32.totalorder %v6186_v21, %v5351_v61  ;;  %v1694_v26 = vadd.f32 %v1630_v34, %v1349_v33  ;;  %v2232_v10 = vmul.f32 %v4050_v35, %v5347_v41  ;;  %v2234_v52 = vmul.f32 %v4052_v53, %v5347_v41 }
 0x192   : > { %v1696_v48 = vadd.f32 %v1632_v43, %v1351_v39  ;;  %v4115_v55 = vsel %vm2381_vm14, 1.0, %v4727_v44  ;;  %v4117_v47 = vsel %vm2383_vm15, 1.0, %v4727_v44  ;;  %vm2733_vm6 = vcmp.eq.s32.totalorder %v6058_v16, %v5359_v9 }
 0x193   : > { %vm2735_vm8 = vcmp.eq.s32.totalorder %v6186_v21, %v5359_v9  ;;  %v2584_v17 = vmul.f32 %v4115_v55, %v5355_v7  ;;  %v2586_v18 = vmul.f32 %v4117_v47, %v5355_v7  ;;  %v4180_v3 = vsel %vm2733_vm6, 1.0, %v4727_v44 }
 0x194   : > { %v4389_v23 = vpack.c.bf16 %v1696_v48, %v1694_v26  ;;  %v4182_v32 = vsel %vm2735_vm8, 1.0, %v4727_v44  ;;  %v2936_v5 = vmul.f32 %v4180_v3, %v5365_v15  ;;  %vm3078_vm0 = vcmp.eq.s32.totalorder %v6058_v16, %v5385_v58 }
 0x195   : > { %vm3080_vm5 = vcmp.eq.s32.totalorder %v6186_v21, %v5385_v58  ;;  %v2648_v2 = vadd.f32 %v2584_v17, %v2232_v10  ;;  %v2650_v14 = vadd.f32 %v2586_v18, %v2234_v52  ;;  %v2938_v38 = vmul.f32 %v4182_v32, %v5365_v15 }
 0x196   : > { %4390 = vmatpush1.bf16.msra.mxu0 %v4389_v23  ;;  %v4245_v6 = vsel %vm3078_vm0, 1.0, %v4727_v44  ;;  %v4247_v29 = vsel %vm3080_vm5, 1.0, %v4727_v44  ;;  %v6319_v4 = vadd.s32 128, %v4955_v1  ;;  %v6322_v19 = vadd.s32 136, %v4955_v1 }
 0x197   : > { %v3281_v57 = vmul.f32 %v4245_v6, %v5389_v30  ;;  %v3000_v16 = vadd.f32 %v2936_v5, %v2648_v2  ;;  %v3002_v11 = vadd.f32 %v2938_v38, %v2650_v14  ;;  %v3283_v21 = vmul.f32 %v4247_v29, %v5389_v30 }
 0x198   : > { %v6326_v36 = vadd.s32 144, %v4955_v1  ;;  %vm383_vm2 = vcmp.eq.s32.totalorder %v6319_v4, %v5044_v63  ;;  %vm385_vm4 = vcmp.eq.s32.totalorder %v6322_v19, %v5044_v63  ;;  %vm735_vm3 = vcmp.eq.s32.totalorder %v6319_v4, %v5048_v0 }
 0x199   : > { %vm737_vm7 = vcmp.eq.s32.totalorder %v6322_v19, %v5048_v0  ;;  %v3345_v33 = vadd.f32 %v3281_v57, %v3000_v16  ;;  %v3347_v39 = vadd.f32 %v3283_v21, %v3002_v11  ;;  %v3793_v34 = vsel %vm383_vm2, 1.0, %v4727_v44 }
 0x19a   : > { %v3795_v43 = vsel %vm385_vm4, 1.0, %v4727_v44  ;;  %v586_v35 = vmul.f32 %v3793_v34, %v5025_v56  ;;  %v3858_v26 = vsel %vm735_vm3, 1.0, %v4727_v44  ;;  %v3860_v48 = vsel %vm737_vm7, 1.0, %v4727_v44 }
 0x19b   : > { %v588_v53 = vmul.f32 %v3795_v43, %v5025_v56  ;;  %v4453_v10 = vpack.c.bf16 %v3347_v39, %v3345_v33  ;;  %v938_v52 = vmul.f32 %v3858_v26, %v5056_v8  ;;  %v940_v55 = vmul.f32 %v3860_v48, %v5056_v8 }
 0x19c   : > { %vm1087_vm1 = vcmp.eq.s32.totalorder %v6319_v4, %v5112_v24  ;;  %vm1089_vm9 = vcmp.eq.s32.totalorder %v6322_v19, %v5112_v24  ;;  %vm1432_vm10 = vcmp.eq.s32.totalorder %v6319_v4, %v5116_v31  ;;  %vm1434_vm11 = vcmp.eq.s32.totalorder %v6322_v19, %v5116_v31 }
 0x19d   : > { %v3923_v47 = vsel %vm1087_vm1, 1.0, %v4727_v44  ;;  %4454 = vmatpush1.bf16.msra.mxu1 %v4453_v10  ;;  %v1002_v23 = vadd.f32 %v938_v52, %v586_v35  ;;  %v1004_v17 = vadd.f32 %v940_v55, %v588_v53  ;;  %v3925_v18 = vsel %vm1089_vm9, 1.0, %v4727_v44 }
 0x19e   : > { %v1290_v3 = vmul.f32 %v3923_v47, %v5082_v27  ;;  %v1292_v32 = vmul.f32 %v3925_v18, %v5082_v27  ;;  %v3988_v5 = vsel %vm1432_vm10, 1.0, %v4727_v44  ;;  %v3990_v2 = vsel %vm1434_vm11, 1.0, %v4727_v44 }
 0x19f   : > { %vm2034_vm12 = vcmp.eq.s32.totalorder %v6319_v4, %v5197_v28  ;;  %v1635_v38 = vmul.f32 %v3988_v5, %v5101_v37  ;;  %v1637_v6 = vmul.f32 %v3990_v2, %v5101_v37  ;;  %vm2036_vm13 = vcmp.eq.s32.totalorder %v6322_v19, %v5197_v28 }
 0x1a0   : > { %v1354_v14 = vadd.f32 %v1290_v3, %v1002_v23  ;;  %v1356_v29 = vadd.f32 %v1292_v32, %v1004_v17  ;;  %v4055_v57 = vsel %vm2034_vm12, 1.0, %v4727_v44  ;;  %v4057_v16 = vsel %vm2036_vm13, 1.0, %v4727_v44 }
 0x1a1   : > { %vm2386_vm14 = vcmp.eq.s32.totalorder %v6319_v4, %v5228_v42  ;;  %v2237_v21 = vmul.f32 %v4055_v57, %v5177_v22  ;;  %v2239_v33 = vmul.f32 %v4057_v16, %v5177_v22  ;;  %vm2388_vm15 = vcmp.eq.s32.totalorder %v6322_v19, %v5228_v42 }
 0x1a2   : > { %v1699_v11 = vadd.f32 %v1635_v38, %v1354_v14  ;;  %v1701_v39 = vadd.f32 %v1637_v6, %v1356_v29  ;;  %v4120_v34 = vsel %vm2386_vm14, 1.0, %v4727_v44  ;;  %v4122_v43 = vsel %vm2388_vm15, 1.0, %v4727_v44 }
 0x1a3   : > { %vm2738_vm6 = vcmp.eq.s32.totalorder %v6319_v4, %v5259_v12  ;;  %v2589_v35 = vmul.f32 %v4120_v34, %v5186_v62  ;;  %v2591_v53 = vmul.f32 %v4122_v43, %v5186_v62  ;;  %vm2740_vm8 = vcmp.eq.s32.totalorder %v6322_v19, %v5259_v12 }
 0x1a4   : > { %v4185_v26 = vsel %vm2738_vm6, 1.0, %v4727_v44  ;;  %v4391_v48 = vpack.c.bf16 %v1701_v39, %v1699_v11  ;;  %v4187_v10 = vsel %vm2740_vm8, 1.0, %v4727_v44  ;;  %vm3083_vm0 = vcmp.eq.s32.totalorder %v6319_v4, %v5263_v60 }
 0x1a5   : > { %v2941_v52 = vmul.f32 %v4185_v26, %v5222_v40  ;;  %v2653_v55 = vadd.f32 %v2589_v35, %v2237_v21  ;;  %v2655_v47 = vadd.f32 %v2591_v53, %v2239_v33  ;;  %v2943_v23 = vmul.f32 %v4187_v10, %v5222_v40 }
 0x1a6   : > { %vm3085_vm5 = vcmp.eq.s32.totalorder %v6322_v19, %v5263_v60  ;;  %4392 = vmatprep.subr.bf16.mxu0 %v4391_v48  ;;  %v4250_v17 = vsel %vm3083_vm0, 1.0, %v4727_v44  ;;  %vm382_vm2 = vcmp.eq.s32.totalorder %v6319_v4, %v5193_v25  ;;  %vm384_vm4 = vcmp.eq.s32.totalorder %v6322_v19, %v5193_v25 }
 0x1a7   : > { %v4252_v18 = vsel %vm3085_vm5, 1.0, %v4727_v44  ;;  %v3005_v3 = vadd.f32 %v2941_v52, %v2653_v55  ;;  %v3007_v32 = vadd.f32 %v2943_v23, %v2655_v47  ;;  %v3286_v5 = vmul.f32 %v4250_v17, %v5267_v13 }
 0x1a8   : > { %v3288_v2 = vmul.f32 %v4252_v18, %v5267_v13  ;;  %v3792_v14 = vsel %vm382_vm2, 1.0, %v4727_v44  ;;  %v3794_v38 = vsel %vm384_vm4, 1.0, %v4727_v44  ;;  %vm734_vm3 = vcmp.eq.s32.totalorder %v6319_v4, %v5273_v20 }
 0x1a9   : > { %vm736_vm7 = vcmp.eq.s32.totalorder %v6322_v19, %v5273_v20  ;;  %v3350_v6 = vadd.f32 %v3286_v5, %v3005_v3  ;;  %v585_v57 = vmul.f32 %v3792_v14, %v5239_v46  ;;  %v587_v16 = vmul.f32 %v3794_v38, %v5239_v46 }
 0x1aa   : > { %v3352_v29 = vadd.f32 %v3288_v2, %v3007_v32  ;;  %v3857_v11 = vsel %vm734_vm3, 1.0, %v4727_v44  ;;  %v3859_v21 = vsel %vm736_vm7, 1.0, %v4727_v44  ;;  %vm1086_vm1 = vcmp.eq.s32.totalorder %v6319_v4, %v5303_v49 }
 0x1ab   : > { %vm1088_vm9 = vcmp.eq.s32.totalorder %v6322_v19, %v5303_v49  ;;  %v937_v39 = vmul.f32 %v3857_v11, %v5299_v45  ;;  %v939_v34 = vmul.f32 %v3859_v21, %v5299_v45  ;;  %v3922_v43 = vsel %vm1086_vm1, 1.0, %v4727_v44 }
 0x1ac   : > { %v4455_v33 = vpack.c.bf16 %v3352_v29, %v3350_v6  ;;  %v3924_v35 = vsel %vm1088_vm9, 1.0, %v4727_v44  ;;  %v1289_v53 = vmul.f32 %v3922_v43, %v5307_v51  ;;  %vm1431_vm10 = vcmp.eq.s32.totalorder %v6319_v4, %v5311_v50 }
 0x1ad   : > { %vm1433_vm11 = vcmp.eq.s32.totalorder %v6322_v19, %v5311_v50  ;;  %v1001_v26 = vadd.f32 %v937_v39, %v585_v57  ;;  %v1003_v48 = vadd.f32 %v939_v34, %v587_v16  ;;  %v1291_v10 = vmul.f32 %v3924_v35, %v5307_v51 }
 0x1ae   : > { %4456 = vmatprep.subr.bf16.mxu1 %v4455_v33  ;;  %v3987_v52 = vsel %vm1431_vm10, 1.0, %v4727_v44  ;;  %v3989_v55 = vsel %vm1433_vm11, 1.0, %v4727_v44  ;;  %vm2033_vm12 = vcmp.eq.s32.totalorder %v6319_v4, %v5319_v59  ;;  %vm2035_vm13 = vcmp.eq.s32.totalorder %v6322_v19, %v5319_v59 }
 0x1af   : > { %v1634_v47 = vmul.f32 %v3987_v52, %v5315_v54  ;;  %v1353_v23 = vadd.f32 %v1289_v53, %v1001_v26  ;;  %v1355_v17 = vadd.f32 %v1291_v10, %v1003_v48  ;;  %v1636_v18 = vmul.f32 %v3989_v55, %v5315_v54 }
 0x1b0   : > { %v4054_v3 = vsel %vm2033_vm12, 1.0, %v4727_v44  ;;  %v4056_v32 = vsel %vm2035_vm13, 1.0, %v4727_v44  ;;  %vm2385_vm14 = vcmp.eq.s32.totalorder %v6319_v4, %v5351_v61  ;;  %vm2387_vm15 = vcmp.eq.s32.totalorder %v6322_v19, %v5351_v61 }
 0x1b1   : > { %v2236_v5 = vmul.f32 %v4054_v3, %v5347_v41  ;;  %v1698_v2 = vadd.f32 %v1634_v47, %v1353_v23  ;;  %v1700_v14 = vadd.f32 %v1636_v18, %v1355_v17  ;;  %v2238_v38 = vmul.f32 %v4056_v32, %v5347_v41 }
 0x1b2   : > { %v4119_v6 = vsel %vm2385_vm14, 1.0, %v4727_v44  ;;  %v4121_v29 = vsel %vm2387_vm15, 1.0, %v4727_v44  ;;  %vm2737_vm6 = vcmp.eq.s32.totalorder %v6319_v4, %v5359_v9  ;;  %vm2739_vm8 = vcmp.eq.s32.totalorder %v6322_v19, %v5359_v9 }
 0x1b3   : > { %v2588_v57 = vmul.f32 %v4119_v6, %v5355_v7  ;;  %v4393_v16 = vpack.c.bf16 %v1700_v14, %v1698_v2  ;;  %v2590_v11 = vmul.f32 %v4121_v29, %v5355_v7  ;;  %v4184_v21 = vsel %vm2737_vm6, 1.0, %v4727_v44 }
 0x1b4   : > { %v4186_v33 = vsel %vm2739_vm8, 1.0, %v4727_v44  ;;  %v2940_v34 = vmul.f32 %v4184_v21, %v5365_v15  ;;  %vm3082_vm0 = vcmp.eq.s32.totalorder %v6319_v4, %v5385_v58  ;;  %vm3084_vm5 = vcmp.eq.s32.totalorder %v6322_v19, %v5385_v58 }
 0x1b5   : > { %v2652_v39 = vadd.f32 %v2588_v57, %v2236_v5  ;;  %v2942_v43 = vmul.f32 %v4186_v33, %v5365_v15  ;;  %4394 = vmatpush1.bf16.msra.mxu0 %v4393_v16  ;;  %v2654_v35 = vadd.f32 %v2590_v11, %v2238_v38  ;;  %v4249_v53 = vsel %vm3082_vm0, 1.0, %v4727_v44 }
 0x1b6   : > { %v6454_v26 = vadd.s32 152, %v4955_v1  ;;  %v4251_v10 = vsel %vm3084_vm5, 1.0, %v4727_v44  ;;  %v3285_v52 = vmul.f32 %v4249_v53, %v5389_v30  ;;  %vm387_vm2 = vcmp.eq.s32.totalorder %v6326_v36, %v5044_v63 }
 0x1b7   : > { %v3004_v48 = vadd.f32 %v2940_v34, %v2652_v39  ;;  %v3006_v55 = vadd.f32 %v2942_v43, %v2654_v35  ;;  %v3287_v4 = vmul.f32 %v4251_v10, %v5389_v30  ;;  %v3797_v19 = vsel %vm387_vm2, 1.0, %v4727_v44 }
 0x1b8   : > { %vm389_vm4 = vcmp.eq.s32.totalorder %v6454_v26, %v5044_v63  ;;  %v590_v17 = vmul.f32 %v3797_v19, %v5025_v56  ;;  %vm739_vm3 = vcmp.eq.s32.totalorder %v6326_v36, %v5048_v0  ;;  %vm741_vm7 = vcmp.eq.s32.totalorder %v6454_v26, %v5048_v0 }
 0x1b9   : > { %v3349_v47 = vadd.f32 %v3285_v52, %v3004_v48  ;;  %v3799_v23 = vsel %vm389_vm4, 1.0, %v4727_v44  ;;  %v3351_v18 = vadd.f32 %v3287_v4, %v3006_v55  ;;  %v3862_v32 = vsel %vm739_vm3, 1.0, %v4727_v44 }
 0x1ba   : > { %v592_v3 = vmul.f32 %v3799_v23, %v5025_v56  ;;  %v3864_v5 = vsel %vm741_vm7, 1.0, %v4727_v44  ;;  %v942_v2 = vmul.f32 %v3862_v32, %v5056_v8  ;;  %vm1091_vm1 = vcmp.eq.s32.totalorder %v6326_v36, %v5112_v24 }
 0x1bb   : > { %vm1093_vm9 = vcmp.eq.s32.totalorder %v6454_v26, %v5112_v24  ;;  %v4457_v14 = vpack.c.bf16 %v3351_v18, %v3349_v47  ;;  %v944_v38 = vmul.f32 %v3864_v5, %v5056_v8  ;;  %v3927_v6 = vsel %vm1091_vm1, 1.0, %v4727_v44 }
 0x1bc   : > { %v3929_v29 = vsel %vm1093_vm9, 1.0, %v4727_v44  ;;  %v1006_v57 = vadd.f32 %v942_v2, %v590_v17  ;;  %v1294_v16 = vmul.f32 %v3927_v6, %v5082_v27  ;;  %vm1436_vm10 = vcmp.eq.s32.totalorder %v6326_v36, %v5116_v31 }
 0x1bd   : > { %v1296_v11 = vmul.f32 %v3929_v29, %v5082_v27  ;;  %4458 = vmatpush1.bf16.msra.mxu1 %v4457_v14  ;;  %v1008_v21 = vadd.f32 %v944_v38, %v592_v3  ;;  %vm1438_vm11 = vcmp.eq.s32.totalorder %v6454_v26, %v5116_v31  ;;  %v3992_v33 = vsel %vm1436_vm10, 1.0, %v4727_v44 }
 0x1be   : > { %vm2038_vm12 = vcmp.eq.s32.totalorder %v6326_v36, %v5197_v28  ;;  %v1358_v39 = vadd.f32 %v1294_v16, %v1006_v57  ;;  %v3994_v34 = vsel %vm1438_vm11, 1.0, %v4727_v44  ;;  %v1639_v43 = vmul.f32 %v3992_v33, %v5101_v37 }
 0x1bf   : > { %vm2040_vm13 = vcmp.eq.s32.totalorder %v6454_v26, %v5197_v28  ;;  %v1360_v35 = vadd.f32 %v1296_v11, %v1008_v21  ;;  %v1641_v53 = vmul.f32 %v3994_v34, %v5101_v37  ;;  %v4059_v48 = vsel %vm2038_vm12, 1.0, %v4727_v44 }
 0x1c0   : > { %v4061_v10 = vsel %vm2040_vm13, 1.0, %v4727_v44  ;;  %v1703_v52 = vadd.f32 %v1639_v43, %v1358_v39  ;;  %v2241_v55 = vmul.f32 %v4059_v48, %v5177_v22  ;;  %vm2390_vm14 = vcmp.eq.s32.totalorder %v6326_v36, %v5228_v42 }
 0x1c1   : > { %v2243_v4 = vmul.f32 %v4061_v10, %v5177_v22  ;;  %v1705_v19 = vadd.f32 %v1641_v53, %v1360_v35  ;;  %vm2392_vm15 = vcmp.eq.s32.totalorder %v6454_v26, %v5228_v42  ;;  %v4124_v47 = vsel %vm2390_vm14, 1.0, %v4727_v44 }
 0x1c2   : > { %vm2742_vm6 = vcmp.eq.s32.totalorder %v6326_v36, %v5259_v12  ;;  %v4126_v23 = vsel %vm2392_vm15, 1.0, %v4727_v44  ;;  %v2593_v17 = vmul.f32 %v4124_v47, %v5186_v62  ;;  %vm2744_vm8 = vcmp.eq.s32.totalorder %v6454_v26, %v5259_v12 }
 0x1c3   : > { %v4189_v18 = vsel %vm2742_vm6, 1.0, %v4727_v44  ;;  %v4395_v3 = vpack.c.bf16 %v1705_v19, %v1703_v52  ;;  %v2595_v32 = vmul.f32 %v4126_v23, %v5186_v62  ;;  %v4191_v5 = vsel %vm2744_vm8, 1.0, %v4727_v44 }
 0x1c4   : > { %v2945_v2 = vmul.f32 %v4189_v18, %v5222_v40  ;;  %v2657_v14 = vadd.f32 %v2593_v17, %v2241_v55  ;;  %v2947_v38 = vmul.f32 %v4191_v5, %v5222_v40  ;;  %vm3087_vm0 = vcmp.eq.s32.totalorder %v6326_v36, %v5263_v60 }
 0x1c5   : > { %vm3089_vm5 = vcmp.eq.s32.totalorder %v6454_v26, %v5263_v60  ;;  %4396 = vmatprep.subr.bf16.mxu0 %v4395_v3  ;;  %v2659_v6 = vadd.f32 %v2595_v32, %v2243_v4  ;;  %v4254_v29 = vsel %vm3087_vm0, 1.0, %v4727_v44  ;;  %vm386_vm2 = vcmp.eq.s32.totalorder %v6326_v36, %v5193_v25 }
 0x1c6   : > { %v4256_v57 = vsel %vm3089_vm5, 1.0, %v4727_v44  ;;  %v3009_v16 = vadd.f32 %v2945_v2, %v2657_v14  ;;  %v3290_v11 = vmul.f32 %v4254_v29, %v5267_v13  ;;  %vm388_vm4 = vcmp.eq.s32.totalorder %v6454_v26, %v5193_v25 }
 0x1c7   : > { %v3292_v21 = vmul.f32 %v4256_v57, %v5267_v13  ;;  %v3011_v33 = vadd.f32 %v2947_v38, %v2659_v6  ;;  %v3796_v39 = vsel %vm386_vm2, 1.0, %v4727_v44  ;;  %v3798_v34 = vsel %vm388_vm4, 1.0, %v4727_v44 }
 0x1c8   : > { %vm738_vm3 = vcmp.eq.s32.totalorder %v6326_v36, %v5273_v20  ;;  %v3354_v43 = vadd.f32 %v3290_v11, %v3009_v16  ;;  %v589_v35 = vmul.f32 %v3796_v39, %v5239_v46  ;;  %v591_v53 = vmul.f32 %v3798_v34, %v5239_v46 }
 0x1c9   : > { %vm740_vm7 = vcmp.eq.s32.totalorder %v6454_v26, %v5273_v20  ;;  %v3356_v48 = vadd.f32 %v3292_v21, %v3011_v33  ;;  %v3861_v10 = vsel %vm738_vm3, 1.0, %v4727_v44  ;;  %vm1090_vm1 = vcmp.eq.s32.totalorder %v6326_v36, %v5303_v49 }
 0x1ca   : > { %v3863_v52 = vsel %vm740_vm7, 1.0, %v4727_v44  ;;  %v941_v55 = vmul.f32 %v3861_v10, %v5299_v45  ;;  %vm1092_vm9 = vcmp.eq.s32.totalorder %v6454_v26, %v5303_v49  ;;  %v3926_v19 = vsel %vm1090_vm1, 1.0, %v4727_v44 }
 0x1cb   : > { %v943_v4 = vmul.f32 %v3863_v52, %v5299_v45  ;;  %v4459_v47 = vpack.c.bf16 %v3356_v48, %v3354_v43  ;;  %v3928_v23 = vsel %vm1092_vm9, 1.0, %v4727_v44  ;;  %v1293_v17 = vmul.f32 %v3926_v19, %v5307_v51 }
 0x1cc   : > { %vm1435_vm10 = vcmp.eq.s32.totalorder %v6326_v36, %v5311_v50  ;;  %v1005_v18 = vadd.f32 %v941_v55, %v589_v35  ;;  %v1295_v32 = vmul.f32 %v3928_v23, %v5307_v51  ;;  %vm1437_vm11 = vcmp.eq.s32.totalorder %v6454_v26, %v5311_v50 }
 0x1cd   : > { %v1007_v3 = vadd.f32 %v943_v4, %v591_v53  ;;  %4460 = vmatprep.subr.bf16.mxu1 %v4459_v47  ;;  %v3991_v5 = vsel %vm1435_vm10, 1.0, %v4727_v44  ;;  %v3993_v2 = vsel %vm1437_vm11, 1.0, %v4727_v44  ;;  %vm2037_vm12 = vcmp.eq.s32.totalorder %v6326_v36, %v5319_v59 }
 0x1ce   : > { %vm2039_vm13 = vcmp.eq.s32.totalorder %v6454_v26, %v5319_v59  ;;  %v1357_v14 = vadd.f32 %v1293_v17, %v1005_v18  ;;  %v1638_v6 = vmul.f32 %v3991_v5, %v5315_v54  ;;  %v1640_v29 = vmul.f32 %v3993_v2, %v5315_v54 }
 0x1cf   : > { %v1359_v38 = vadd.f32 %v1295_v32, %v1007_v3  ;;  %v4058_v57 = vsel %vm2037_vm12, 1.0, %v4727_v44  ;;  %v4060_v16 = vsel %vm2039_vm13, 1.0, %v4727_v44  ;;  %vm2389_vm14 = vcmp.eq.s32.totalorder %v6326_v36, %v5351_v61 }
 0x1d0   : > { %vm2391_vm15 = vcmp.eq.s32.totalorder %v6454_v26, %v5351_v61  ;;  %v1702_v11 = vadd.f32 %v1638_v6, %v1357_v14  ;;  %v2240_v33 = vmul.f32 %v4058_v57, %v5347_v41  ;;  %v2242_v39 = vmul.f32 %v4060_v16, %v5347_v41 }
 0x1d1   : > { %v1704_v21 = vadd.f32 %v1640_v29, %v1359_v38  ;;  %v4123_v34 = vsel %vm2389_vm14, 1.0, %v4727_v44  ;;  %v4125_v43 = vsel %vm2391_vm15, 1.0, %v4727_v44  ;;  %vm2741_vm6 = vcmp.eq.s32.totalorder %v6326_v36, %v5359_v9 }
 0x1d2   : > { %vm2743_vm8 = vcmp.eq.s32.totalorder %v6454_v26, %v5359_v9  ;;  %v2592_v53 = vmul.f32 %v4123_v34, %v5355_v7  ;;  %v2594_v48 = vmul.f32 %v4125_v43, %v5355_v7  ;;  %v4188_v10 = vsel %vm2741_vm6, 1.0, %v4727_v44 }
 0x1d3   : > { %v4397_v35 = vpack.c.bf16 %v1704_v21, %v1702_v11  ;;  %v4190_v52 = vsel %vm2743_vm8, 1.0, %v4727_v44  ;;  %v2944_v55 = vmul.f32 %v4188_v10, %v5365_v15  ;;  %vm3086_vm0 = vcmp.eq.s32.totalorder %v6326_v36, %v5385_v58 }
 0x1d4   : > { %vm3088_vm5 = vcmp.eq.s32.totalorder %v6454_v26, %v5385_v58  ;;  %v2656_v4 = vadd.f32 %v2592_v53, %v2240_v33  ;;  %v2658_v19 = vadd.f32 %v2594_v48, %v2242_v39  ;;  %v2946_v47 = vmul.f32 %v4190_v52, %v5365_v15 }
 0x1d5   : > { %4398 = vmatpush1.bf16.msra.mxu0 %v4397_v35  ;;  %v4253_v23 = vsel %vm3086_vm0, 1.0, %v4727_v44  ;;  %v4255_v17 = vsel %vm3088_vm5, 1.0, %v4727_v44  ;;  %v6587_v3 = vadd.s32 160, %v4955_v1  ;;  %v6590_v32 = vadd.s32 168, %v4955_v1 }
 0x1d6   : > { %v3289_v18 = vmul.f32 %v4253_v23, %v5389_v30  ;;  %v3008_v36 = vadd.f32 %v2944_v55, %v2656_v4  ;;  %v3010_v5 = vadd.f32 %v2946_v47, %v2658_v19  ;;  %v3291_v26 = vmul.f32 %v4255_v17, %v5389_v30 }
 0x1d7   : > { %v6594_v2 = vadd.s32 176, %v4955_v1  ;;  %vm391_vm2 = vcmp.eq.s32.totalorder %v6587_v3, %v5044_v63  ;;  %vm393_vm4 = vcmp.eq.s32.totalorder %v6590_v32, %v5044_v63  ;;  %vm743_vm3 = vcmp.eq.s32.totalorder %v6587_v3, %v5048_v0 }
 0x1d8   : > { %vm745_vm7 = vcmp.eq.s32.totalorder %v6590_v32, %v5048_v0  ;;  %v3353_v14 = vadd.f32 %v3289_v18, %v3008_v36  ;;  %v3355_v38 = vadd.f32 %v3291_v26, %v3010_v5  ;;  %v3801_v6 = vsel %vm391_vm2, 1.0, %v4727_v44 }
 0x1d9   : > { %v3803_v29 = vsel %vm393_vm4, 1.0, %v4727_v44  ;;  %v594_v57 = vmul.f32 %v3801_v6, %v5025_v56  ;;  %v3866_v11 = vsel %vm743_vm3, 1.0, %v4727_v44  ;;  %v3868_v21 = vsel %vm745_vm7, 1.0, %v4727_v44 }
 0x1da   : > { %v596_v16 = vmul.f32 %v3803_v29, %v5025_v56  ;;  %v4461_v33 = vpack.c.bf16 %v3355_v38, %v3353_v14  ;;  %v946_v39 = vmul.f32 %v3866_v11, %v5056_v8  ;;  %v948_v34 = vmul.f32 %v3868_v21, %v5056_v8 }
 0x1db   : > { %vm1095_vm1 = vcmp.eq.s32.totalorder %v6587_v3, %v5112_v24  ;;  %vm1097_vm9 = vcmp.eq.s32.totalorder %v6590_v32, %v5112_v24  ;;  %vm1440_vm10 = vcmp.eq.s32.totalorder %v6587_v3, %v5116_v31  ;;  %vm1442_vm11 = vcmp.eq.s32.totalorder %v6590_v32, %v5116_v31 }
 0x1dc   : > { %v3931_v43 = vsel %vm1095_vm1, 1.0, %v4727_v44  ;;  %4462 = vmatpush1.bf16.msra.mxu1 %v4461_v33  ;;  %v1010_v35 = vadd.f32 %v946_v39, %v594_v57  ;;  %v1012_v53 = vadd.f32 %v948_v34, %v596_v16  ;;  %v3933_v48 = vsel %vm1097_vm9, 1.0, %v4727_v44 }
 0x1dd   : > { %v1298_v10 = vmul.f32 %v3931_v43, %v5082_v27  ;;  %v1300_v52 = vmul.f32 %v3933_v48, %v5082_v27  ;;  %v3996_v55 = vsel %vm1440_vm10, 1.0, %v4727_v44  ;;  %v3998_v4 = vsel %vm1442_vm11, 1.0, %v4727_v44 }
 0x1de   : > { %vm2042_vm12 = vcmp.eq.s32.totalorder %v6587_v3, %v5197_v28  ;;  %v1643_v47 = vmul.f32 %v3996_v55, %v5101_v37  ;;  %v1645_v23 = vmul.f32 %v3998_v4, %v5101_v37  ;;  %vm2044_vm13 = vcmp.eq.s32.totalorder %v6590_v32, %v5197_v28 }
 0x1df   : > { %v1362_v19 = vadd.f32 %v1298_v10, %v1010_v35  ;;  %v1364_v17 = vadd.f32 %v1300_v52, %v1012_v53  ;;  %v4063_v18 = vsel %vm2042_vm12, 1.0, %v4727_v44  ;;  %v4065_v36 = vsel %vm2044_vm13, 1.0, %v4727_v44 }
 0x1e0   : > { %vm2394_vm14 = vcmp.eq.s32.totalorder %v6587_v3, %v5228_v42  ;;  %v2245_v26 = vmul.f32 %v4063_v18, %v5177_v22  ;;  %v2247_v14 = vmul.f32 %v4065_v36, %v5177_v22  ;;  %vm2396_vm15 = vcmp.eq.s32.totalorder %v6590_v32, %v5228_v42 }
 0x1e1   : > { %v1707_v5 = vadd.f32 %v1643_v47, %v1362_v19  ;;  %v1709_v38 = vadd.f32 %v1645_v23, %v1364_v17  ;;  %v4128_v6 = vsel %vm2394_vm14, 1.0, %v4727_v44  ;;  %v4130_v29 = vsel %vm2396_vm15, 1.0, %v4727_v44 }
 0x1e2   : > { %vm2746_vm6 = vcmp.eq.s32.totalorder %v6587_v3, %v5259_v12  ;;  %v2597_v57 = vmul.f32 %v4128_v6, %v5186_v62  ;;  %v2599_v16 = vmul.f32 %v4130_v29, %v5186_v62  ;;  %vm2748_vm8 = vcmp.eq.s32.totalorder %v6590_v32, %v5259_v12 }
 0x1e3   : > { %v4193_v11 = vsel %vm2746_vm6, 1.0, %v4727_v44  ;;  %v4399_v21 = vpack.c.bf16 %v1709_v38, %v1707_v5  ;;  %v4195_v33 = vsel %vm2748_vm8, 1.0, %v4727_v44  ;;  %vm3091_vm0 = vcmp.eq.s32.totalorder %v6587_v3, %v5263_v60 }
 0x1e4   : > { %v2949_v39 = vmul.f32 %v4193_v11, %v5222_v40  ;;  %v2661_v34 = vadd.f32 %v2597_v57, %v2245_v26  ;;  %v2663_v43 = vadd.f32 %v2599_v16, %v2247_v14  ;;  %v2951_v35 = vmul.f32 %v4195_v33, %v5222_v40 }
 0x1e5   : > { %vm3093_vm5 = vcmp.eq.s32.totalorder %v6590_v32, %v5263_v60  ;;  %4400 = vmatprep.subr.bf16.mxu0 %v4399_v21  ;;  %v4258_v53 = vsel %vm3091_vm0, 1.0, %v4727_v44  ;;  %vm390_vm2 = vcmp.eq.s32.totalorder %v6587_v3, %v5193_v25  ;;  %vm392_vm4 = vcmp.eq.s32.totalorder %v6590_v32, %v5193_v25 }
 0x1e6   : > { %v4260_v48 = vsel %vm3093_vm5, 1.0, %v4727_v44  ;;  %v3013_v10 = vadd.f32 %v2949_v39, %v2661_v34  ;;  %v3015_v52 = vadd.f32 %v2951_v35, %v2663_v43  ;;  %v3294_v55 = vmul.f32 %v4258_v53, %v5267_v13 }
 0x1e7   : > { %v3296_v4 = vmul.f32 %v4260_v48, %v5267_v13  ;;  %v3800_v19 = vsel %vm390_vm2, 1.0, %v4727_v44  ;;  %v3802_v47 = vsel %vm392_vm4, 1.0, %v4727_v44  ;;  %vm742_vm3 = vcmp.eq.s32.totalorder %v6587_v3, %v5273_v20 }
 0x1e8   : > { %vm744_vm7 = vcmp.eq.s32.totalorder %v6590_v32, %v5273_v20  ;;  %v3358_v23 = vadd.f32 %v3294_v55, %v3013_v10  ;;  %v593_v18 = vmul.f32 %v3800_v19, %v5239_v46  ;;  %v595_v36 = vmul.f32 %v3802_v47, %v5239_v46 }
 0x1e9   : > { %v3360_v17 = vadd.f32 %v3296_v4, %v3015_v52  ;;  %v3865_v5 = vsel %vm742_vm3, 1.0, %v4727_v44  ;;  %v3867_v26 = vsel %vm744_vm7, 1.0, %v4727_v44  ;;  %vm1094_vm1 = vcmp.eq.s32.totalorder %v6587_v3, %v5303_v49 }
 0x1ea   : > { %vm1096_vm9 = vcmp.eq.s32.totalorder %v6590_v32, %v5303_v49  ;;  %v945_v38 = vmul.f32 %v3865_v5, %v5299_v45  ;;  %v947_v6 = vmul.f32 %v3867_v26, %v5299_v45  ;;  %v3930_v29 = vsel %vm1094_vm1, 1.0, %v4727_v44 }
 0x1eb   : > { %v4463_v14 = vpack.c.bf16 %v3360_v17, %v3358_v23  ;;  %v3932_v57 = vsel %vm1096_vm9, 1.0, %v4727_v44  ;;  %v1297_v16 = vmul.f32 %v3930_v29, %v5307_v51  ;;  %vm1439_vm10 = vcmp.eq.s32.totalorder %v6587_v3, %v5311_v50 }
 0x1ec   : > { %vm1441_vm11 = vcmp.eq.s32.totalorder %v6590_v32, %v5311_v50  ;;  %v1009_v11 = vadd.f32 %v945_v38, %v593_v18  ;;  %v1011_v21 = vadd.f32 %v947_v6, %v595_v36  ;;  %v1299_v33 = vmul.f32 %v3932_v57, %v5307_v51 }
 0x1ed   : > { %4464 = vmatprep.subr.bf16.mxu1 %v4463_v14  ;;  %v3995_v39 = vsel %vm1439_vm10, 1.0, %v4727_v44  ;;  %v3997_v34 = vsel %vm1441_vm11, 1.0, %v4727_v44  ;;  %vm2041_vm12 = vcmp.eq.s32.totalorder %v6587_v3, %v5319_v59  ;;  %vm2043_vm13 = vcmp.eq.s32.totalorder %v6590_v32, %v5319_v59 }
 0x1ee   : > { %v1642_v43 = vmul.f32 %v3995_v39, %v5315_v54  ;;  %v1361_v35 = vadd.f32 %v1297_v16, %v1009_v11  ;;  %v1363_v53 = vadd.f32 %v1299_v33, %v1011_v21  ;;  %v1644_v48 = vmul.f32 %v3997_v34, %v5315_v54 }
 0x1ef   : > { %v4062_v10 = vsel %vm2041_vm12, 1.0, %v4727_v44  ;;  %v4064_v52 = vsel %vm2043_vm13, 1.0, %v4727_v44  ;;  %vm2393_vm14 = vcmp.eq.s32.totalorder %v6587_v3, %v5351_v61  ;;  %vm2395_vm15 = vcmp.eq.s32.totalorder %v6590_v32, %v5351_v61 }
 0x1f0   : > { %v2244_v55 = vmul.f32 %v4062_v10, %v5347_v41  ;;  %v1706_v4 = vadd.f32 %v1642_v43, %v1361_v35  ;;  %v1708_v19 = vadd.f32 %v1644_v48, %v1363_v53  ;;  %v2246_v47 = vmul.f32 %v4064_v52, %v5347_v41 }
 0x1f1   : > { %v4127_v23 = vsel %vm2393_vm14, 1.0, %v4727_v44  ;;  %v4129_v17 = vsel %vm2395_vm15, 1.0, %v4727_v44  ;;  %vm2745_vm6 = vcmp.eq.s32.totalorder %v6587_v3, %v5359_v9  ;;  %vm2747_vm8 = vcmp.eq.s32.totalorder %v6590_v32, %v5359_v9 }
 0x1f2   : > { %v2596_v18 = vmul.f32 %v4127_v23, %v5355_v7  ;;  %v4401_v36 = vpack.c.bf16 %v1708_v19, %v1706_v4  ;;  %v2598_v5 = vmul.f32 %v4129_v17, %v5355_v7  ;;  %v4192_v26 = vsel %vm2745_vm6, 1.0, %v4727_v44 }
 0x1f3   : > { %v4194_v14 = vsel %vm2747_vm8, 1.0, %v4727_v44  ;;  %v2948_v6 = vmul.f32 %v4192_v26, %v5365_v15  ;;  %vm3090_vm0 = vcmp.eq.s32.totalorder %v6587_v3, %v5385_v58  ;;  %vm3092_vm5 = vcmp.eq.s32.totalorder %v6590_v32, %v5385_v58 }
 0x1f4   : > { %v2660_v38 = vadd.f32 %v2596_v18, %v2244_v55  ;;  %v2950_v29 = vmul.f32 %v4194_v14, %v5365_v15  ;;  %4402 = vmatpush1.bf16.msra.mxu0 %v4401_v36  ;;  %v2662_v57 = vadd.f32 %v2598_v5, %v2246_v47  ;;  %v4257_v16 = vsel %vm3090_vm0, 1.0, %v4727_v44 }
 0x1f5   : > { %v6722_v11 = vadd.s32 184, %v4955_v1  ;;  %v4259_v33 = vsel %vm3092_vm5, 1.0, %v4727_v44  ;;  %v3293_v39 = vmul.f32 %v4257_v16, %v5389_v30  ;;  %vm395_vm2 = vcmp.eq.s32.totalorder %v6594_v2, %v5044_v63 }
 0x1f6   : > { %v3012_v21 = vadd.f32 %v2948_v6, %v2660_v38  ;;  %v3014_v34 = vadd.f32 %v2950_v29, %v2662_v57  ;;  %v3295_v3 = vmul.f32 %v4259_v33, %v5389_v30  ;;  %v3805_v32 = vsel %vm395_vm2, 1.0, %v4727_v44 }
 0x1f7   : > { %vm397_vm4 = vcmp.eq.s32.totalorder %v6722_v11, %v5044_v63  ;;  %v598_v53 = vmul.f32 %v3805_v32, %v5025_v56  ;;  %vm747_vm3 = vcmp.eq.s32.totalorder %v6594_v2, %v5048_v0  ;;  %vm749_vm7 = vcmp.eq.s32.totalorder %v6722_v11, %v5048_v0 }
 0x1f8   : > { %v3357_v43 = vadd.f32 %v3293_v39, %v3012_v21  ;;  %v3807_v35 = vsel %vm397_vm4, 1.0, %v4727_v44  ;;  %v3359_v48 = vadd.f32 %v3295_v3, %v3014_v34  ;;  %v3870_v52 = vsel %vm747_vm3, 1.0, %v4727_v44 }
 0x1f9   : > { %v600_v10 = vmul.f32 %v3807_v35, %v5025_v56  ;;  %v3872_v55 = vsel %vm749_vm7, 1.0, %v4727_v44  ;;  %v950_v4 = vmul.f32 %v3870_v52, %v5056_v8  ;;  %vm1099_vm1 = vcmp.eq.s32.totalorder %v6594_v2, %v5112_v24 }
 0x1fa   : > { %vm1101_vm9 = vcmp.eq.s32.totalorder %v6722_v11, %v5112_v24  ;;  %v4465_v19 = vpack.c.bf16 %v3359_v48, %v3357_v43  ;;  %v952_v47 = vmul.f32 %v3872_v55, %v5056_v8  ;;  %v3935_v23 = vsel %vm1099_vm1, 1.0, %v4727_v44 }
 0x1fb   : > { %v3937_v17 = vsel %vm1101_vm9, 1.0, %v4727_v44  ;;  %v1014_v18 = vadd.f32 %v950_v4, %v598_v53  ;;  %v1302_v36 = vmul.f32 %v3935_v23, %v5082_v27  ;;  %vm1444_vm10 = vcmp.eq.s32.totalorder %v6594_v2, %v5116_v31 }
 0x1fc   : > { %v1304_v5 = vmul.f32 %v3937_v17, %v5082_v27  ;;  %4466 = vmatpush1.bf16.msra.mxu1 %v4465_v19  ;;  %v1016_v26 = vadd.f32 %v952_v47, %v600_v10  ;;  %vm1446_vm11 = vcmp.eq.s32.totalorder %v6722_v11, %v5116_v31  ;;  %v4000_v14 = vsel %vm1444_vm10, 1.0, %v4727_v44 }
 0x1fd   : > { %vm2046_vm12 = vcmp.eq.s32.totalorder %v6594_v2, %v5197_v28  ;;  %v1366_v38 = vadd.f32 %v1302_v36, %v1014_v18  ;;  %v4002_v6 = vsel %vm1446_vm11, 1.0, %v4727_v44  ;;  %v1647_v29 = vmul.f32 %v4000_v14, %v5101_v37 }
 0x1fe   : > { %vm2048_vm13 = vcmp.eq.s32.totalorder %v6722_v11, %v5197_v28  ;;  %v1368_v57 = vadd.f32 %v1304_v5, %v1016_v26  ;;  %v1649_v16 = vmul.f32 %v4002_v6, %v5101_v37  ;;  %v4067_v21 = vsel %vm2046_vm12, 1.0, %v4727_v44 }
 0x1ff   : > { %v4069_v33 = vsel %vm2048_vm13, 1.0, %v4727_v44  ;;  %v1711_v39 = vadd.f32 %v1647_v29, %v1366_v38  ;;  %v2249_v34 = vmul.f32 %v4067_v21, %v5177_v22  ;;  %vm2398_vm14 = vcmp.eq.s32.totalorder %v6594_v2, %v5228_v42 }
 0x200   : > { %v2251_v3 = vmul.f32 %v4069_v33, %v5177_v22  ;;  %v1713_v32 = vadd.f32 %v1649_v16, %v1368_v57  ;;  %vm2400_vm15 = vcmp.eq.s32.totalorder %v6722_v11, %v5228_v42  ;;  %v4132_v43 = vsel %vm2398_vm14, 1.0, %v4727_v44 }
 0x201   : > { %vm2750_vm6 = vcmp.eq.s32.totalorder %v6594_v2, %v5259_v12  ;;  %v4134_v35 = vsel %vm2400_vm15, 1.0, %v4727_v44  ;;  %v2601_v53 = vmul.f32 %v4132_v43, %v5186_v62  ;;  %vm2752_vm8 = vcmp.eq.s32.totalorder %v6722_v11, %v5259_v12 }
 0x202   : > { %v4197_v48 = vsel %vm2750_vm6, 1.0, %v4727_v44  ;;  %v4403_v10 = vpack.c.bf16 %v1713_v32, %v1711_v39  ;;  %v2603_v52 = vmul.f32 %v4134_v35, %v5186_v62  ;;  %v4199_v55 = vsel %vm2752_vm8, 1.0, %v4727_v44 }
 0x203   : > { %v2953_v4 = vmul.f32 %v4197_v48, %v5222_v40  ;;  %v2665_v19 = vadd.f32 %v2601_v53, %v2249_v34  ;;  %v2955_v47 = vmul.f32 %v4199_v55, %v5222_v40  ;;  %vm3095_vm0 = vcmp.eq.s32.totalorder %v6594_v2, %v5263_v60 }
 0x204   : > { %vm3097_vm5 = vcmp.eq.s32.totalorder %v6722_v11, %v5263_v60  ;;  %4404 = vmatprep.subr.bf16.mxu0 %v4403_v10  ;;  %v2667_v23 = vadd.f32 %v2603_v52, %v2251_v3  ;;  %v4262_v17 = vsel %vm3095_vm0, 1.0, %v4727_v44  ;;  %vm394_vm2 = vcmp.eq.s32.totalorder %v6594_v2, %v5193_v25 }
 0x205   : > { %v4264_v18 = vsel %vm3097_vm5, 1.0, %v4727_v44  ;;  %v3017_v36 = vadd.f32 %v2953_v4, %v2665_v19  ;;  %v3298_v5 = vmul.f32 %v4262_v17, %v5267_v13  ;;  %vm396_vm4 = vcmp.eq.s32.totalorder %v6722_v11, %v5193_v25 }
 0x206   : > { %v3300_v26 = vmul.f32 %v4264_v18, %v5267_v13  ;;  %v3019_v14 = vadd.f32 %v2955_v47, %v2667_v23  ;;  %v3804_v38 = vsel %vm394_vm2, 1.0, %v4727_v44  ;;  %v3806_v6 = vsel %vm396_vm4, 1.0, %v4727_v44 }
 0x207   : > { %vm746_vm3 = vcmp.eq.s32.totalorder %v6594_v2, %v5273_v20  ;;  %v3362_v29 = vadd.f32 %v3298_v5, %v3017_v36  ;;  %v597_v57 = vmul.f32 %v3804_v38, %v5239_v46  ;;  %v599_v16 = vmul.f32 %v3806_v6, %v5239_v46 }
 0x208   : > { %vm748_vm7 = vcmp.eq.s32.totalorder %v6722_v11, %v5273_v20  ;;  %v3364_v21 = vadd.f32 %v3300_v26, %v3019_v14  ;;  %v3869_v33 = vsel %vm746_vm3, 1.0, %v4727_v44  ;;  %vm1098_vm1 = vcmp.eq.s32.totalorder %v6594_v2, %v5303_v49 }
 0x209   : > { %v3871_v39 = vsel %vm748_vm7, 1.0, %v4727_v44  ;;  %v949_v34 = vmul.f32 %v3869_v33, %v5299_v45  ;;  %vm1100_vm9 = vcmp.eq.s32.totalorder %v6722_v11, %v5303_v49  ;;  %v3934_v32 = vsel %vm1098_vm1, 1.0, %v4727_v44 }
 0x20a   : > { %v951_v3 = vmul.f32 %v3871_v39, %v5299_v45  ;;  %v4467_v43 = vpack.c.bf16 %v3364_v21, %v3362_v29  ;;  %v3936_v35 = vsel %vm1100_vm9, 1.0, %v4727_v44  ;;  %v1301_v53 = vmul.f32 %v3934_v32, %v5307_v51 }
 0x20b   : > { %vm1443_vm10 = vcmp.eq.s32.totalorder %v6594_v2, %v5311_v50  ;;  %v1013_v48 = vadd.f32 %v949_v34, %v597_v57  ;;  %v1303_v52 = vmul.f32 %v3936_v35, %v5307_v51  ;;  %vm1445_vm11 = vcmp.eq.s32.totalorder %v6722_v11, %v5311_v50 }
 0x20c   : > { %v1015_v10 = vadd.f32 %v951_v3, %v599_v16  ;;  %4468 = vmatprep.subr.bf16.mxu1 %v4467_v43  ;;  %v3999_v55 = vsel %vm1443_vm10, 1.0, %v4727_v44  ;;  %v4001_v4 = vsel %vm1445_vm11, 1.0, %v4727_v44  ;;  %vm2045_vm12 = vcmp.eq.s32.totalorder %v6594_v2, %v5319_v59 }
 0x20d   : > { %vm2047_vm13 = vcmp.eq.s32.totalorder %v6722_v11, %v5319_v59  ;;  %v1365_v19 = vadd.f32 %v1301_v53, %v1013_v48  ;;  %v1646_v23 = vmul.f32 %v3999_v55, %v5315_v54  ;;  %v1648_v17 = vmul.f32 %v4001_v4, %v5315_v54 }
 0x20e   : > { %v1367_v47 = vadd.f32 %v1303_v52, %v1015_v10  ;;  %v4066_v18 = vsel %vm2045_vm12, 1.0, %v4727_v44  ;;  %v4068_v36 = vsel %vm2047_vm13, 1.0, %v4727_v44  ;;  %vm2397_vm14 = vcmp.eq.s32.totalorder %v6594_v2, %v5351_v61 }
 0x20f   : > { %vm2399_vm15 = vcmp.eq.s32.totalorder %v6722_v11, %v5351_v61  ;;  %v1710_v5 = vadd.f32 %v1646_v23, %v1365_v19  ;;  %v2248_v14 = vmul.f32 %v4066_v18, %v5347_v41  ;;  %v2250_v38 = vmul.f32 %v4068_v36, %v5347_v41 }
 0x210   : > { %v1712_v26 = vadd.f32 %v1648_v17, %v1367_v47  ;;  %v4131_v6 = vsel %vm2397_vm14, 1.0, %v4727_v44  ;;  %v4133_v29 = vsel %vm2399_vm15, 1.0, %v4727_v44  ;;  %vm2749_vm6 = vcmp.eq.s32.totalorder %v6594_v2, %v5359_v9 }
 0x211   : > { %vm2751_vm8 = vcmp.eq.s32.totalorder %v6722_v11, %v5359_v9  ;;  %v2600_v16 = vmul.f32 %v4131_v6, %v5355_v7  ;;  %v2602_v21 = vmul.f32 %v4133_v29, %v5355_v7  ;;  %v4196_v33 = vsel %vm2749_vm6, 1.0, %v4727_v44  ;;  %v1731_v29 = vld [vmem:[%s4943_s26 + $0x8] sm:$0xff] }
 0x212   : > { %v4405_v57 = vpack.c.bf16 %v1712_v26, %v1710_v5  ;;  %v4198_v39 = vsel %vm2751_vm8, 1.0, %v4727_v44  ;;  %v2952_v34 = vmul.f32 %v4196_v33, %v5365_v15  ;;  %vm3094_vm0 = vcmp.eq.s32.totalorder %v6594_v2, %v5385_v58  ;;  %1826 = vmatprep.mubr.f32.mxu0 %v1731_v29 }
 0x213   : > { %vm3096_vm5 = vcmp.eq.s32.totalorder %v6722_v11, %v5385_v58  ;;  %v2664_v3 = vadd.f32 %v2600_v16, %v2248_v14  ;;  %v2666_v32 = vadd.f32 %v2602_v21, %v2250_v38  ;;  %v2954_v43 = vmul.f32 %v4198_v39, %v5365_v15 }
 0x214   : > { %4406 = vmatpush1.bf16.msra.mxu0 %v4405_v57  ;;  %v4261_v35 = vsel %vm3094_vm0, 1.0, %v4727_v44  ;;  %v4263_v53 = vsel %vm3096_vm5, 1.0, %v4727_v44  ;;  %v6855_v10 = vadd.s32 192, %v4955_v1  ;;  %v6858_v52 = vadd.s32 200, %v4955_v1  ;;  %v4282_v57 = vld [vmem:[%s4943_s26 + $0x108] sm:$0xff] }
 0x215   : > { %v3297_v48 = vmul.f32 %v4261_v35, %v5389_v30  ;;  %v3016_v2 = vadd.f32 %v2952_v34, %v2664_v3  ;;  %v3018_v55 = vadd.f32 %v2954_v43, %v2666_v32  ;;  %v3299_v11 = vmul.f32 %v4263_v53, %v5389_v30  ;;  %3478 = vmatprep.mubr.f32.mxu1 %v4282_v57 }
 0x216   : > { %v6862_v4 = vadd.s32 208, %v4955_v1  ;;  %vm399_vm2 = vcmp.eq.s32.totalorder %v6855_v10, %v5044_v63  ;;  %vm401_vm4 = vcmp.eq.s32.totalorder %v6858_v52, %v5044_v63  ;;  %vm751_vm3 = vcmp.eq.s32.totalorder %v6855_v10, %v5048_v0 }
 0x217   : > { %vm753_vm7 = vcmp.eq.s32.totalorder %v6858_v52, %v5048_v0  ;;  %v3361_v19 = vadd.f32 %v3297_v48, %v3016_v2  ;;  %v3363_v47 = vadd.f32 %v3299_v11, %v3018_v55  ;;  %v3809_v23 = vsel %vm399_vm2, 1.0, %v4727_v44 }
 0x218   : > { %v3811_v17 = vsel %vm401_vm4, 1.0, %v4727_v44  ;;  %v602_v18 = vmul.f32 %v3809_v23, %v5025_v56  ;;  %v3874_v5 = vsel %vm751_vm3, 1.0, %v4727_v44  ;;  %v3876_v26 = vsel %vm753_vm7, 1.0, %v4727_v44 }
 0x219   : > { %v604_v36 = vmul.f32 %v3811_v17, %v5025_v56  ;;  %v4469_v14 = vpack.c.bf16 %v3363_v47, %v3361_v19  ;;  %v954_v38 = vmul.f32 %v3874_v5, %v5056_v8  ;;  %v956_v6 = vmul.f32 %v3876_v26, %v5056_v8 }
 0x21a   : > { %vm1103_vm1 = vcmp.eq.s32.totalorder %v6855_v10, %v5112_v24  ;;  %vm1105_vm9 = vcmp.eq.s32.totalorder %v6858_v52, %v5112_v24  ;;  %vm1448_vm10 = vcmp.eq.s32.totalorder %v6855_v10, %v5116_v31  ;;  %vm1450_vm11 = vcmp.eq.s32.totalorder %v6858_v52, %v5116_v31 }
 0x21b   : > { %v3939_v16 = vsel %vm1103_vm1, 1.0, %v4727_v44  ;;  %4470 = vmatpush1.bf16.msra.mxu1 %v4469_v14  ;;  %v1018_v21 = vadd.f32 %v954_v38, %v602_v18  ;;  %v1020_v33 = vadd.f32 %v956_v6, %v604_v36  ;;  %v3941_v39 = vsel %vm1105_vm9, 1.0, %v4727_v44 }
 0x21c   : > { %v1306_v34 = vmul.f32 %v3939_v16, %v5082_v27  ;;  %v1308_v3 = vmul.f32 %v3941_v39, %v5082_v27  ;;  %v4004_v32 = vsel %vm1448_vm10, 1.0, %v4727_v44  ;;  %v4006_v43 = vsel %vm1450_vm11, 1.0, %v4727_v44 }
 0x21d   : > { %vm2050_vm12 = vcmp.eq.s32.totalorder %v6855_v10, %v5197_v28  ;;  %v1651_v53 = vmul.f32 %v4004_v32, %v5101_v37  ;;  %v1653_v48 = vmul.f32 %v4006_v43, %v5101_v37  ;;  %vm2052_vm13 = vcmp.eq.s32.totalorder %v6858_v52, %v5197_v28 }
 0x21e   : > { %v1370_v35 = vadd.f32 %v1306_v34, %v1018_v21  ;;  %v1372_v2 = vadd.f32 %v1308_v3, %v1020_v33  ;;  %v4071_v55 = vsel %vm2050_vm12, 1.0, %v4727_v44  ;;  %v4073_v11 = vsel %vm2052_vm13, 1.0, %v4727_v44 }
 0x21f   : > { %vm2402_vm14 = vcmp.eq.s32.totalorder %v6855_v10, %v5228_v42  ;;  %v2253_v47 = vmul.f32 %v4071_v55, %v5177_v22  ;;  %v2255_v23 = vmul.f32 %v4073_v11, %v5177_v22  ;;  %vm2404_vm15 = vcmp.eq.s32.totalorder %v6858_v52, %v5228_v42 }
 0x220   : > { %v1715_v19 = vadd.f32 %v1651_v53, %v1370_v35  ;;  %v1717_v17 = vadd.f32 %v1653_v48, %v1372_v2  ;;  %v4136_v18 = vsel %vm2402_vm14, 1.0, %v4727_v44  ;;  %v4138_v36 = vsel %vm2404_vm15, 1.0, %v4727_v44 }
 0x221   : > { %vm2754_vm6 = vcmp.eq.s32.totalorder %v6855_v10, %v5259_v12  ;;  %v2605_v5 = vmul.f32 %v4136_v18, %v5186_v62  ;;  %v2607_v26 = vmul.f32 %v4138_v36, %v5186_v62  ;;  %vm2756_vm8 = vcmp.eq.s32.totalorder %v6858_v52, %v5259_v12 }
 0x222   : > { %v4201_v14 = vsel %vm2754_vm6, 1.0, %v4727_v44  ;;  %v4407_v38 = vpack.c.bf16 %v1717_v17, %v1715_v19  ;;  %v4203_v6 = vsel %vm2756_vm8, 1.0, %v4727_v44  ;;  %vm3099_vm0 = vcmp.eq.s32.totalorder %v6855_v10, %v5263_v60 }
 0x223   : > { %v2957_v29 = vmul.f32 %v4201_v14, %v5222_v40  ;;  %v2669_v57 = vadd.f32 %v2605_v5, %v2253_v47  ;;  %v2671_v16 = vadd.f32 %v2607_v26, %v2255_v23  ;;  %v2959_v21 = vmul.f32 %v4203_v6, %v5222_v40 }
 0x224   : > { %vm3101_vm5 = vcmp.eq.s32.totalorder %v6858_v52, %v5263_v60  ;;  %4408 = vmatprep.subr.bf16.mxu0 %v4407_v38  ;;  %v4266_v33 = vsel %vm3099_vm0, 1.0, %v4727_v44  ;;  %vm398_vm2 = vcmp.eq.s32.totalorder %v6855_v10, %v5193_v25  ;;  %vm400_vm4 = vcmp.eq.s32.totalorder %v6858_v52, %v5193_v25 }
 0x225   : > { %v4268_v39 = vsel %vm3101_vm5, 1.0, %v4727_v44  ;;  %v3021_v34 = vadd.f32 %v2957_v29, %v2669_v57  ;;  %v3023_v3 = vadd.f32 %v2959_v21, %v2671_v16  ;;  %v3302_v32 = vmul.f32 %v4266_v33, %v5267_v13 }
 0x226   : > { %v3304_v43 = vmul.f32 %v4268_v39, %v5267_v13  ;;  %v3808_v35 = vsel %vm398_vm2, 1.0, %v4727_v44  ;;  %v3810_v53 = vsel %vm400_vm4, 1.0, %v4727_v44  ;;  %vm750_vm3 = vcmp.eq.s32.totalorder %v6855_v10, %v5273_v20 }
 0x227   : > { %vm752_vm7 = vcmp.eq.s32.totalorder %v6858_v52, %v5273_v20  ;;  %v3366_v48 = vadd.f32 %v3302_v32, %v3021_v34  ;;  %v601_v55 = vmul.f32 %v3808_v35, %v5239_v46  ;;  %v603_v11 = vmul.f32 %v3810_v53, %v5239_v46 }
 0x228   : > { %v3368_v2 = vadd.f32 %v3304_v43, %v3023_v3  ;;  %v3873_v19 = vsel %vm750_vm3, 1.0, %v4727_v44  ;;  %v3875_v47 = vsel %vm752_vm7, 1.0, %v4727_v44  ;;  %vm1102_vm1 = vcmp.eq.s32.totalorder %v6855_v10, %v5303_v49 }
 0x229   : > { %vm1104_vm9 = vcmp.eq.s32.totalorder %v6858_v52, %v5303_v49  ;;  %v953_v17 = vmul.f32 %v3873_v19, %v5299_v45  ;;  %v955_v18 = vmul.f32 %v3875_v47, %v5299_v45  ;;  %v3938_v36 = vsel %vm1102_vm1, 1.0, %v4727_v44 }
 0x22a   : > { %v4471_v23 = vpack.c.bf16 %v3368_v2, %v3366_v48  ;;  %v3940_v5 = vsel %vm1104_vm9, 1.0, %v4727_v44  ;;  %v1305_v26 = vmul.f32 %v3938_v36, %v5307_v51  ;;  %vm1447_vm10 = vcmp.eq.s32.totalorder %v6855_v10, %v5311_v50 }
 0x22b   : > { %vm1449_vm11 = vcmp.eq.s32.totalorder %v6858_v52, %v5311_v50  ;;  %v1017_v14 = vadd.f32 %v953_v17, %v601_v55  ;;  %v1019_v38 = vadd.f32 %v955_v18, %v603_v11  ;;  %v1307_v6 = vmul.f32 %v3940_v5, %v5307_v51 }
 0x22c   : > { %4472 = vmatprep.subr.bf16.mxu1 %v4471_v23  ;;  %v4003_v29 = vsel %vm1447_vm10, 1.0, %v4727_v44  ;;  %v4005_v57 = vsel %vm1449_vm11, 1.0, %v4727_v44  ;;  %vm2049_vm12 = vcmp.eq.s32.totalorder %v6855_v10, %v5319_v59  ;;  %vm2051_vm13 = vcmp.eq.s32.totalorder %v6858_v52, %v5319_v59 }
 0x22d   : > { %v1650_v16 = vmul.f32 %v4003_v29, %v5315_v54  ;;  %v1369_v21 = vadd.f32 %v1305_v26, %v1017_v14  ;;  %v1371_v33 = vadd.f32 %v1307_v6, %v1019_v38  ;;  %v1652_v39 = vmul.f32 %v4005_v57, %v5315_v54 }
 0x22e   : > { %v4070_v34 = vsel %vm2049_vm12, 1.0, %v4727_v44  ;;  %v4072_v3 = vsel %vm2051_vm13, 1.0, %v4727_v44  ;;  %vm2401_vm14 = vcmp.eq.s32.totalorder %v6855_v10, %v5351_v61  ;;  %vm2403_vm15 = vcmp.eq.s32.totalorder %v6858_v52, %v5351_v61 }
 0x22f   : > { %v2252_v32 = vmul.f32 %v4070_v34, %v5347_v41  ;;  %v1714_v43 = vadd.f32 %v1650_v16, %v1369_v21  ;;  %v1716_v35 = vadd.f32 %v1652_v39, %v1371_v33  ;;  %v2254_v53 = vmul.f32 %v4072_v3, %v5347_v41 }
 0x230   : > { %v4135_v48 = vsel %vm2401_vm14, 1.0, %v4727_v44  ;;  %v4137_v2 = vsel %vm2403_vm15, 1.0, %v4727_v44  ;;  %vm2753_vm6 = vcmp.eq.s32.totalorder %v6855_v10, %v5359_v9  ;;  %vm2755_vm8 = vcmp.eq.s32.totalorder %v6858_v52, %v5359_v9 }
 0x231   : > { %v2604_v55 = vmul.f32 %v4135_v48, %v5355_v7  ;;  %v4409_v11 = vpack.c.bf16 %v1716_v35, %v1714_v43  ;;  %v2606_v19 = vmul.f32 %v4137_v2, %v5355_v7  ;;  %v4200_v47 = vsel %vm2753_vm6, 1.0, %v4727_v44 }
 0x232   : > { %v4202_v23 = vsel %vm2755_vm8, 1.0, %v4727_v44  ;;  %v2956_v18 = vmul.f32 %v4200_v47, %v5365_v15  ;;  %vm3098_vm0 = vcmp.eq.s32.totalorder %v6855_v10, %v5385_v58  ;;  %vm3100_vm5 = vcmp.eq.s32.totalorder %v6858_v52, %v5385_v58 }
 0x233   : > { %v2668_v17 = vadd.f32 %v2604_v55, %v2252_v32  ;;  %v2958_v36 = vmul.f32 %v4202_v23, %v5365_v15  ;;  %4410 = vmatpush1.bf16.msra.mxu0 %v4409_v11  ;;  %v2670_v5 = vadd.f32 %v2606_v19, %v2254_v53  ;;  %v4265_v26 = vsel %vm3098_vm0, 1.0, %v4727_v44 }
 0x234   : > { %v6992_v14 = vadd.s32 216, %v4955_v1  ;;  %v4267_v6 = vsel %vm3100_vm5, 1.0, %v4727_v44  ;;  %v3301_v29 = vmul.f32 %v4265_v26, %v5389_v30  ;;  %vm403_vm2 = vcmp.eq.s32.totalorder %v6862_v4, %v5044_v63 }
 0x235   : > { %v3020_v38 = vadd.f32 %v2956_v18, %v2668_v17  ;;  %v3022_v57 = vadd.f32 %v2958_v36, %v2670_v5  ;;  %v3303_v10 = vmul.f32 %v4267_v6, %v5389_v30  ;;  %v3813_v52 = vsel %vm403_vm2, 1.0, %v4727_v44 }
 0x236   : > { %vm405_vm4 = vcmp.eq.s32.totalorder %v6992_v14, %v5044_v63  ;;  %v606_v33 = vmul.f32 %v3813_v52, %v5025_v56  ;;  %vm755_vm3 = vcmp.eq.s32.totalorder %v6862_v4, %v5048_v0  ;;  %vm757_vm7 = vcmp.eq.s32.totalorder %v6992_v14, %v5048_v0 }
 0x237   : > { %v3365_v16 = vadd.f32 %v3301_v29, %v3020_v38  ;;  %v3815_v21 = vsel %vm405_vm4, 1.0, %v4727_v44  ;;  %v3367_v39 = vadd.f32 %v3303_v10, %v3022_v57  ;;  %v3878_v3 = vsel %vm755_vm3, 1.0, %v4727_v44 }
 0x238   : > { %v608_v34 = vmul.f32 %v3815_v21, %v5025_v56  ;;  %v3880_v32 = vsel %vm757_vm7, 1.0, %v4727_v44  ;;  %v958_v43 = vmul.f32 %v3878_v3, %v5056_v8  ;;  %vm1107_vm1 = vcmp.eq.s32.totalorder %v6862_v4, %v5112_v24 }
 0x239   : > { %vm1109_vm9 = vcmp.eq.s32.totalorder %v6992_v14, %v5112_v24  ;;  %v4473_v35 = vpack.c.bf16 %v3367_v39, %v3365_v16  ;;  %v960_v53 = vmul.f32 %v3880_v32, %v5056_v8  ;;  %v3943_v48 = vsel %vm1107_vm1, 1.0, %v4727_v44 }
 0x23a   : > { %v3945_v2 = vsel %vm1109_vm9, 1.0, %v4727_v44  ;;  %v1022_v55 = vadd.f32 %v958_v43, %v606_v33  ;;  %v1310_v11 = vmul.f32 %v3943_v48, %v5082_v27  ;;  %vm1452_vm10 = vcmp.eq.s32.totalorder %v6862_v4, %v5116_v31 }
 0x23b   : > { %v1312_v19 = vmul.f32 %v3945_v2, %v5082_v27  ;;  %4474 = vmatpush1.bf16.msra.mxu1 %v4473_v35  ;;  %v1024_v47 = vadd.f32 %v960_v53, %v608_v34  ;;  %vm1454_vm11 = vcmp.eq.s32.totalorder %v6992_v14, %v5116_v31  ;;  %v4008_v23 = vsel %vm1452_vm10, 1.0, %v4727_v44 }
 0x23c   : > { %vm2054_vm12 = vcmp.eq.s32.totalorder %v6862_v4, %v5197_v28  ;;  %v1374_v17 = vadd.f32 %v1310_v11, %v1022_v55  ;;  %v4010_v18 = vsel %vm1454_vm11, 1.0, %v4727_v44  ;;  %v1655_v36 = vmul.f32 %v4008_v23, %v5101_v37 }
 0x23d   : > { %vm2056_vm13 = vcmp.eq.s32.totalorder %v6992_v14, %v5197_v28  ;;  %v1376_v5 = vadd.f32 %v1312_v19, %v1024_v47  ;;  %v1657_v26 = vmul.f32 %v4010_v18, %v5101_v37  ;;  %v4075_v38 = vsel %vm2054_vm12, 1.0, %v4727_v44 }
 0x23e   : > { %v4077_v6 = vsel %vm2056_vm13, 1.0, %v4727_v44  ;;  %v1719_v29 = vadd.f32 %v1655_v36, %v1374_v17  ;;  %v2257_v57 = vmul.f32 %v4075_v38, %v5177_v22  ;;  %vm2406_vm14 = vcmp.eq.s32.totalorder %v6862_v4, %v5228_v42 }
 0x23f   : > { %v2259_v10 = vmul.f32 %v4077_v6, %v5177_v22  ;;  %v1721_v52 = vadd.f32 %v1657_v26, %v1376_v5  ;;  %vm2408_vm15 = vcmp.eq.s32.totalorder %v6992_v14, %v5228_v42  ;;  %v4140_v16 = vsel %vm2406_vm14, 1.0, %v4727_v44 }
 0x240   : > { %vm2758_vm6 = vcmp.eq.s32.totalorder %v6862_v4, %v5259_v12  ;;  %v4142_v21 = vsel %vm2408_vm15, 1.0, %v4727_v44  ;;  %v2609_v33 = vmul.f32 %v4140_v16, %v5186_v62  ;;  %vm2760_vm8 = vcmp.eq.s32.totalorder %v6992_v14, %v5259_v12 }
 0x241   : > { %v4205_v39 = vsel %vm2758_vm6, 1.0, %v4727_v44  ;;  %v4411_v34 = vpack.c.bf16 %v1721_v52, %v1719_v29  ;;  %v2611_v3 = vmul.f32 %v4142_v21, %v5186_v62  ;;  %v4207_v32 = vsel %vm2760_vm8, 1.0, %v4727_v44 }
 0x242   : > { %v2961_v43 = vmul.f32 %v4205_v39, %v5222_v40  ;;  %v2673_v35 = vadd.f32 %v2609_v33, %v2257_v57  ;;  %v2963_v53 = vmul.f32 %v4207_v32, %v5222_v40  ;;  %vm3103_vm0 = vcmp.eq.s32.totalorder %v6862_v4, %v5263_v60 }
 0x243   : > { %vm3105_vm5 = vcmp.eq.s32.totalorder %v6992_v14, %v5263_v60  ;;  %4412 = vmatprep.subr.bf16.mxu0 %v4411_v34  ;;  %v2675_v48 = vadd.f32 %v2611_v3, %v2259_v10  ;;  %v4270_v2 = vsel %vm3103_vm0, 1.0, %v4727_v44  ;;  %vm402_vm2 = vcmp.eq.s32.totalorder %v6862_v4, %v5193_v25 }
 0x244   : > { %v4272_v55 = vsel %vm3105_vm5, 1.0, %v4727_v44  ;;  %v3025_v11 = vadd.f32 %v2961_v43, %v2673_v35  ;;  %v3306_v19 = vmul.f32 %v4270_v2, %v5267_v13  ;;  %vm404_vm4 = vcmp.eq.s32.totalorder %v6992_v14, %v5193_v25 }
 0x245   : > { %v3308_v47 = vmul.f32 %v4272_v55, %v5267_v13  ;;  %v3027_v23 = vadd.f32 %v2963_v53, %v2675_v48  ;;  %v3812_v17 = vsel %vm402_vm2, 1.0, %v4727_v44  ;;  %v3814_v18 = vsel %vm404_vm4, 1.0, %v4727_v44 }
 0x246   : > { %vm754_vm3 = vcmp.eq.s32.totalorder %v6862_v4, %v5273_v20  ;;  %v3370_v36 = vadd.f32 %v3306_v19, %v3025_v11  ;;  %v605_v5 = vmul.f32 %v3812_v17, %v5239_v46  ;;  %v607_v26 = vmul.f32 %v3814_v18, %v5239_v46 }
 0x247   : > { %vm756_vm7 = vcmp.eq.s32.totalorder %v6992_v14, %v5273_v20  ;;  %v3372_v38 = vadd.f32 %v3308_v47, %v3027_v23  ;;  %v3877_v6 = vsel %vm754_vm3, 1.0, %v4727_v44  ;;  %vm1106_vm1 = vcmp.eq.s32.totalorder %v6862_v4, %v5303_v49 }
 0x248   : > { %v3879_v29 = vsel %vm756_vm7, 1.0, %v4727_v44  ;;  %v957_v57 = vmul.f32 %v3877_v6, %v5299_v45  ;;  %vm1108_vm9 = vcmp.eq.s32.totalorder %v6992_v14, %v5303_v49  ;;  %v3942_v52 = vsel %vm1106_vm1, 1.0, %v4727_v44 }
 0x249   : > { %v959_v10 = vmul.f32 %v3879_v29, %v5299_v45  ;;  %v4475_v16 = vpack.c.bf16 %v3372_v38, %v3370_v36  ;;  %v3944_v21 = vsel %vm1108_vm9, 1.0, %v4727_v44  ;;  %v1309_v33 = vmul.f32 %v3942_v52, %v5307_v51 }
 0x24a   : > { %vm1451_vm10 = vcmp.eq.s32.totalorder %v6862_v4, %v5311_v50  ;;  %v1021_v39 = vadd.f32 %v957_v57, %v605_v5  ;;  %v1311_v3 = vmul.f32 %v3944_v21, %v5307_v51  ;;  %vm1453_vm11 = vcmp.eq.s32.totalorder %v6992_v14, %v5311_v50 }
 0x24b   : > { %v1023_v34 = vadd.f32 %v959_v10, %v607_v26  ;;  %4476 = vmatprep.subr.bf16.mxu1 %v4475_v16  ;;  %v4007_v32 = vsel %vm1451_vm10, 1.0, %v4727_v44  ;;  %v4009_v43 = vsel %vm1453_vm11, 1.0, %v4727_v44  ;;  %vm2053_vm12 = vcmp.eq.s32.totalorder %v6862_v4, %v5319_v59 }
 0x24c   : > { %vm2055_vm13 = vcmp.eq.s32.totalorder %v6992_v14, %v5319_v59  ;;  %v1373_v35 = vadd.f32 %v1309_v33, %v1021_v39  ;;  %v1654_v48 = vmul.f32 %v4007_v32, %v5315_v54  ;;  %v1656_v2 = vmul.f32 %v4009_v43, %v5315_v54 }
 0x24d   : > { %v1375_v53 = vadd.f32 %v1311_v3, %v1023_v34  ;;  %v4074_v55 = vsel %vm2053_vm12, 1.0, %v4727_v44  ;;  %v4076_v11 = vsel %vm2055_vm13, 1.0, %v4727_v44  ;;  %vm2405_vm14 = vcmp.eq.s32.totalorder %v6862_v4, %v5351_v61 }
 0x24e   : > { %vm2407_vm15 = vcmp.eq.s32.totalorder %v6992_v14, %v5351_v61  ;;  %v1718_v19 = vadd.f32 %v1654_v48, %v1373_v35  ;;  %v2256_v23 = vmul.f32 %v4074_v55, %v5347_v41  ;;  %v2258_v17 = vmul.f32 %v4076_v11, %v5347_v41 }
 0x24f   : > { %v1720_v47 = vadd.f32 %v1656_v2, %v1375_v53  ;;  %v4139_v18 = vsel %vm2405_vm14, 1.0, %v4727_v44  ;;  %v4141_v36 = vsel %vm2407_vm15, 1.0, %v4727_v44  ;;  %vm2757_vm6 = vcmp.eq.s32.totalorder %v6862_v4, %v5359_v9 }
 0x250   : > { %vm2759_vm8 = vcmp.eq.s32.totalorder %v6992_v14, %v5359_v9  ;;  %v2608_v26 = vmul.f32 %v4139_v18, %v5355_v7  ;;  %v2610_v38 = vmul.f32 %v4141_v36, %v5355_v7  ;;  %v4204_v6 = vsel %vm2757_vm6, 1.0, %v4727_v44 }
 0x251   : > { %v4413_v5 = vpack.c.bf16 %v1720_v47, %v1718_v19  ;;  %v4206_v29 = vsel %vm2759_vm8, 1.0, %v4727_v44  ;;  %v2960_v57 = vmul.f32 %v4204_v6, %v5365_v15  ;;  %vm3102_vm0 = vcmp.eq.s32.totalorder %v6862_v4, %v5385_v58 }
 0x252   : > { %vm3104_vm5 = vcmp.eq.s32.totalorder %v6992_v14, %v5385_v58  ;;  %v2672_v10 = vadd.f32 %v2608_v26, %v2256_v23  ;;  %v2674_v52 = vadd.f32 %v2610_v38, %v2258_v17  ;;  %v2962_v16 = vmul.f32 %v4206_v29, %v5365_v15 }
 0x253   : > { %4414 = vmatpush1.bf16.msra.mxu0 %v4413_v5  ;;  %v4269_v21 = vsel %vm3102_vm0, 1.0, %v4727_v44  ;;  %v4271_v33 = vsel %vm3104_vm5, 1.0, %v4727_v44  ;;  %v7125_v34 = vadd.s32 224, %v4955_v1  ;;  %v7128_v3 = vadd.s32 232, %v4955_v1 }
 0x254   : > { %v3305_v39 = vmul.f32 %v4269_v21, %v5389_v30  ;;  %v3024_v4 = vadd.f32 %v2960_v57, %v2672_v10  ;;  %v3026_v32 = vadd.f32 %v2962_v16, %v2674_v52  ;;  %v3307_v14 = vmul.f32 %v4271_v33, %v5389_v30 }
 0x255   : > { %v7132_v43 = vadd.s32 240, %v4955_v1  ;;  %vm407_vm2 = vcmp.eq.s32.totalorder %v7125_v34, %v5044_v63  ;;  %vm409_vm4 = vcmp.eq.s32.totalorder %v7128_v3, %v5044_v63  ;;  %vm759_vm3 = vcmp.eq.s32.totalorder %v7125_v34, %v5048_v0 }
 0x256   : > { %vm761_vm7 = vcmp.eq.s32.totalorder %v7128_v3, %v5048_v0  ;;  %v3369_v35 = vadd.f32 %v3305_v39, %v3024_v4  ;;  %v3371_v53 = vadd.f32 %v3307_v14, %v3026_v32  ;;  %v3817_v48 = vsel %vm407_vm2, 1.0, %v4727_v44 }
 0x257   : > { %v3819_v2 = vsel %vm409_vm4, 1.0, %v4727_v44  ;;  %v610_v55 = vmul.f32 %v3817_v48, %v5025_v56  ;;  %v3882_v19 = vsel %vm759_vm3, 1.0, %v4727_v44  ;;  %v3884_v47 = vsel %vm761_vm7, 1.0, %v4727_v44 }
 0x258   : > { %v612_v11 = vmul.f32 %v3819_v2, %v5025_v56  ;;  %v4477_v23 = vpack.c.bf16 %v3371_v53, %v3369_v35  ;;  %v962_v17 = vmul.f32 %v3882_v19, %v5056_v8  ;;  %v964_v18 = vmul.f32 %v3884_v47, %v5056_v8 }
 0x259   : > { %vm1111_vm1 = vcmp.eq.s32.totalorder %v7125_v34, %v5112_v24  ;;  %vm1113_vm9 = vcmp.eq.s32.totalorder %v7128_v3, %v5112_v24  ;;  %vm1456_vm10 = vcmp.eq.s32.totalorder %v7125_v34, %v5116_v31  ;;  %vm1458_vm11 = vcmp.eq.s32.totalorder %v7128_v3, %v5116_v31 }
 0x25a   : > { %v3947_v36 = vsel %vm1111_vm1, 1.0, %v4727_v44  ;;  %4478 = vmatpush1.bf16.msra.mxu1 %v4477_v23  ;;  %v1026_v5 = vadd.f32 %v962_v17, %v610_v55  ;;  %v1028_v26 = vadd.f32 %v964_v18, %v612_v11  ;;  %v3949_v38 = vsel %vm1113_vm9, 1.0, %v4727_v44 }
 0x25b   : > { %v1314_v6 = vmul.f32 %v3947_v36, %v5082_v27  ;;  %v1316_v29 = vmul.f32 %v3949_v38, %v5082_v27  ;;  %v4012_v57 = vsel %vm1456_vm10, 1.0, %v4727_v44  ;;  %v4014_v10 = vsel %vm1458_vm11, 1.0, %v4727_v44 }
 0x25c   : > { %vm2058_vm12 = vcmp.eq.s32.totalorder %v7125_v34, %v5197_v28  ;;  %v1659_v16 = vmul.f32 %v4012_v57, %v5101_v37  ;;  %v1661_v21 = vmul.f32 %v4014_v10, %v5101_v37  ;;  %vm2060_vm13 = vcmp.eq.s32.totalorder %v7128_v3, %v5197_v28 }
 0x25d   : > { %v1378_v52 = vadd.f32 %v1314_v6, %v1026_v5  ;;  %v1380_v33 = vadd.f32 %v1316_v29, %v1028_v26  ;;  %v4079_v39 = vsel %vm2058_vm12, 1.0, %v4727_v44  ;;  %v4081_v4 = vsel %vm2060_vm13, 1.0, %v4727_v44 }
 0x25e   : > { %vm2410_vm14 = vcmp.eq.s32.totalorder %v7125_v34, %v5228_v42  ;;  %v2261_v14 = vmul.f32 %v4079_v39, %v5177_v22  ;;  %v2263_v35 = vmul.f32 %v4081_v4, %v5177_v22  ;;  %vm2412_vm15 = vcmp.eq.s32.totalorder %v7128_v3, %v5228_v42 }
 0x25f   : > { %v1723_v32 = vadd.f32 %v1659_v16, %v1378_v52  ;;  %v1725_v53 = vadd.f32 %v1661_v21, %v1380_v33  ;;  %v4144_v48 = vsel %vm2410_vm14, 1.0, %v4727_v44  ;;  %v4146_v2 = vsel %vm2412_vm15, 1.0, %v4727_v44 }
 0x260   : > { %vm2762_vm6 = vcmp.eq.s32.totalorder %v7125_v34, %v5259_v12  ;;  %v2613_v55 = vmul.f32 %v4144_v48, %v5186_v62  ;;  %v2615_v11 = vmul.f32 %v4146_v2, %v5186_v62  ;;  %vm2764_vm8 = vcmp.eq.s32.totalorder %v7128_v3, %v5259_v12 }
 0x261   : > { %v4209_v19 = vsel %vm2762_vm6, 1.0, %v4727_v44  ;;  %v4415_v47 = vpack.c.bf16 %v1725_v53, %v1723_v32  ;;  %v4211_v23 = vsel %vm2764_vm8, 1.0, %v4727_v44  ;;  %vm3107_vm0 = vcmp.eq.s32.totalorder %v7125_v34, %v5263_v60 }
 0x262   : > { %v2965_v17 = vmul.f32 %v4209_v19, %v5222_v40  ;;  %v2677_v18 = vadd.f32 %v2613_v55, %v2261_v14  ;;  %v2679_v36 = vadd.f32 %v2615_v11, %v2263_v35  ;;  %v2967_v5 = vmul.f32 %v4211_v23, %v5222_v40 }
 0x263   : > { %vm3109_vm5 = vcmp.eq.s32.totalorder %v7128_v3, %v5263_v60  ;;  %4416 = vmatprep.subr.bf16.mxu0 %v4415_v47  ;;  %v4274_v26 = vsel %vm3107_vm0, 1.0, %v4727_v44  ;;  %vm406_vm2 = vcmp.eq.s32.totalorder %v7125_v34, %v5193_v25  ;;  %vm408_vm4 = vcmp.eq.s32.totalorder %v7128_v3, %v5193_v25 }
 0x264   : > { %v4276_v38 = vsel %vm3109_vm5, 1.0, %v4727_v44  ;;  %v3029_v6 = vadd.f32 %v2965_v17, %v2677_v18  ;;  %v3031_v29 = vadd.f32 %v2967_v5, %v2679_v36  ;;  %v3310_v57 = vmul.f32 %v4274_v26, %v5267_v13 }
 0x265   : > { %v3312_v10 = vmul.f32 %v4276_v38, %v5267_v13  ;;  %v3816_v52 = vsel %vm406_vm2, 1.0, %v4727_v44  ;;  %v3818_v16 = vsel %vm408_vm4, 1.0, %v4727_v44  ;;  %vm758_vm3 = vcmp.eq.s32.totalorder %v7125_v34, %v5273_v20 }
 0x266   : > { %vm760_vm7 = vcmp.eq.s32.totalorder %v7128_v3, %v5273_v20  ;;  %v3374_v21 = vadd.f32 %v3310_v57, %v3029_v6  ;;  %v609_v39 = vmul.f32 %v3816_v52, %v5239_v46  ;;  %v611_v4 = vmul.f32 %v3818_v16, %v5239_v46 }
 0x267   : > { %v3376_v33 = vadd.f32 %v3312_v10, %v3031_v29  ;;  %v3881_v32 = vsel %vm758_vm3, 1.0, %v4727_v44  ;;  %v3883_v14 = vsel %vm760_vm7, 1.0, %v4727_v44  ;;  %vm1110_vm1 = vcmp.eq.s32.totalorder %v7125_v34, %v5303_v49 }
 0x268   : > { %vm1112_vm9 = vcmp.eq.s32.totalorder %v7128_v3, %v5303_v49  ;;  %v961_v53 = vmul.f32 %v3881_v32, %v5299_v45  ;;  %v963_v48 = vmul.f32 %v3883_v14, %v5299_v45  ;;  %v3946_v2 = vsel %vm1110_vm1, 1.0, %v4727_v44 }
 0x269   : > { %v4479_v35 = vpack.c.bf16 %v3376_v33, %v3374_v21  ;;  %v3948_v55 = vsel %vm1112_vm9, 1.0, %v4727_v44  ;;  %v1313_v11 = vmul.f32 %v3946_v2, %v5307_v51  ;;  %vm1455_vm10 = vcmp.eq.s32.totalorder %v7125_v34, %v5311_v50 }
 0x26a   : > { %vm1457_vm11 = vcmp.eq.s32.totalorder %v7128_v3, %v5311_v50  ;;  %v1025_v19 = vadd.f32 %v961_v53, %v609_v39  ;;  %v1027_v47 = vadd.f32 %v963_v48, %v611_v4  ;;  %v1315_v23 = vmul.f32 %v3948_v55, %v5307_v51 }
 0x26b   : > { %4480 = vmatprep.subr.bf16.mxu1 %v4479_v35  ;;  %v4011_v17 = vsel %vm1455_vm10, 1.0, %v4727_v44  ;;  %v4013_v18 = vsel %vm1457_vm11, 1.0, %v4727_v44  ;;  %vm2057_vm12 = vcmp.eq.s32.totalorder %v7125_v34, %v5319_v59  ;;  %vm2059_vm13 = vcmp.eq.s32.totalorder %v7128_v3, %v5319_v59 }
 0x26c   : > { %v1658_v36 = vmul.f32 %v4011_v17, %v5315_v54  ;;  %v1377_v5 = vadd.f32 %v1313_v11, %v1025_v19  ;;  %v1379_v26 = vadd.f32 %v1315_v23, %v1027_v47  ;;  %v1660_v38 = vmul.f32 %v4013_v18, %v5315_v54 }
 0x26d   : > { %v4078_v6 = vsel %vm2057_vm12, 1.0, %v4727_v44  ;;  %v4080_v29 = vsel %vm2059_vm13, 1.0, %v4727_v44  ;;  %vm2409_vm14 = vcmp.eq.s32.totalorder %v7125_v34, %v5351_v61  ;;  %vm2411_vm15 = vcmp.eq.s32.totalorder %v7128_v3, %v5351_v61 }
 0x26e   : > { %v2260_v57 = vmul.f32 %v4078_v6, %v5347_v41  ;;  %v1722_v10 = vadd.f32 %v1658_v36, %v1377_v5  ;;  %v1724_v52 = vadd.f32 %v1660_v38, %v1379_v26  ;;  %v2262_v16 = vmul.f32 %v4080_v29, %v5347_v41 }
 0x26f   : > { %v4143_v21 = vsel %vm2409_vm14, 1.0, %v4727_v44  ;;  %v4145_v33 = vsel %vm2411_vm15, 1.0, %v4727_v44  ;;  %vm2761_vm6 = vcmp.eq.s32.totalorder %v7125_v34, %v5359_v9  ;;  %vm2763_vm8 = vcmp.eq.s32.totalorder %v7128_v3, %v5359_v9 }
 0x270   : > { %v2612_v39 = vmul.f32 %v4143_v21, %v5355_v7  ;;  %v4417_v4 = vpack.c.bf16 %v1724_v52, %v1722_v10  ;;  %v2614_v32 = vmul.f32 %v4145_v33, %v5355_v7  ;;  %v4208_v14 = vsel %vm2761_vm6, 1.0, %v4727_v44 }
 0x271   : > { %v4210_v35 = vsel %vm2763_vm8, 1.0, %v4727_v44  ;;  %v2964_v48 = vmul.f32 %v4208_v14, %v5365_v15  ;;  %vm3106_vm0 = vcmp.eq.s32.totalorder %v7125_v34, %v5385_v58  ;;  %vm3108_vm5 = vcmp.eq.s32.totalorder %v7128_v3, %v5385_v58 }
 0x272   : > { %v2676_v53 = vadd.f32 %v2612_v39, %v2260_v57  ;;  %v2966_v2 = vmul.f32 %v4210_v35, %v5365_v15  ;;  %4418 = vmatpush1.bf16.msra.mxu0 %v4417_v4  ;;  %v2678_v55 = vadd.f32 %v2614_v32, %v2262_v16  ;;  %v4273_v11 = vsel %vm3106_vm0, 1.0, %v4727_v44 }
 0x273   : > { %v7260_v19 = vadd.s32 248, %v4955_v1  ;;  %v4275_v23 = vsel %vm3108_vm5, 1.0, %v4727_v44  ;;  %v3309_v17 = vmul.f32 %v4273_v11, %v5389_v30  ;;  %vm411_vm2 = vcmp.eq.s32.totalorder %v7132_v43, %v5044_v63 }
 0x274   : > { %v3028_v47 = vadd.f32 %v2964_v48, %v2676_v53  ;;  %v3030_v18 = vadd.f32 %v2966_v2, %v2678_v55  ;;  %v3311_v34 = vmul.f32 %v4275_v23, %v5389_v30  ;;  %v3821_v3 = vsel %vm411_vm2, 1.0, %v4727_v44 }
 0x275   : > { %vm413_vm4 = vcmp.eq.s32.totalorder %v7260_v19, %v5044_v63  ;;  %v614_v5 = vmul.f32 %v3821_v3, %v5025_v56  ;;  %vm763_vm3 = vcmp.eq.s32.totalorder %v7132_v43, %v5048_v0  ;;  %vm765_vm7 = vcmp.eq.s32.totalorder %v7260_v19, %v5048_v0 }
 0x276   : > { %v3373_v36 = vadd.f32 %v3309_v17, %v3028_v47  ;;  %v3823_v1 = vsel %vm413_vm4, 1.0, %v4727_v44  ;;  %v3375_v26 = vadd.f32 %v3311_v34, %v3030_v18  ;;  %v3886_v6 = vsel %vm763_vm3, 1.0, %v4727_v44 }
 0x277   : > { %v616_v38 = vmul.f32 %v3823_v1, %v5025_v56  ;;  %v3888_v63 = vsel %vm765_vm7, 1.0, %v4727_v44  ;;  %v966_v29 = vmul.f32 %v3886_v6, %v5056_v8  ;;  %vm1115_vm1 = vcmp.eq.s32.totalorder %v7132_v43, %v5112_v24 }
 0x278   : > { %vm1117_vm9 = vcmp.eq.s32.totalorder %v7260_v19, %v5112_v24  ;;  %v4481_v57 = vpack.c.bf16 %v3375_v26, %v3373_v36  ;;  %v968_v10 = vmul.f32 %v3888_v63, %v5056_v8  ;;  %v3951_v56 = vsel %vm1115_vm1, 1.0, %v4727_v44 }
 0x279   : > { %v3953_v52 = vsel %vm1117_vm9, 1.0, %v4727_v44  ;;  %v1030_v0 = vadd.f32 %v966_v29, %v614_v5  ;;  %v1318_v16 = vmul.f32 %v3951_v56, %v5082_v27  ;;  %vm1460_vm10 = vcmp.eq.s32.totalorder %v7132_v43, %v5116_v31 }
 0x27a   : > { %v1320_v21 = vmul.f32 %v3953_v52, %v5082_v27  ;;  %4482 = vmatpush1.bf16.msra.mxu1 %v4481_v57  ;;  %v1032_v33 = vadd.f32 %v968_v10, %v616_v38  ;;  %vm1462_vm11 = vcmp.eq.s32.totalorder %v7260_v19, %v5116_v31  ;;  %v4016_v24 = vsel %vm1460_vm10, 1.0, %v4727_v44 }
 0x27b   : > { %vm2062_vm12 = vcmp.eq.s32.totalorder %v7132_v43, %v5197_v28  ;;  %v1382_v8 = vadd.f32 %v1318_v16, %v1030_v0  ;;  %v4018_v39 = vsel %vm1462_vm11, 1.0, %v4727_v44  ;;  %v1663_v4 = vmul.f32 %v4016_v24, %v5101_v37 }
 0x27c   : > { %vm2064_vm13 = vcmp.eq.s32.totalorder %v7260_v19, %v5197_v28  ;;  %v1384_v27 = vadd.f32 %v1320_v21, %v1032_v33  ;;  %v1665_v32 = vmul.f32 %v4018_v39, %v5101_v37  ;;  %v4083_v14 = vsel %vm2062_vm12, 1.0, %v4727_v44 }
 0x27d   : > { %v4085_v31 = vsel %vm2064_vm13, 1.0, %v4727_v44  ;;  %v1727_v35 = vadd.f32 %v1663_v4, %v1382_v8  ;;  %v2265_v53 = vmul.f32 %v4083_v14, %v5177_v22  ;;  %vm2414_vm14 = vcmp.eq.s32.totalorder %v7132_v43, %v5228_v42 }
 0x27e   : > { %v2267_v48 = vmul.f32 %v4085_v31, %v5177_v22  ;;  %v1729_v2 = vadd.f32 %v1665_v32, %v1384_v27  ;;  %vm2416_vm15 = vcmp.eq.s32.totalorder %v7260_v19, %v5228_v42  ;;  %v4148_v28 = vsel %vm2414_vm14, 1.0, %v4727_v44 }
 0x27f   : > { %vm2766_vm6 = vcmp.eq.s32.totalorder %v7132_v43, %v5259_v12  ;;  %v4150_v37 = vsel %vm2416_vm15, 1.0, %v4727_v44  ;;  %v2617_v55 = vmul.f32 %v4148_v28, %v5186_v62  ;;  %vm2768_vm8 = vcmp.eq.s32.totalorder %v7260_v19, %v5259_v12  ;;  %v1730_v28 = vld [vmem:[%s4943_s26] sm:$0xff] }
 0x280   : > { %v4213_v22 = vsel %vm2766_vm6, 1.0, %v4727_v44  ;;  %v4419_v11 = vpack.c.bf16 %v1729_v2, %v1727_v35  ;;  %v2619_v47 = vmul.f32 %v4150_v37, %v5186_v62  ;;  %v4215_v23 = vsel %vm2768_vm8, 1.0, %v4727_v44 }
 0x281   : > { %v2969_v42 = vmul.f32 %v4213_v22, %v5222_v40  ;;  %v2681_v17 = vadd.f32 %v2617_v55, %v2265_v53  ;;  %v2971_v18 = vmul.f32 %v4215_v23, %v5222_v40  ;;  %vm3111_vm0 = vcmp.eq.s32.totalorder %v7132_v43, %v5263_v60  ;;  %v1735_v23 = vld [vmem:[%s4943_s26 + $0x28] sm:$0xff] }
 0x282   : > { %vm3113_vm5 = vcmp.eq.s32.totalorder %v7260_v19, %v5263_v60  ;;  %4420 = vmatprep.subr.bf16.mxu0 %v4419_v11  ;;  %v2683_v12 = vadd.f32 %v2619_v47, %v2267_v48  ;;  %v4278_v34 = vsel %vm3111_vm0, 1.0, %v4727_v44  ;;  %vm410_vm2 = vcmp.eq.s32.totalorder %v7132_v43, %v5193_v25  ;;  %v1732_v47 = vld [vmem:[%s4943_s26 + $0x10] sm:$0xff] }
 0x283   : > { %v4280_v3 = vsel %vm3113_vm5, 1.0, %v4727_v44  ;;  %v3033_v62 = vadd.f32 %v2969_v42, %v2681_v17  ;;  %v3314_v36 = vmul.f32 %v4278_v34, %v5267_v13  ;;  %vm412_vm4 = vcmp.eq.s32.totalorder %v7260_v19, %v5193_v25  ;;  %v4281_v42 = vld [vmem:[%s4943_s26 + $0x100] sm:$0xff]  ;;  %v1736_v34 = vld [vmem:[%s4943_s26 + $0x30] sm:$0xff] }
 0x284   : > { %v3316_v40 = vmul.f32 %v4280_v3, %v5267_v13  ;;  %v3035_v1 = vadd.f32 %v2971_v18, %v2683_v12  ;;  %v3820_v60 = vsel %vm410_vm2, 1.0, %v4727_v44  ;;  %v3822_v5 = vsel %vm412_vm4, 1.0, %v4727_v44  ;;  %v1734_v17 = vld [vmem:[%s4943_s26 + $0x20] sm:$0xff]  ;;  %v4284_v18 = vld [vmem:[%s4943_s26 + $0x118] sm:$0xff]  ;;  %v4283_v12 = vld [vmem:[%s4943_s26 + $0x110] sm:$0xff] }
 0x285   : > { %vm762_vm3 = vcmp.eq.s32.totalorder %v7132_v43, %v5273_v20  ;;  %v3378_v26 = vadd.f32 %v3314_v36, %v3033_v62  ;;  %v613_v38 = vmul.f32 %v3820_v60, %v5239_v46  ;;  %v615_v6 = vmul.f32 %v3822_v5, %v5239_v46  ;;  %v4286_v3 = vld [vmem:[%s4943_s26 + $0x128] sm:$0xff]  ;;  %v4285_v36 = vld [vmem:[%s4943_s26 + $0x120] sm:$0xff]  ;;  %v1741_v60 = vld [vmem:[%s4943_s26 + $0x58] sm:$0xff] }
 0x286   : > { %vm764_vm7 = vcmp.eq.s32.totalorder %v7260_v19, %v5273_v20  ;;  %v3380_v13 = vadd.f32 %v3316_v40, %v3035_v1  ;;  %v3885_v63 = vsel %vm762_vm3, 1.0, %v4727_v44  ;;  %vm1114_vm1 = vcmp.eq.s32.totalorder %v7132_v43, %v5303_v49  ;;  %v1739_v62 = vld [vmem:[%s4943_s26 + $0x48] sm:$0xff]  ;;  %v1738_v40 = vld [vmem:[%s4943_s26 + $0x40] sm:$0xff]  ;;  %v4288_v1 = vld [vmem:[%s4943_s26 + $0x138] sm:$0xff] }
 0x287   : > { %v3887_v25 = vsel %vm764_vm7, 1.0, %v4727_v44  ;;  %v965_v29 = vmul.f32 %v3885_v63, %v5299_v45  ;;  %vm1116_vm9 = vcmp.eq.s32.totalorder %v7260_v19, %v5303_v49  ;;  %v3950_v46 = vsel %vm1114_vm1, 1.0, %v4727_v44  ;;  %v4287_v5 = vld [vmem:[%s4943_s26 + $0x130] sm:$0xff]  ;;  %v1742_v63 = vld [vmem:[%s4943_s26 + $0x60] sm:$0xff] }
 0x288   : > { %v967_v57 = vmul.f32 %v3887_v25, %v5299_v45  ;;  %v4483_v10 = vpack.c.bf16 %v3380_v13, %v3378_v26  ;;  %v3952_v20 = vsel %vm1116_vm9, 1.0, %v4727_v44  ;;  %v1317_v56 = vmul.f32 %v3950_v46, %v5307_v51  ;;  %v1740_v26 = vld [vmem:[%s4943_s26 + $0x50] sm:$0xff]  ;;  %v4289_v13 = vld [vmem:[%s4943_s26 + $0x140] sm:$0xff]  ;;  %v4292_v25 = vld [vmem:[%s4943_s26 + $0x158] sm:$0xff] }
 0x289   : > { %vm1459_vm10 = vcmp.eq.s32.totalorder %v7132_v43, %v5311_v50  ;;  %v1029_v52 = vadd.f32 %v965_v29, %v613_v38  ;;  %v1319_v16 = vmul.f32 %v3952_v20, %v5307_v51  ;;  %vm1461_vm11 = vcmp.eq.s32.totalorder %v7260_v19, %v5311_v50  ;;  %v4290_v38 = vld [vmem:[%s4943_s26 + $0x148] sm:$0xff]  ;;  %v1745_v29 = vld [vmem:[%s4943_s26 + $0x78] sm:$0xff]  ;;  %v1744_v46 = vld [vmem:[%s4943_s26 + $0x70] sm:$0xff] }
 0x28a   : > { %v1031_v0 = vadd.f32 %v967_v57, %v615_v6  ;;  %4484 = vmatprep.subr.bf16.mxu1 %v4483_v10  ;;  %v4015_v45 = vsel %vm1459_vm10, 1.0, %v4727_v44  ;;  %v4017_v49 = vsel %vm1461_vm11, 1.0, %v4727_v44  ;;  %vm2061_vm12 = vcmp.eq.s32.totalorder %v7132_v43, %v5319_v59  ;;  %v1743_v6 = vld [vmem:[%s4943_s26 + $0x68] sm:$0xff]  ;;  %v4291_v57 = vld [vmem:[%s4943_s26 + $0x150] sm:$0xff] }
 0x28b   : > { %vm2063_vm13 = vcmp.eq.s32.totalorder %v7260_v19, %v5319_v59  ;;  %v1381_v21 = vadd.f32 %v1317_v56, %v1029_v52  ;;  %v1662_v24 = vmul.f32 %v4015_v45, %v5315_v54  ;;  %v1664_v51 = vmul.f32 %v4017_v49, %v5315_v54  ;;  %v4294_v10 = vld [vmem:[%s4943_s26 + $0x168] sm:$0xff]  ;;  %v4293_v56 = vld [vmem:[%s4943_s26 + $0x160] sm:$0xff]  ;;  %v4295_v45 = vld [vmem:[%s4943_s26 + $0x170] sm:$0xff] }
 0x28c   : > { %v1383_v33 = vadd.f32 %v1319_v16, %v1031_v0  ;;  %v4082_v8 = vsel %vm2061_vm12, 1.0, %v4727_v44  ;;  %v4084_v50 = vsel %vm2063_vm13, 1.0, %v4727_v44  ;;  %vm2413_vm14 = vcmp.eq.s32.totalorder %v7132_v43, %v5351_v61  ;;  %v1747_v20 = vld [vmem:[%s4943_s26 + $0x88] sm:$0xff]  ;;  %v1746_v52 = vld [vmem:[%s4943_s26 + $0x80] sm:$0xff]  ;;  %v4296_v0 = vld [vmem:[%s4943_s26 + $0x178] sm:$0xff] }
 0x28d   : > { %vm2415_vm15 = vcmp.eq.s32.totalorder %v7260_v19, %v5351_v61  ;;  %v1726_v39 = vadd.f32 %v1662_v24, %v1381_v21  ;;  %v2264_v59 = vmul.f32 %v4082_v8, %v5347_v41  ;;  %v2266_v27 = vmul.f32 %v4084_v50, %v5347_v41  ;;  %v1749_v16 = vld [vmem:[%s4943_s26 + $0x98] sm:$0xff]  ;;  %v1748_v49 = vld [vmem:[%s4943_s26 + $0x90] sm:$0xff]  ;;  %v4298_v21 = vld [vmem:[%s4943_s26 + $0x188] sm:$0xff] }
 0x28e   : > { %v1728_v4 = vadd.f32 %v1664_v51, %v1383_v33  ;;  %v4147_v32 = vsel %vm2413_vm14, 1.0, %v4727_v44  ;;  %v4149_v54 = vsel %vm2415_vm15, 1.0, %v4727_v44  ;;  %vm2765_vm6 = vcmp.eq.s32.totalorder %v7132_v43, %v5359_v9  ;;  %v1751_v33 = vld [vmem:[%s4943_s26 + $0xa8] sm:$0xff]  ;;  %v4297_v24 = vld [vmem:[%s4943_s26 + $0x180] sm:$0xff]  ;;  %v4300_v8 = vld [vmem:[%s4943_s26 + $0x198] sm:$0xff] }
 0x28f   : > { %vm2767_vm8 = vcmp.eq.s32.totalorder %v7260_v19, %v5359_v9  ;;  %v2616_v61 = vmul.f32 %v4147_v32, %v5355_v7  ;;  %v2618_v31 = vmul.f32 %v4149_v54, %v5355_v7  ;;  %v4212_v35 = vsel %vm2765_vm6, 1.0, %v4727_v44  ;;  %v1750_v51 = vld [vmem:[%s4943_s26 + $0xa0] sm:$0xff]  ;;  %v1753_v50 = vld [vmem:[%s4943_s26 + $0xb8] sm:$0xff] }
 0x290   : > { %v4421_v14 = vpack.c.bf16 %v1728_v4, %v1726_v39  ;;  %v4214_v41 = vsel %vm2767_vm8, 1.0, %v4727_v44  ;;  %v2968_v53 = vmul.f32 %v4212_v35, %v5365_v15  ;;  %vm3110_vm0 = vcmp.eq.s32.totalorder %v7132_v43, %v5385_v58  ;;  %v1733_v43 = vld [vmem:[%s4943_s26 + $0x18] sm:$0xff]  ;;  %v4299_v39 = vld [vmem:[%s4943_s26 + $0x190] sm:$0xff]  ;;  %v4301_v32 = vld [vmem:[%s4943_s26 + $0x1a0] sm:$0xff] }
 0x291   : > { %vm3112_vm5 = vcmp.eq.s32.totalorder %v7260_v19, %v5385_v58  ;;  %v2680_v9 = vadd.f32 %v2616_v61, %v2264_v59  ;;  %v2682_v48 = vadd.f32 %v2618_v31, %v2266_v27  ;;  %v2970_v2 = vmul.f32 %v4214_v41, %v5365_v15  ;;  %v1752_v4 = vld [vmem:[%s4943_s26 + $0xb0] sm:$0xff]  ;;  %v4302_v59 = vld [vmem:[%s4943_s26 + $0x1a8] sm:$0xff]  ;;  %v1754_v54 = vld [vmem:[%s4943_s26 + $0xc0] sm:$0xff] }
 0x292   : > { %4422 = vmatpush1.bf16.msra.mxu0 %v4421_v14  ;;  %v4277_v7 = vsel %vm3110_vm0, 1.0, %v4727_v44  ;;  %v4279_v37 = vsel %vm3112_vm5, 1.0, %v4727_v44  ;;  %v1755_v27 = vld [vmem:[%s4943_s26 + $0xc8] sm:$0xff]  ;;  %v4304_v14 = vld [vmem:[%s4943_s26 + $0x1b8] sm:$0xff]  ;;  %v4303_v31 = vld [vmem:[%s4943_s26 + $0x1b0] sm:$0xff] }
 0x293   : > { %v3313_v55 = vmul.f32 %v4277_v7, %v5389_v30  ;;  %v3032_v22 = vadd.f32 %v2968_v53, %v2680_v9  ;;  %v3034_v58 = vadd.f32 %v2970_v2, %v2682_v48  ;;  %v3315_v19 = vmul.f32 %v4279_v37, %v5389_v30  ;;  %v1737_v30 = vld [vmem:[%s4943_s26 + $0x38] sm:$0xff]  ;;  %v1756_v35 = vld [vmem:[%s4943_s26 + $0xd0] sm:$0xff]  ;;  %v4306_v41 = vld [vmem:[%s4943_s26 + $0x1c8] sm:$0xff] }
 0x294   : > { %v1757_v61 = vld [vmem:[%s4943_s26 + $0xd8] sm:$0xff]  ;;  %v1759_v53 = vld [vmem:[%s4943_s26 + $0xe8] sm:$0xff]  ;;  %v4305_v9 = vld [vmem:[%s4943_s26 + $0x1c0] sm:$0xff] }
 0x295   : > { %1827 = vmatmul.mubr.f32.vlgmr.msra.gmra.mrb[0].mxu0 %v1730_v28  ;;  %v3377_v11 = vadd.f32 %v3313_v55, %v3032_v22  ;;  %v3379_v15 = vadd.f32 %v3315_v19, %v3034_v58  ;;  %v1758_v48 = vld [vmem:[%s4943_s26 + $0xe0] sm:$0xff]  ;;  %v4308_v2 = vld [vmem:[%s4943_s26 + $0x1d8] sm:$0xff]  ;;  %v4307_v28 = vld [vmem:[%s4943_s26 + $0x1d0] sm:$0xff] }
 0x296   : > { %1832 = vmatprep.mubr.f32.mxu0 %v1733_v43  ;;  %v1761_v7 = vld [vmem:[%s4943_s26 + $0xf8] sm:$0xff]  ;;  %v1760_v37 = vld [vmem:[%s4943_s26 + $0xf0] sm:$0xff]  ;;  %v4310_v55 = vld [vmem:[%s4943_s26 + $0x1e8] sm:$0xff] }
 0x297   : > { %v4485_v44 = vpack.c.bf16 %v3379_v15, %v3377_v11  ;;  %v4309_v43 = vld [vmem:[%s4943_s26 + $0x1e0] sm:$0xff]  ;;  %v4312_v22 = vld [vmem:[%s4943_s26 + $0x1f8] sm:$0xff]  ;;  %v4311_v58 = vld [vmem:[%s4943_s26 + $0x1f0] sm:$0xff] }
 0x299   : > { %1833 = vmatmul.mubr.f32.gmra.mrb[2].mxu0 %v1732_v47  ;;  %4486 = vmatpush1.bf16.msra.mxu1 %v4485_v44 }
 0x29a   : > { %1838 = vmatprep.mubr.f32.mxu0 %v1735_v23 }
 0x29c   : > { %3479 = vmatmul.mubr.f32.vlgmr.msra.gmra.mrb[0].mxu1 %v4281_v42 }
 0x29d   : > { %1839 = vmatmul.mubr.f32.gmra.mrb[4].mxu0 %v1734_v17  ;;  %3484 = vmatprep.mubr.f32.mxu1 %v4284_v18 }
 0x29e   : > { %1844 = vmatprep.mubr.f32.mxu0 %v1737_v30 }
 0x2a0   : > { %3485 = vmatmul.mubr.f32.gmra.mrb[2].mxu1 %v4283_v12 }
 0x2a1   : > { %1845 = vmatmul.mubr.f32.gmra.mrb[6].mxu0 %v1736_v34  ;;  %3490 = vmatprep.mubr.f32.mxu1 %v4286_v3 }
 0x2a2   : > { %1850 = vmatprep.mubr.f32.mxu0 %v1739_v62 }
 0x2a4   : > { %3491 = vmatmul.mubr.f32.gmra.mrb[4].mxu1 %v4285_v36 }
 0x2a5   : > { %1851 = vmatmul.mubr.f32.gmra.mrb[8].mxu0 %v1738_v40  ;;  %3496 = vmatprep.mubr.f32.mxu1 %v4288_v1 }
 0x2a6   : > { %1856 = vmatprep.mubr.f32.mxu0 %v1741_v60 }
 0x2a8   : > { %3497 = vmatmul.mubr.f32.gmra.mrb[6].mxu1 %v4287_v5 }
 0x2a9   : > { %1857 = vmatmul.mubr.f32.gmra.mrb[10].mxu0 %v1740_v26  ;;  %3502 = vmatprep.mubr.f32.mxu1 %v4290_v38 }
 0x2aa   : > { %1862 = vmatprep.mubr.f32.mxu0 %v1743_v6 }
 0x2ac   : > { %3503 = vmatmul.mubr.f32.gmra.mrb[8].mxu1 %v4289_v13 }
 0x2ad   : > { %1863 = vmatmul.mubr.f32.gmra.mrb[12].mxu0 %v1742_v63  ;;  %3508 = vmatprep.mubr.f32.mxu1 %v4292_v25 }
 0x2ae   : > { %1868 = vmatprep.mubr.f32.mxu0 %v1745_v29 }
 0x2b0   : > { %3509 = vmatmul.mubr.f32.gmra.mrb[10].mxu1 %v4291_v57 }
 0x2b1   : > { %1869 = vmatmul.mubr.f32.gmra.mrb[14].mxu0 %v1744_v46  ;;  %3514 = vmatprep.mubr.f32.mxu1 %v4294_v10 }
 0x2b2   : > { %1874 = vmatprep.mubr.f32.mxu0 %v1747_v20 }
 0x2b4   : > { %3515 = vmatmul.mubr.f32.gmra.mrb[12].mxu1 %v4293_v56 }
 0x2b5   : > { %1875 = vmatmul.mubr.f32.gmra.mrb[16].mxu0 %v1746_v52  ;;  %3520 = vmatprep.mubr.f32.mxu1 %v4296_v0 }
 0x2b6   : > { %1880 = vmatprep.mubr.f32.mxu0 %v1749_v16 }
 0x2b8   : > { %3521 = vmatmul.mubr.f32.gmra.mrb[14].mxu1 %v4295_v45 }
 0x2b9   : > { %1881 = vmatmul.mubr.f32.gmra.mrb[18].mxu0 %v1748_v49  ;;  %3526 = vmatprep.mubr.f32.mxu1 %v4298_v21 }
 0x2ba   : > { %1886 = vmatprep.mubr.f32.mxu0 %v1751_v33 }
 0x2bc   : > { %3527 = vmatmul.mubr.f32.gmra.mrb[16].mxu1 %v4297_v24 }
 0x2bd   : > { %1887 = vmatmul.mubr.f32.gmra.mrb[20].mxu0 %v1750_v51  ;;  %3532 = vmatprep.mubr.f32.mxu1 %v4300_v8 }
 0x2be   : > { %1892 = vmatprep.mubr.f32.mxu0 %v1753_v50 }
 0x2c0   : > { %3533 = vmatmul.mubr.f32.gmra.mrb[18].mxu1 %v4299_v39 }
 0x2c1   : > { %1893 = vmatmul.mubr.f32.gmra.mrb[22].mxu0 %v1752_v4  ;;  %3538 = vmatprep.mubr.f32.mxu1 %v4302_v59 }
 0x2c2   : > { %1898 = vmatprep.mubr.f32.mxu0 %v1755_v27 }
 0x2c4   : > { %3539 = vmatmul.mubr.f32.gmra.mrb[20].mxu1 %v4301_v32 }
 0x2c5   : > { %1899 = vmatmul.mubr.f32.gmra.mrb[24].mxu0 %v1754_v54  ;;  %3544 = vmatprep.mubr.f32.mxu1 %v4304_v14 }
 0x2c6   : > { %1904 = vmatprep.mubr.f32.mxu0 %v1757_v61 }
 0x2c8   : > { %3545 = vmatmul.mubr.f32.gmra.mrb[22].mxu1 %v4303_v31 }
 0x2c9   : > { %1905 = vmatmul.mubr.f32.gmra.mrb[26].mxu0 %v1756_v35  ;;  %3550 = vmatprep.mubr.f32.mxu1 %v4306_v41 }
 0x2ca   : > { %1910 = vmatprep.mubr.f32.mxu0 %v1759_v53 }
 0x2cc   : > { %3551 = vmatmul.mubr.f32.gmra.mrb[24].mxu1 %v4305_v9 }
 0x2cd   : > { %1911 = vmatmul.mubr.f32.gmra.mrb[28].mxu0 %v1758_v48  ;;  %3556 = vmatprep.mubr.f32.mxu1 %v4308_v2 }
 0x2ce   : > { %1916 = vmatprep.mubr.f32.mxu0 %v1761_v7 }
 0x2d0   : > { %3557 = vmatmul.mubr.f32.gmra.mrb[26].mxu1 %v4307_v28 }
 0x2d1   : > { %1917 = vmatmul.mubr.f32.gmra.mrb[30].mxu0 %v1760_v37  ;;  %3562 = vmatprep.mubr.f32.mxu1 %v4310_v55 }
 0x2d4   : > { %3563 = vmatmul.mubr.f32.gmra.mrb[28].mxu1 %v4309_v43 }
 0x2d5   : > { %3568 = vmatprep.mubr.f32.mxu1 %v4312_v22 }
 0x2d8   : > { %3569 = vmatmul.mubr.f32.gmra.mrb[30].mxu1 %v4311_v58 }
 0x368   : > { %v1828_v19 = vpop.f32.mrb[0].mxu0 }
 0x369   : > { %1923 = vst [vmem:[%s7457_s6] sm:$0xff] %v1828_v19  ;;  %v1830_v11 = vpop.f32.mrb[1].mxu0 }
 0x36a   : > { %1924 = vst [vmem:[%s7457_s6 + $0x8] sm:$0xff] %v1830_v11 }
 0x36c   : > { %v1834_v15 = vpop.f32.mrb[2].mxu0 }
 0x36d   : > { %1925 = vst [vmem:[%s7457_s6 + $0x10] sm:$0xff] %v1834_v15  ;;  %v1836_v47 = vpop.f32.mrb[3].mxu0 }
 0x36e   : > { %1926 = vst [vmem:[%s7457_s6 + $0x18] sm:$0xff] %v1836_v47 }
 0x36f   : > { %v3480_v23 = vpop.f32.mrb[0].mxu1 }
 0x370   : > { %v1840_v44 = vpop.f32.mrb[4].mxu0  ;;  %4313 = vst [vmem:[%s7457_s6 + $0x100] sm:$0xff] %v3480_v23  ;;  %v3482_v42 = vpop.f32.mrb[1].mxu1 }
 0x371   : > { %1927 = vst [vmem:[%s7457_s6 + $0x20] sm:$0xff] %v1840_v44  ;;  %v1842_v17 = vpop.f32.mrb[5].mxu0  ;;  %4314 = vst [vmem:[%s7457_s6 + $0x108] sm:$0xff] %v3482_v42 }
 0x372   : > { %1928 = vst [vmem:[%s7457_s6 + $0x28] sm:$0xff] %v1842_v17 }
 0x373   : > { %v3486_v18 = vpop.f32.mrb[2].mxu1 }
 0x374   : > { %v1846_v30 = vpop.f32.mrb[6].mxu0  ;;  %4315 = vst [vmem:[%s7457_s6 + $0x110] sm:$0xff] %v3486_v18  ;;  %v3488_v12 = vpop.f32.mrb[3].mxu1 }
 0x375   : > { %1929 = vst [vmem:[%s7457_s6 + $0x30] sm:$0xff] %v1846_v30  ;;  %v1848_v34 = vpop.f32.mrb[7].mxu0  ;;  %4316 = vst [vmem:[%s7457_s6 + $0x118] sm:$0xff] %v3488_v12 }
 0x376   : > { %1930 = vst [vmem:[%s7457_s6 + $0x38] sm:$0xff] %v1848_v34 }
 0x377   : > { %v3492_v3 = vpop.f32.mrb[4].mxu1 }
 0x378   : > { %v1852_v62 = vpop.f32.mrb[8].mxu0  ;;  %4317 = vst [vmem:[%s7457_s6 + $0x120] sm:$0xff] %v3492_v3  ;;  %v3494_v36 = vpop.f32.mrb[5].mxu1 }
 0x379   : > { %1931 = vst [vmem:[%s7457_s6 + $0x40] sm:$0xff] %v1852_v62  ;;  %v1854_v40 = vpop.f32.mrb[9].mxu0  ;;  %4318 = vst [vmem:[%s7457_s6 + $0x128] sm:$0xff] %v3494_v36 }
 0x37a   : > { %1932 = vst [vmem:[%s7457_s6 + $0x48] sm:$0xff] %v1854_v40 }
 0x37b   : > { %v3498_v1 = vpop.f32.mrb[6].mxu1 }
 0x37c   : > { %v1858_v60 = vpop.f32.mrb[10].mxu0  ;;  %4319 = vst [vmem:[%s7457_s6 + $0x130] sm:$0xff] %v3498_v1  ;;  %v3500_v5 = vpop.f32.mrb[7].mxu1 }
 0x37d   : > { %1933 = vst [vmem:[%s7457_s6 + $0x50] sm:$0xff] %v1858_v60  ;;  %v1860_v26 = vpop.f32.mrb[11].mxu0  ;;  %4320 = vst [vmem:[%s7457_s6 + $0x138] sm:$0xff] %v3500_v5 }
 0x37e   : > { %1934 = vst [vmem:[%s7457_s6 + $0x58] sm:$0xff] %v1860_v26 }
 0x37f   : > { %v3504_v38 = vpop.f32.mrb[8].mxu1 }
 0x380   : > { %v1864_v6 = vpop.f32.mrb[12].mxu0  ;;  %4321 = vst [vmem:[%s7457_s6 + $0x140] sm:$0xff] %v3504_v38  ;;  %v3506_v13 = vpop.f32.mrb[9].mxu1 }
 0x381   : > { %1935 = vst [vmem:[%s7457_s6 + $0x60] sm:$0xff] %v1864_v6  ;;  %v1866_v63 = vpop.f32.mrb[13].mxu0  ;;  %4322 = vst [vmem:[%s7457_s6 + $0x148] sm:$0xff] %v3506_v13 }
 0x382   : > { %1936 = vst [vmem:[%s7457_s6 + $0x68] sm:$0xff] %v1866_v63 }
 0x383   : > { %v3510_v25 = vpop.f32.mrb[10].mxu1 }
 0x384   : > { %v1870_v29 = vpop.f32.mrb[14].mxu0  ;;  %4323 = vst [vmem:[%s7457_s6 + $0x150] sm:$0xff] %v3510_v25  ;;  %v3512_v57 = vpop.f32.mrb[11].mxu1 }
 0x385   : > { %1937 = vst [vmem:[%s7457_s6 + $0x70] sm:$0xff] %v1870_v29  ;;  %v1872_v46 = vpop.f32.mrb[15].mxu0  ;;  %4324 = vst [vmem:[%s7457_s6 + $0x158] sm:$0xff] %v3512_v57 }
 0x386   : > { %1938 = vst [vmem:[%s7457_s6 + $0x78] sm:$0xff] %v1872_v46 }
 0x387   : > { %v3516_v10 = vpop.f32.mrb[12].mxu1 }
 0x388   : > { %v1876_v20 = vpop.f32.mrb[16].mxu0  ;;  %4325 = vst [vmem:[%s7457_s6 + $0x160] sm:$0xff] %v3516_v10  ;;  %v3518_v56 = vpop.f32.mrb[13].mxu1 }
 0x389   : > { %1939 = vst [vmem:[%s7457_s6 + $0x80] sm:$0xff] %v1876_v20  ;;  %v1878_v52 = vpop.f32.mrb[17].mxu0  ;;  %4326 = vst [vmem:[%s7457_s6 + $0x168] sm:$0xff] %v3518_v56 }
 0x38a   : > { %1940 = vst [vmem:[%s7457_s6 + $0x88] sm:$0xff] %v1878_v52 }
 0x38b   : > { %v3522_v0 = vpop.f32.mrb[14].mxu1 }
 0x38c   : > { %v1882_v16 = vpop.f32.mrb[18].mxu0  ;;  %4327 = vst [vmem:[%s7457_s6 + $0x170] sm:$0xff] %v3522_v0  ;;  %v3524_v45 = vpop.f32.mrb[15].mxu1 }
 0x38d   : > { %1941 = vst [vmem:[%s7457_s6 + $0x90] sm:$0xff] %v1882_v16  ;;  %v1884_v49 = vpop.f32.mrb[19].mxu0  ;;  %4328 = vst [vmem:[%s7457_s6 + $0x178] sm:$0xff] %v3524_v45 }
 0x38e   : > { %1942 = vst [vmem:[%s7457_s6 + $0x98] sm:$0xff] %v1884_v49 }
 0x38f   : > { %v3528_v21 = vpop.f32.mrb[16].mxu1 }
 0x390   : > { %v1888_v33 = vpop.f32.mrb[20].mxu0  ;;  %4329 = vst [vmem:[%s7457_s6 + $0x180] sm:$0xff] %v3528_v21  ;;  %v3530_v24 = vpop.f32.mrb[17].mxu1 }
 0x391   : > { %1943 = vst [vmem:[%s7457_s6 + $0xa0] sm:$0xff] %v1888_v33  ;;  %v1890_v51 = vpop.f32.mrb[21].mxu0  ;;  %4330 = vst [vmem:[%s7457_s6 + $0x188] sm:$0xff] %v3530_v24 }
 0x392   : > { %1944 = vst [vmem:[%s7457_s6 + $0xa8] sm:$0xff] %v1890_v51 }
 0x393   : > { %v3534_v8 = vpop.f32.mrb[18].mxu1 }
 0x394   : > { %v1894_v50 = vpop.f32.mrb[22].mxu0  ;;  %4331 = vst [vmem:[%s7457_s6 + $0x190] sm:$0xff] %v3534_v8  ;;  %v3536_v39 = vpop.f32.mrb[19].mxu1 }
 0x395   : > { %1945 = vst [vmem:[%s7457_s6 + $0xb0] sm:$0xff] %v1894_v50  ;;  %v1896_v4 = vpop.f32.mrb[23].mxu0  ;;  %4332 = vst [vmem:[%s7457_s6 + $0x198] sm:$0xff] %v3536_v39 }
 0x396   : > { %1946 = vst [vmem:[%s7457_s6 + $0xb8] sm:$0xff] %v1896_v4 }
 0x397   : > { %v3540_v59 = vpop.f32.mrb[20].mxu1 }
 0x398   : > { %v1900_v27 = vpop.f32.mrb[24].mxu0  ;;  %4333 = vst [vmem:[%s7457_s6 + $0x1a0] sm:$0xff] %v3540_v59  ;;  %v3542_v32 = vpop.f32.mrb[21].mxu1 }
 0x399   : > { %1947 = vst [vmem:[%s7457_s6 + $0xc0] sm:$0xff] %v1900_v27  ;;  %v1902_v54 = vpop.f32.mrb[25].mxu0  ;;  %4334 = vst [vmem:[%s7457_s6 + $0x1a8] sm:$0xff] %v3542_v32 }
 0x39a   : > { %1948 = vst [vmem:[%s7457_s6 + $0xc8] sm:$0xff] %v1902_v54 }
 0x39b   : > { %v3546_v14 = vpop.f32.mrb[22].mxu1 }
 0x39c   : > { %v1906_v61 = vpop.f32.mrb[26].mxu0  ;;  %4335 = vst [vmem:[%s7457_s6 + $0x1b0] sm:$0xff] %v3546_v14  ;;  %v3548_v31 = vpop.f32.mrb[23].mxu1 }
 0x39d   : > { %1949 = vst [vmem:[%s7457_s6 + $0xd0] sm:$0xff] %v1906_v61  ;;  %v1908_v35 = vpop.f32.mrb[27].mxu0  ;;  %4336 = vst [vmem:[%s7457_s6 + $0x1b8] sm:$0xff] %v3548_v31 }
 0x39e   : > { %1950 = vst [vmem:[%s7457_s6 + $0xd8] sm:$0xff] %v1908_v35 }
 0x39f   : > { %v3552_v41 = vpop.f32.mrb[24].mxu1 }
 0x3a0   : > { %v1912_v53 = vpop.f32.mrb[28].mxu0  ;;  %4337 = vst [vmem:[%s7457_s6 + $0x1c0] sm:$0xff] %v3552_v41  ;;  %v3554_v9 = vpop.f32.mrb[25].mxu1 }
 0x3a1   : > { %1951 = vst [vmem:[%s7457_s6 + $0xe0] sm:$0xff] %v1912_v53  ;;  %v1914_v48 = vpop.f32.mrb[29].mxu0  ;;  %4338 = vst [vmem:[%s7457_s6 + $0x1c8] sm:$0xff] %v3554_v9 }
 0x3a2   : > { %1952 = vst [vmem:[%s7457_s6 + $0xe8] sm:$0xff] %v1914_v48 }
 0x3a3   : > { %v3558_v2 = vpop.f32.mrb[26].mxu1 }
 0x3a4   : > { %v1918_v7 = vpop.f32.mrb[30].mxu0  ;;  %4339 = vst [vmem:[%s7457_s6 + $0x1d0] sm:$0xff] %v3558_v2  ;;  %v3560_v28 = vpop.f32.mrb[27].mxu1 }
 0x3a5   : > { %1953 = vst [vmem:[%s7457_s6 + $0xf0] sm:$0xff] %v1918_v7  ;;  %v1920_v37 = vpop.f32.mrb[31].mxu0  ;;  %4340 = vst [vmem:[%s7457_s6 + $0x1d8] sm:$0xff] %v3560_v28 }
 0x3a6   : > { %1954 = vst [vmem:[%s7457_s6 + $0xf8] sm:$0xff] %v1920_v37 }
 0x3a7   : > { %v3564_v55 = vpop.f32.mrb[28].mxu1 }
 0x3a8   : > { %4341 = vst [vmem:[%s7457_s6 + $0x1e0] sm:$0xff] %v3564_v55  ;;  %v3566_v43 = vpop.f32.mrb[29].mxu1 }
 0x3a9   : > { %4342 = vst [vmem:[%s7457_s6 + $0x1e8] sm:$0xff] %v3566_v43 }
 0x3ab   : > { %v3570_v22 = vpop.f32.mrb[30].mxu1 }
 0x3ac   : > { %4343 = vst [vmem:[%s7457_s6 + $0x1f0] sm:$0xff] %v3570_v22  ;;  %v3572_v58 = vpop.f32.mrb[31].mxu1 }
 0x3ad   : > { %4344 = vst [vmem:[%s7457_s6 + $0x1f8] sm:$0xff] %v3572_v58 }
 0x3ae   : > { %4661 = shalt.err (!%p4658_p10)
}
 0x3af   : > { %s4662_s11 = scalar_lea.hbm %s7526_s19, 8192  ;;  %s4666_s1 = scalar_lea.hbm %s7577_s3, 16384 }
 0x3b0   : > { %p4663_p7 = scmp.ne.s32.totalorder %s7526_s19, %s4662_s11  ;;  %p4667_p4 = scmp.lt.u32.totalorder %s7526_s19, %s7577_s3 }
 0x3b1   : > { %p4668_p1 = scmp.lt.u32.totalorder %s4666_s1, %s4662_s11  ;;  %p4670_p13 = scmp.lt.u32.totalorder %s4662_s11, %s7526_s19 }
 0x3b2   : > { %p4664_p11 = pnand %p4663_p7, %p7604_p5 }
 0x3b3   : > { %p4669_p0 = por %p4668_p1, %p4667_p4 }
 0x3b4   : > { %p4665_p2 = pneg %p4664_p11 }
 0x3b5   : > { %p4671_p6 = por %p4670_p13, %p4669_p0 }
 0x3b7   : > { %p4672_p9 = pnand %p4671_p6, %p4665_p2 }
 0x3b9   : > { %4675 = shalt.err (!%p4672_p9)
}
 0x3ba   : > { %s4729_s4 = smov 256   ;;  %s4730_s22 = smov 16  }
 0x3bb   : > { %4501 = dma.vmem_to_hbm [thread:$0]  (%p7604_p5), %s7528_s17, 8192, %s7526_s19, %s3609_s29, %s4729_s4, %s4729_s4, %s4730_s22  }
 0x3bc PF: > { %s3638_s6 = sand.u32 1, %s4706_s12   ;;  %p7605_p12 = scmp.ne.s32.totalorder %s7585_s24, 0 }
 0x3bd   : > { %p7606_p3 = scmp.ge.s32.totalorder %s4718_s15, 2  ;;  %s3639_s9 = scalar_lea.sflag [#allocation4], %s3638_s6 }
 0x3bf   : > { %p4514_p8 = pnand %p7606_p3, %p7605_p12 }
 0x3c1   : > { %4701 = dma.done.wait (!%p4514_p8), %s3639_s9, 8192  }
 0x3c2   : > { %4703 = vsyncadd (!%p4514_p8), %s3639_s9, 4294959104  ;;  %p19_p10 = scmp.ge.s32.totalorder %s4776_s18, 4   ;;  %s7607_s12 = smov %s4710_s13 }
 0x3c3   : > { %s7608_s13 = smov %s4714_s14  ;;  %s7609_s14 = smov %s4788_s21 }
 0x3c4   : > { %s7610_s15 = smov %s4776_s18  ;;  %21 = sbr.rel (!%p19_p10) target bundleno = 9 (0x9), region = 105 }
 0x3cb   :  { %3644 = vsyncpa [#allocation3], 1 }
 0x3cc   :  { %3646 = vsyncpa [#allocation3 + $0x1], 1 }
 0x3cd   :  { %3647 = vsyncpa [#allocation6], 1 }
 0x3ce   :  { %3649 = vsyncpa [#allocation6 + $0x1], 1 }
 0x3cf   :  { %3650 = vsyncpa [#allocation4], 1 }
 0x3d0   :  { %3652 = vsyncpa [#allocation4 + $0x1], 1 }

</bundles_post_ra>
